<compile_context>
chip_gen: v5e
topology: v5e:2x2
jax: 0.10.0
libtpu: 0.0.40
codegen_flags: <defaults>
</compile_context>

<pallas_src>
import functools

import jax
import jax.numpy as jnp
from jax.experimental import pallas as pl
from jax.experimental.pallas import tpu as pltpu


OUT_PAD = 128  # lane-dense padded width of the final (·, 2) output


def _mlp_kernel(x_ref, t_ref,
                w0_ref, b0_ref,
                w1_ref, b1_ref,
                w2_ref, b2_ref,
                w3_ref, b3_ref,
                o_ref):
    """One (TILE_B, ·) batch tile of the 4-layer MLP. Weights are resident."""
    x = x_ref[...]                                   # (TB, 2)  f32
    t = t_ref[...]                                   # (TB, 1)  f32

    # ---- layer 0: Linear(3, H) on the VPU (K=3 would waste the MXU) -------
    w0 = w0_ref[...].astype(jnp.float32)             # (3, H)
    h = (x[:, 0:1] * w0[0:1, :]
         + x[:, 1:2] * w0[1:2, :]
         + t * w0[2:3, :]
         + b0_ref[...])                              # (TB, H) f32
    h = jnp.maximum(h, 0.0)

    # ---- layer 1: Linear(H, H) + ReLU (MXU, bf16 operands, f32 acc) -------
    h = jnp.dot(h.astype(jnp.bfloat16), w1_ref[...],
                preferred_element_type=jnp.float32) + b1_ref[...]
    h = jnp.maximum(h, 0.0)

    # ---- layer 2: Linear(H, H) + ReLU --------------------------------------
    h = jnp.dot(h.astype(jnp.bfloat16), w2_ref[...],
                preferred_element_type=jnp.float32) + b2_ref[...]
    h = jnp.maximum(h, 0.0)

    # ---- layer 3: Linear(H, 2), zero-padded to 128 lanes -------------------
    out = jnp.dot(h.astype(jnp.bfloat16), w3_ref[...],
                  preferred_element_type=jnp.float32) + b3_ref[...]
    o_ref[...] = out.astype(o_ref.dtype)             # full unmasked vst


@functools.partial(jax.jit, static_argnames=("tile_b",))
def net_forward(x, t, params, *, tile_b=256):
    """x: (B, 2) f32, t: (B, 1) f32 -> (B, 2) f32."""
    (w0, b0), (w1, b1), (w2, b2), (w3, b3) = params
    H = w0.shape[1]
    B = x.shape[0]

    # Pad batch to a multiple of the tile (sliced off at the end).
    n_blocks = pl.cdiv(B, tile_b)
    b_pad = n_blocks * tile_b
    if b_pad != B:
        x = jnp.pad(x, ((0, b_pad - B), (0, 0)))
        t = jnp.pad(t, ((0, b_pad - B), (0, 0)))

    flops = 2 * b_pad * (3 * H + H * H + H * H + H * OUT_PAD)
    bytes_accessed = (x.size * 4 + t.size * 4 + b_pad * OUT_PAD * 4
                      + w0.size * 2 + w1.size * 2 + w2.size * 2 + w3.size * 2
                      + (b0.size + b1.size + b2.size + b3.size) * 4)

    out = pl.pallas_call(
        _mlp_kernel,
        out_shape=jax.ShapeDtypeStruct((b_pad, OUT_PAD), jnp.float32),
        grid=(n_blocks,),
        in_specs=[
            pl.BlockSpec((tile_b, 2), lambda i: (i, 0)),       # x
            pl.BlockSpec((tile_b, 1), lambda i: (i, 0)),       # t
            pl.BlockSpec((3, H), lambda i: (0, 0)),            # w0
            pl.BlockSpec((1, H), lambda i: (0, 0)),            # b0
            pl.BlockSpec((H, H), lambda i: (0, 0)),            # w1
            pl.BlockSpec((1, H), lambda i: (0, 0)),            # b1
            pl.BlockSpec((H, H), lambda i: (0, 0)),            # w2
            pl.BlockSpec((1, H), lambda i: (0, 0)),            # b2
            pl.BlockSpec((H, OUT_PAD), lambda i: (0, 0)),      # w3 (padded)
            pl.BlockSpec((1, OUT_PAD), lambda i: (0, 0)),      # b3 (padded)
        ],
        out_specs=pl.BlockSpec((tile_b, OUT_PAD), lambda i: (i, 0)),
        compiler_params=pltpu.CompilerParams(
            dimension_semantics=("parallel",),   # megacore sharding on v7x
            vmem_limit_bytes=32 * 1024 * 1024),
        cost_estimate=pl.CostEstimate(
            flops=flops, transcendentals=0, bytes_accessed=bytes_accessed),
    )(x, t, w0, b0, w1, b1, w2, b2, w3, b3)

    return out[:B, :2]


def init_params(key, nhidden=256):
    """Matches nn.Linear + kaiming_uniform_(a=0) on weights.

    Weights stored (in, out) in bfloat16 (MXU operands); biases (1, out) f32.
    The last layer is zero-padded to OUT_PAD lanes for lane-dense stores.
    """
    dims = [(3, nhidden), (nhidden, nhidden), (nhidden, nhidden), (nhidden, 2)]
    params = []
    for li, (fan_in, fan_out) in enumerate(dims):
        key, kw, kb = jax.random.split(key, 3)
        w_bound = (6.0 / fan_in) ** 0.5            # kaiming_uniform_, a=0
        w = jax.random.uniform(kw, (fan_in, fan_out), jnp.float32,
                               -w_bound, w_bound)
        b_bound = 1.0 / (fan_in ** 0.5)            # default nn.Linear bias init
        b = jax.random.uniform(kb, (1, fan_out), jnp.float32,
                               -b_bound, b_bound)
        if li == len(dims) - 1:                    # pad final layer to 128 lanes
            w = jnp.pad(w, ((0, 0), (0, OUT_PAD - fan_out)))
            b = jnp.pad(b, ((0, 0), (0, OUT_PAD - fan_out)))
        params.append((w.astype(jnp.bfloat16), b))
    return params


def net_forward_ref(x, t, params):
    """Pure-JAX reference with the same dtype strategy as the kernel."""
    (w0, b0), (w1, b1), (w2, b2), (w3, b3) = params
    xt = jnp.concatenate([x, t], axis=-1)
    h = jnp.maximum(xt @ w0.astype(jnp.float32) + b0, 0.0)
    h = jnp.maximum(jnp.dot(h.astype(jnp.bfloat16), w1,
                            preferred_element_type=jnp.float32) + b1, 0.0)
    h = jnp.maximum(jnp.dot(h.astype(jnp.bfloat16), w2,
                            preferred_element_type=jnp.float32) + b2, 0.0)
    out = jnp.dot(h.astype(jnp.bfloat16), w3,
                  preferred_element_type=jnp.float32) + b3
    return out[:, :2]


if __name__ == "__main__":
    key = jax.random.PRNGKey(0)
    k_params, k_x, k_t = jax.random.split(key, 3)

    nhidden = 256          # PyTorch module default
    batch = 512            # multiple of TILE_B; non-multiples are auto-padded
    tile_b = 256

    params = init_params(k_params, nhidden=nhidden)
    # x ~ points on a noisy circle (2-D), t ~ diffusion timestep scalar
    x = jax.random.normal(k_x, (batch, 2), jnp.float32)
    t = jax.random.uniform(k_t, (batch, 1), jnp.float32)

    out = net_forward(x, t, params, tile_b=tile_b)
    out = jax.block_until_ready(out)

    ref = net_forward_ref(x, t, params)
    assert out.shape == (batch, 2)
    assert bool(jnp.allclose(out, ref, atol=2e-2, rtol=2e-2)), \
        "mismatch vs reference"

    # Also exercise a batch that is not a multiple of the tile (pad path).
    out_small = net_forward(x[:100], t[:100], params, tile_b=tile_b)
    out_small = jax.block_until_ready(out_small)
    assert out_small.shape == (100, 2)
    assert bool(jnp.allclose(out_small, ref[:100], atol=2e-2, rtol=2e-2)), \
        "mismatch vs reference (padded batch)"

    print("KERNEL_OK")
</pallas_src>

<mosaic_0001>
module attributes {stable_mosaic.version = 11 : i64} {
  func.func @_mlp_kernel(%arg0: i32, %arg1: memref<256x2xf32, #tpu.memory_space<vmem>>, %arg2: memref<256x1xf32, #tpu.memory_space<vmem>>, %arg3: memref<3x256xbf16, #tpu.memory_space<vmem>>, %arg4: memref<1x256xf32, #tpu.memory_space<vmem>>, %arg5: memref<256x256xbf16, #tpu.memory_space<vmem>>, %arg6: memref<1x256xf32, #tpu.memory_space<vmem>>, %arg7: memref<256x256xbf16, #tpu.memory_space<vmem>>, %arg8: memref<1x256xf32, #tpu.memory_space<vmem>>, %arg9: memref<256x128xbf16, #tpu.memory_space<vmem>>, %arg10: memref<1x128xf32, #tpu.memory_space<vmem>>, %arg11: memref<256x128xf32, #tpu.memory_space<vmem>>) attributes {dimension_semantics = [#tpu.dimension_semantics<parallel>], iteration_bounds = array<i64: 2>, scalar_prefetch = 0 : i64, scratch_operands = 0 : i64, tpu.core_type = #tpu.core_type<tc>, window_params = [{transform_indices = @transform_0, window_bounds = array<i64: 256, 2>}, {transform_indices = @transform_1, window_bounds = array<i64: 256, 1>}, {pipeline_mode = #tpu.pipeline_mode<synchronous>, transform_indices = @transform_2, window_bounds = array<i64: 3, 256>}, {pipeline_mode = #tpu.pipeline_mode<synchronous>, transform_indices = @transform_3, window_bounds = array<i64: 1, 256>}, {pipeline_mode = #tpu.pipeline_mode<synchronous>, transform_indices = @transform_4, window_bounds = array<i64: 256, 256>}, {pipeline_mode = #tpu.pipeline_mode<synchronous>, transform_indices = @transform_5, window_bounds = array<i64: 1, 256>}, {pipeline_mode = #tpu.pipeline_mode<synchronous>, transform_indices = @transform_6, window_bounds = array<i64: 256, 256>}, {pipeline_mode = #tpu.pipeline_mode<synchronous>, transform_indices = @transform_7, window_bounds = array<i64: 1, 256>}, {pipeline_mode = #tpu.pipeline_mode<synchronous>, transform_indices = @transform_8, window_bounds = array<i64: 256, 128>}, {pipeline_mode = #tpu.pipeline_mode<synchronous>, transform_indices = @transform_9, window_bounds = array<i64: 1, 128>}, {transform_indices = @transform_10, window_bounds = array<i64: 256, 128>}]} {
    %c0 = arith.constant 0 : index
    %c0_0 = arith.constant 0 : index
    %0 = vector.load %arg1[%c0, %c0_0] : memref<256x2xf32, #tpu.memory_space<vmem>>, vector<256x2xf32>
    %c0_1 = arith.constant 0 : index
    %c0_2 = arith.constant 0 : index
    %1 = vector.load %arg2[%c0_1, %c0_2] : memref<256x1xf32, #tpu.memory_space<vmem>>, vector<256x1xf32>
    %c0_3 = arith.constant 0 : index
    %c0_4 = arith.constant 0 : index
    %2 = vector.load %arg3[%c0_3, %c0_4] : memref<3x256xbf16, #tpu.memory_space<vmem>>, vector<3x256xbf16>
    %3 = arith.extf %2 : vector<3x256xbf16> to vector<3x256xf32>
    %4 = vector.extract_strided_slice %0 {offsets = [0, 0], sizes = [256, 1], strides = [1, 1]} : vector<256x2xf32> to vector<256x1xf32>
    %5 = vector.extract_strided_slice %3 {offsets = [0, 0], sizes = [1, 256], strides = [1, 1]} : vector<3x256xf32> to vector<1x256xf32>
    %6 = vector.broadcast %4 : vector<256x1xf32> to vector<256x256xf32>
    %7 = vector.broadcast %5 : vector<1x256xf32> to vector<256x256xf32>
    %8 = arith.mulf %6, %7 : vector<256x256xf32>
    %9 = vector.extract_strided_slice %0 {offsets = [0, 1], sizes = [256, 1], strides = [1, 1]} : vector<256x2xf32> to vector<256x1xf32>
    %10 = vector.extract_strided_slice %3 {offsets = [1, 0], sizes = [1, 256], strides = [1, 1]} : vector<3x256xf32> to vector<1x256xf32>
    %11 = vector.broadcast %9 : vector<256x1xf32> to vector<256x256xf32>
    %12 = vector.broadcast %10 : vector<1x256xf32> to vector<256x256xf32>
    %13 = arith.mulf %11, %12 : vector<256x256xf32>
    %14 = arith.addf %8, %13 : vector<256x256xf32>
    %15 = vector.extract_strided_slice %3 {offsets = [2, 0], sizes = [1, 256], strides = [1, 1]} : vector<3x256xf32> to vector<1x256xf32>
    %16 = vector.broadcast %1 : vector<256x1xf32> to vector<256x256xf32>
    %17 = vector.broadcast %15 : vector<1x256xf32> to vector<256x256xf32>
    %18 = arith.mulf %16, %17 : vector<256x256xf32>
    %19 = arith.addf %14, %18 : vector<256x256xf32>
    %c0_5 = arith.constant 0 : index
    %c0_6 = arith.constant 0 : index
    %20 = vector.load %arg4[%c0_5, %c0_6] : memref<1x256xf32, #tpu.memory_space<vmem>>, vector<1x256xf32>
    %21 = vector.broadcast %20 : vector<1x256xf32> to vector<256x256xf32>
    %22 = arith.addf %19, %21 : vector<256x256xf32>
    %cst = arith.constant 0.000000e+00 : f32
    %23 = vector.broadcast %cst : f32 to vector<256x256xf32>
    %24 = arith.maximumf %22, %23 : vector<256x256xf32>
    %25 = arith.truncf %24 : vector<256x256xf32> to vector<256x256xbf16>
    %c0_7 = arith.constant 0 : index
    %c0_8 = arith.constant 0 : index
    %26 = vector.load %arg5[%c0_7, %c0_8] : memref<256x256xbf16, #tpu.memory_space<vmem>>, vector<256x256xbf16>
    %cst_9 = arith.constant dense<0.000000e+00> : vector<256x256xf32>
    %27 = tpu.matmul %25, %26, %cst_9 {dimension_numbers = #tpu.dot_dimension_numbers<[1], [0], [0], [1], [0, 0, 1, 1], [], []>} : vector<256x256xbf16>, vector<256x256xbf16>, vector<256x256xf32> -> vector<256x256xf32>
    %c0_10 = arith.constant 0 : index
    %c0_11 = arith.constant 0 : index
    %28 = vector.load %arg6[%c0_10, %c0_11] : memref<1x256xf32, #tpu.memory_space<vmem>>, vector<1x256xf32>
    %29 = vector.broadcast %28 : vector<1x256xf32> to vector<256x256xf32>
    %30 = arith.addf %27, %29 : vector<256x256xf32>
    %cst_12 = arith.constant 0.000000e+00 : f32
    %31 = vector.broadcast %cst_12 : f32 to vector<256x256xf32>
    %32 = arith.maximumf %30, %31 : vector<256x256xf32>
    %33 = arith.truncf %32 : vector<256x256xf32> to vector<256x256xbf16>
    %c0_13 = arith.constant 0 : index
    %c0_14 = arith.constant 0 : index
    %34 = vector.load %arg7[%c0_13, %c0_14] : memref<256x256xbf16, #tpu.memory_space<vmem>>, vector<256x256xbf16>
    %cst_15 = arith.constant dense<0.000000e+00> : vector<256x256xf32>
    %35 = tpu.matmul %33, %34, %cst_15 {dimension_numbers = #tpu.dot_dimension_numbers<[1], [0], [0], [1], [0, 0, 1, 1], [], []>} : vector<256x256xbf16>, vector<256x256xbf16>, vector<256x256xf32> -> vector<256x256xf32>
    %c0_16 = arith.constant 0 : index
    %c0_17 = arith.constant 0 : index
    %36 = vector.load %arg8[%c0_16, %c0_17] : memref<1x256xf32, #tpu.memory_space<vmem>>, vector<1x256xf32>
    %37 = vector.broadcast %36 : vector<1x256xf32> to vector<256x256xf32>
    %38 = arith.addf %35, %37 : vector<256x256xf32>
    %cst_18 = arith.constant 0.000000e+00 : f32
    %39 = vector.broadcast %cst_18 : f32 to vector<256x256xf32>
    %40 = arith.maximumf %38, %39 : vector<256x256xf32>
    %41 = arith.truncf %40 : vector<256x256xf32> to vector<256x256xbf16>
    %c0_19 = arith.constant 0 : index
    %c0_20 = arith.constant 0 : index
    %42 = vector.load %arg9[%c0_19, %c0_20] : memref<256x128xbf16, #tpu.memory_space<vmem>>, vector<256x128xbf16>
    %cst_21 = arith.constant dense<0.000000e+00> : vector<256x128xf32>
    %43 = tpu.matmul %41, %42, %cst_21 {dimension_numbers = #tpu.dot_dimension_numbers<[1], [0], [0], [1], [0, 0, 1, 1], [], []>} : vector<256x256xbf16>, vector<256x128xbf16>, vector<256x128xf32> -> vector<256x128xf32>
    %c0_22 = arith.constant 0 : index
    %c0_23 = arith.constant 0 : index
    %44 = vector.load %arg10[%c0_22, %c0_23] : memref<1x128xf32, #tpu.memory_space<vmem>>, vector<1x128xf32>
    %45 = vector.broadcast %44 : vector<1x128xf32> to vector<256x128xf32>
    %46 = arith.addf %43, %45 : vector<256x128xf32>
    %c0_24 = arith.constant 0 : index
    %c0_25 = arith.constant 0 : index
    %47 = vector.load %arg11[%c0_24, %c0_25] : memref<256x128xf32, #tpu.memory_space<vmem>>, vector<256x128xf32>
    tpu.vector_store %arg11[%c0_24, %c0_25], %46 {strides = array<i32>} : memref<256x128xf32, #tpu.memory_space<vmem>>, vector<256x128xf32>,
    return
  }
  func.func @transform_0(%arg0: i32) -> (i32, i32) {
    %c0_i32 = arith.constant 0 : i32
    %c0_i32_0 = arith.constant 0 : i32
    return %arg0, %c0_i32 : i32, i32
  }
  func.func @transform_1(%arg0: i32) -> (i32, i32) {
    %c0_i32 = arith.constant 0 : i32
    %c0_i32_0 = arith.constant 0 : i32
    return %arg0, %c0_i32 : i32, i32
  }
  func.func @transform_2(%arg0: i32) -> (i32, i32) {
    %c0_i32 = arith.constant 0 : i32
    %c0_i32_0 = arith.constant 0 : i32
    %c0_i32_1 = arith.constant 0 : i32
    return %c0_i32, %c0_i32_0 : i32, i32
  }
  func.func @transform_3(%arg0: i32) -> (i32, i32) {
    %c0_i32 = arith.constant 0 : i32
    %c0_i32_0 = arith.constant 0 : i32
    %c0_i32_1 = arith.constant 0 : i32
    return %c0_i32, %c0_i32_0 : i32, i32
  }
  func.func @transform_4(%arg0: i32) -> (i32, i32) {
    %c0_i32 = arith.constant 0 : i32
    %c0_i32_0 = arith.constant 0 : i32
    %c0_i32_1 = arith.constant 0 : i32
    return %c0_i32, %c0_i32_0 : i32, i32
  }
  func.func @transform_5(%arg0: i32) -> (i32, i32) {
    %c0_i32 = arith.constant 0 : i32
    %c0_i32_0 = arith.constant 0 : i32
    %c0_i32_1 = arith.constant 0 : i32
    return %c0_i32, %c0_i32_0 : i32, i32
  }
  func.func @transform_6(%arg0: i32) -> (i32, i32) {
    %c0_i32 = arith.constant 0 : i32
    %c0_i32_0 = arith.constant 0 : i32
    %c0_i32_1 = arith.constant 0 : i32
    return %c0_i32, %c0_i32_0 : i32, i32
  }
  func.func @transform_7(%arg0: i32) -> (i32, i32) {
    %c0_i32 = arith.constant 0 : i32
    %c0_i32_0 = arith.constant 0 : i32
    %c0_i32_1 = arith.constant 0 : i32
    return %c0_i32, %c0_i32_0 : i32, i32
  }
  func.func @transform_8(%arg0: i32) -> (i32, i32) {
    %c0_i32 = arith.constant 0 : i32
    %c0_i32_0 = arith.constant 0 : i32
    %c0_i32_1 = arith.constant 0 : i32
    return %c0_i32, %c0_i32_0 : i32, i32
  }
  func.func @transform_9(%arg0: i32) -> (i32, i32) {
    %c0_i32 = arith.constant 0 : i32
    %c0_i32_0 = arith.constant 0 : i32
    %c0_i32_1 = arith.constant 0 : i32
    return %c0_i32, %c0_i32_0 : i32, i32
  }
  func.func @transform_10(%arg0: i32) -> (i32, i32) {
    %c0_i32 = arith.constant 0 : i32
    %c0_i32_0 = arith.constant 0 : i32
    return %arg0, %c0_i32 : i32, i32
  }
}

</mosaic_0001>

<bundles_post_ra>
// kernel: net_forward.1
= control target key start
LH: loop header
LB: loop body
LE: loop exit
PB: predicated region body
PF: predicated region fallthrough
CT: control target
= control target key end

     0   :  { %s3680_s13 = smov 0   ;;  %s5193_s0 = inlined_call_operand.vmem [shape: f32[512,2], index: 0, kind: input, shape index: {}]   ;;  %s5194_s1 = inlined_call_operand.vmem [shape: f32[512,1], index: 1, kind: input, shape index: {}]   ;;  %s5195_s2 = inlined_call_operand.vmem [shape: bf16[3,256], index: 2, kind: input, shape index: {}]   ;;  %s5196_s3 = inlined_call_operand.vmem [shape: f32[1,256], index: 3, kind: input, shape index: {}]   ;;  %s5197_s4 = inlined_call_operand.vmem [shape: bf16[256,256], index: 4, kind: input, shape index: {}]   ;;  %s5198_s5 = inlined_call_operand.vmem [shape: f32[1,256], index: 5, kind: input, shape index: {}]   ;;  %s5199_s6 = inlined_call_operand.vmem [shape: bf16[256,256], index: 6, kind: input, shape index: {}]   ;;  %s5200_s7 = inlined_call_operand.vmem [shape: f32[1,256], index: 7, kind: input, shape index: {}]   ;;  %s5201_s8 = inlined_call_operand.vmem [shape: bf16[256,128], index: 8, kind: input, shape index: {}]   ;;  %s5202_s9 = inlined_call_operand.vmem [shape: f32[1,128], index: 9, kind: input, shape index: {}]   ;;  %s5203_s10 = inlined_call_operand.vmem [shape: f32[512,128], index: 10, kind: output, shape index: {}]  }
   0x1 LB: > { %s3114_s14 = sadd.s32 4294967295, %s3621_s13   ;;  %p3118_p0 = scmp.ge.s32.totalorder %s3621_s13, 1  ;;  %s3621_s13 = sphi %s3680_s13, %s20_s13  }
   0x2   : > { %p324_p1 = scmp.lt.s32.totalorder %s3621_s13, 3 }
   0x4   : > { %p325_p2 = pnand %p3118_p0, %p324_p1 }
   0x6   : > { %328 = sbr.rel (%p325_p2) target bundleno = 1101 (0x44d), region = 60 }
   0xb   : > { %s3119_s15 = sshll.u32 %s3114_s14, 5  ;;  %v3623_v0 = vmov 1   ;;  %v3624_v1 = vmov 0   ;;  %v3183_v21 = vld [vmem:[%s5197_s4 + $0x70] sm:$0xf] }
   0xc   : > { %3554 = vset.pattern.permute.xlu1 %v3623_v0  ;;  %3555 = vset.pattern.permute.xlu2 %v3624_v1  ;;  %p368_p3 = scmp.lt.s32.totalorder %s3119_s15, 63  ;;  %v3462_v22 = vld [vmem:[%s5197_s4 + $0x74] sm:$0xf0]  ;;  %v3247_v23 = vld [vmem:[%s5197_s4 + $0xf0] sm:$0xf] }
   0xd   : > { %3553 = vset.pattern.permute.xlu0 %v3624_v1  ;;  %v3184_v24 = vor.u32 %v3462_v22, %v3183_v21  ;;  %v3478_v25 = vld [vmem:[%s5197_s4 + $0xf4] sm:$0xf0]  ;;  %v3175_v28 = vld [vmem:[%s5197_s4 + $0x60] sm:$0xf]  ;;  %v3460_v29 = vld [vmem:[%s5197_s4 + $0x64] sm:$0xf0] }
   0xe   : > { %s5215_s15 = smov (!%p368_p3, %s3119_s15), 63  ;;  %v3248_v27 = vor.u32 %v3478_v25, %v3247_v23  ;;  %v3176_v30 = vor.u32 %v3460_v29, %v3175_v28  ;;  %v3239_v31 = vld [vmem:[%s5197_s4 + $0xe0] sm:$0xf]  ;;  %v3476_v32 = vld [vmem:[%s5197_s4 + $0xe4] sm:$0xf0] }
   0xf   : > { %s3691_s16 = sshll.u32 %s5215_s15, 3  ;;  %3527 = vmatpush.bf16.msra.mxu2 %v3184_v24  ;;  %1602 = vmatpush.bf16.msra.mxu0 %v3184_v24  ;;  %v3240_v33 = vor.u32 %v3476_v32, %v3239_v31  ;;  %v3167_v34 = vld [vmem:[%s5197_s4 + $0x50] sm:$0xf]  ;;  %v3458_v35 = vld [vmem:[%s5197_s4 + $0x54] sm:$0xf0] }
  0x10   : > { %s3697_s19 = scalar_lea.vmem %s5194_s1, %s3691_s16  ;;  %s3703_s22 = scalar_lea.vmem %s5193_s0, %s3691_s16  ;;  %3535 = vmatpush.bf16.msra.mxu3 %v3248_v27  ;;  %1691 = vmatpush.bf16.msra.mxu1 %v3248_v27  ;;  %v3231_v36 = vld [vmem:[%s5197_s4 + $0xd0] sm:$0xf]  ;;  %v3168_v37 = vor.u32 %v3458_v35, %v3167_v34  ;;  %v3474_v38 = vld [vmem:[%s5197_s4 + $0xd4] sm:$0xf0]  ;;  %v3159_v42 = vld [vmem:[%s5197_s4 + $0x40] sm:$0xf] }
  0x11   : > { %v433_v2 = vld [vmem:[%s3697_s19 + $0x80] sm:$0xff]  ;;  %v434_v4 = vld [vmem:[%s3697_s19 + $0x88] sm:$0xff]  ;;  %v403_v6 = vld [vmem:[%s3703_s22 + $0x90] sm:$0xff]  ;;  %v3232_v39 = vor.u32 %v3474_v38, %v3231_v36 }
  0x12   : > { %v401_v3 = vld [vmem:[%s3703_s22 + $0x80] sm:$0xff]  ;;  %1026 = vperm.xlu2 %3555, %v433_v2   ;;  %v402_v5 = vld [vmem:[%s3703_s22 + $0x88] sm:$0xff]  ;;  %v404_v7 = vld [vmem:[%s3703_s22 + $0x98] sm:$0xff] }
  0x13   : > { %747 = vperm.xlu1 %3554, %v401_v3   ;;  %533 = vperm.xlu0 %3553, %v401_v3   ;;  %v435_v8 = vld [vmem:[%s3697_s19 + $0x90] sm:$0xff]  ;;  %v436_v9 = vld [vmem:[%s3697_s19 + $0x98] sm:$0xff]  ;;  %v405_v10 = vld [vmem:[%s3703_s22 + $0xa0] sm:$0xff] }
  0x14   : > { %v406_v11 = vld [vmem:[%s3703_s22 + $0xa8] sm:$0xff]  ;;  %v437_v12 = vld [vmem:[%s3697_s19 + $0xa0] sm:$0xff]  ;;  %v408_v14 = vld [vmem:[%s3703_s22 + $0xb8] sm:$0xff]  ;;  %3528 = vmatpush.bf16.msra.mxu2 %v3176_v30  ;;  %3536 = vmatpush.bf16.msra.mxu3 %v3240_v33 }
  0x15   : > { %v438_v13 = vld [vmem:[%s3697_s19 + $0xa8] sm:$0xff]  ;;  %v439_v15 = vld [vmem:[%s3697_s19 + $0xb0] sm:$0xff]  ;;  %v441_v18 = vld [vmem:[%s3697_s19 + $0xc0] sm:$0xff]  ;;  %1603 = vmatpush.bf16.msra.mxu0 %v3176_v30  ;;  %1692 = vmatpush.bf16.msra.mxu1 %v3240_v33 }
  0x16   : > { %v407_v16 = vld [vmem:[%s3703_s22 + $0xb0] sm:$0xff]  ;;  %v410_v17 = vld [vmem:[%s3703_s22 + $0xc8] sm:$0xff]  ;;  %v409_v19 = vld [vmem:[%s3703_s22 + $0xc0] sm:$0xff] }
  0x17   : > { %v440_v20 = vld [vmem:[%s3697_s19 + $0xb8] sm:$0xff]  ;;  %v443_v40 = vld [vmem:[%s3697_s19 + $0xd0] sm:$0xff]  ;;  %v3456_v43 = vld [vmem:[%s5197_s4 + $0x44] sm:$0xf0] }
  0x18   : > { %v3748_v26 = vld [vmem:[%s3703_s22 + $0xd8] sm:$0xff]  ;;  %3529 = vmatpush.bf16.msra.mxu2 %v3168_v37  ;;  %v411_v41 = vld [vmem:[%s3703_s22 + $0xd0] sm:$0xff]  ;;  %3537 = vmatpush.bf16.msra.mxu3 %v3232_v39  ;;  %v3223_v44 = vld [vmem:[%s5197_s4 + $0xc0] sm:$0xf]  ;;  %v3160_v46 = vor.u32 %v3456_v43, %v3159_v42 }
  0x19   : > { %v3472_v45 = vld [vmem:[%s5197_s4 + $0xc4] sm:$0xf0]  ;;  %1604 = vmatpush.bf16.msra.mxu0 %v3168_v37  ;;  %1693 = vmatpush.bf16.msra.mxu1 %v3232_v39  ;;  %v3151_v49 = vld [vmem:[%s5197_s4 + $0x30] sm:$0xf]  ;;  %v3454_v50 = vld [vmem:[%s5197_s4 + $0x34] sm:$0xf0] }
  0x1a   : > { %1031 = vperm.xlu2 %3555, %v434_v4   ;;  %v3224_v47 = vor.u32 %v3472_v45, %v3223_v44  ;;  %v442_v48 = vld [vmem:[%s3697_s19 + $0xc8] sm:$0xff]  ;;  %v3215_v51 = vld [vmem:[%s5197_s4 + $0xb0] sm:$0xf]  ;;  %v3152_v52 = vor.u32 %v3454_v50, %v3151_v49  ;;  %v3470_v53 = vld [vmem:[%s5197_s4 + $0xb4] sm:$0xf0] }
  0x1b   : > { %751 = vperm.xlu1 %3554, %v402_v5   ;;  %538 = vperm.xlu0 %3553, %v402_v5   ;;  %v3807_v54 = vld [vmem:[%s3703_s22 + $0xe8] sm:$0xff]  ;;  %v3216_v55 = vor.u32 %v3470_v53, %v3215_v51  ;;  %v3143_v56 = vld [vmem:[%s5197_s4 + $0x20] sm:$0xf]  ;;  %v3135_v62 = vld [vmem:[%s5197_s4 + $0x10] sm:$0xf] }
  0x1c   : > { %3530 = vmatpush.bf16.msra.mxu2 %v3160_v46  ;;  %3538 = vmatpush.bf16.msra.mxu3 %v3224_v47  ;;  %v3452_v57 = vld [vmem:[%s5197_s4 + $0x24] sm:$0xf0]  ;;  %v3207_v59 = vld [vmem:[%s5197_s4 + $0xa0] sm:$0xf]  ;;  %v3450_v63 = vld [vmem:[%s5197_s4 + $0x14] sm:$0xf0] }
  0x1d   : > { %1605 = vmatpush.bf16.msra.mxu0 %v3160_v46  ;;  %1694 = vmatpush.bf16.msra.mxu1 %v3224_v47  ;;  %v3144_v58 = vor.u32 %v3452_v57, %v3143_v56  ;;  %v3468_v60 = vld [vmem:[%s5197_s4 + $0xa4] sm:$0xf0]  ;;  %v3199_v2 = vld [vmem:[%s5197_s4 + $0x90] sm:$0xf]  ;;  %v3136_v3 = vor.u32 %v3450_v63, %v3135_v62  ;;  %v3466_v4 = vld [vmem:[%s5197_s4 + $0x94] sm:$0xf0] }
  0x1e   : > { %v3208_v61 = vor.u32 %v3468_v60, %v3207_v59  ;;  %v445_v5 = vld [vmem:[%s3697_s19 + $0xe0] sm:$0xff]  ;;  %v447_v28 = vld [vmem:[%s3697_s19 + $0xf0] sm:$0xff]  ;;  %v3885_v44 = vld [vmem:[%s3703_s22 + $0x8] sm:$0xff] }
  0x1f   : > { %v415_v39 = vld [vmem:[%s3703_s22 + $0xf0] sm:$0xff]  ;;  %v446_v47 = vld [vmem:[%s3697_s19 + $0xe8] sm:$0xff] }
  0x20   : > { %3531 = vmatpush.bf16.msra.mxu2 %v3152_v52  ;;  %3539 = vmatpush.bf16.msra.mxu3 %v3216_v55 }
  0x21   : > { %1606 = vmatpush.bf16.msra.mxu0 %v3152_v52  ;;  %1695 = vmatpush.bf16.msra.mxu1 %v3216_v55 }
  0x22   : > { %3557 = vset.pattern.permute.xlu2 %v3623_v0 }
  0x23   : > { %3556 = vset.pattern.permute.xlu1 %v3624_v1  ;;  %543 = vperm.xlu0 %3553, %v403_v6  }
  0x24   : > { %755 = vperm.xlu2 %3557, %v403_v6   ;;  %548 = vperm.xlu1 %3556, %v404_v7   ;;  %v3200_v6 = vor.u32 %v3466_v4, %v3199_v2  ;;  %v417_v2 = vld [vmem:[%s3697_s19] sm:$0xff] }
  0x25   : > { %3532 = vmatpush.bf16.msra.mxu2 %v3144_v58  ;;  %3540 = vmatpush.bf16.msra.mxu3 %v3208_v61 }
  0x26   : > { %1607 = vmatpush.bf16.msra.mxu0 %v3144_v58  ;;  %1696 = vmatpush.bf16.msra.mxu1 %v3208_v61 }
  0x29   : > { %3533 = vmatpush.bf16.msra.mxu2 %v3136_v3  ;;  %3541 = vmatpush.bf16.msra.mxu3 %v3200_v6 }
  0x2a   : > { %1608 = vmatpush.bf16.msra.mxu0 %v3136_v3  ;;  %1697 = vmatpush.bf16.msra.mxu1 %v3200_v6 }
  0x2b   : > { %3558 = vset.pattern.permute.xlu0 %v3623_v0 }
  0x2c   : > { %3559 = vset.pattern.permute.xlu2 %v3624_v1  ;;  %1036 = vperm.xlu1 %3556, %v435_v8   ;;  %v3448_v8 = vld [vmem:[%s5197_s4 + $0x4] sm:$0xf0] }
  0x2d   : > { %759 = vperm.xlu0 %3558, %v404_v7   ;;  %1041 = vperm.xlu2 %3559, %v436_v9   ;;  %v3127_v7 = vld [vmem:[%s5197_s4] sm:$0xf] }
  0x2e   : > { %v3128_v9 = vor.u32 %v3448_v8, %v3127_v7 }
  0x30   : > { %3534 = vmatpush.bf16.msra.mxu2 %v3128_v9  ;;  %1609 = vmatpush.bf16.msra.mxu0 %v3128_v9 }
  0x34   : > { %553 = vperm.xlu1 %3556, %v405_v10  }
  0x35   : > { %763 = vperm.xlu0 %3558, %v405_v10   ;;  %558 = vperm.xlu2 %3559, %v406_v11   ;;  %v3191_v10 = vld [vmem:[%s5197_s4 + $0x80] sm:$0xf] }
  0x3c   : > { %3560 = vset.pattern.permute.xlu1 %v3623_v0 }
  0x3d   : > { %3561 = vset.pattern.permute.xlu0 %v3624_v1  ;;  %1046 = vperm.xlu2 %3559, %v437_v12  }
  0x3e   : > { %767 = vperm.xlu1 %3560, %v406_v11   ;;  %1051 = vperm.xlu0 %3561, %v438_v13   ;;  %v3464_v11 = vld [vmem:[%s5197_s4 + $0x84] sm:$0xf0]  ;;  %v449_v13 = vld [vmem:[%s5195_s2] sm:$0xf] }
  0x3f   : > { %v3192_v12 = vor.u32 %v3464_v11, %v3191_v10 }
  0x41   : > { %3542 = vmatpush.bf16.msra.mxu3 %v3192_v12  ;;  %1698 = vmatpush.bf16.msra.mxu1 %v3192_v12 }
  0x45   : > { %568 = vperm.xlu2 %3559, %v408_v14  }
  0x46   : > { %3562 = vset.pattern.permute.xlu1 %v3624_v1  ;;  %1056 = vperm.xlu0 %3561, %v439_v15   ;;  %v413_v15 = vld [vmem:[%s3703_s22 + $0xe0] sm:$0xff] }
  0x47   : > { %563 = vperm.xlu1 %3562, %v407_v16  }
  0x4d   : > { %3564 = vset.pattern.permute.xlu2 %v3623_v0 }
  0x4e   : > { %578 = vperm.xlu0 %3561, %v410_v17   ;;  %775 = vperm.xlu2 %3564, %v408_v14  }
  0x4f   : > { %3563 = vset.pattern.permute.xlu1 %v3623_v0 }
  0x50   : > { %771 = vperm.xlu1 %3563, %v407_v16   ;;  %v444_v16 = vld [vmem:[%s3697_s19 + $0xd8] sm:$0xff] }
  0x56   : > { %1066 = vperm.xlu0 %3561, %v441_v18   ;;  %3566 = vset.pattern.permute.xlu2 %v3624_v1  ;;  %v3857_v18 = vld [vmem:[%s3703_s22 + $0xf8] sm:$0xff] }
  0x57   : > { %573 = vperm.xlu2 %3566, %v409_v19  }
  0x58   : > { %3565 = vset.pattern.permute.xlu1 %v3624_v1 }
  0x59   : > { %1061 = vperm.xlu1 %3565, %v440_v20  }
  0x5e   : > { %588 = vperm.xlu0 %3561, %v3748_v26  }
  0x5f   : > { %3568 = vset.pattern.permute.xlu2 %v3623_v0 }
  0x60   : > { %783 = vperm.xlu2 %3568, %v410_v17   ;;  %v450_v17 = vunpack.c.l.bf16 %v449_v13 }
  0x61   : > { %3567 = vset.pattern.permute.xlu1 %v3623_v0 }
  0x62   : > { %779 = vperm.xlu1 %3567, %v409_v19   ;;  %v810_v19 = vperm.slane %v450_v17, 1  ;;  %v811_v20 = vperm.slane %v450_v17, 5  ;;  %v612_v21 = vperm.slane %v450_v17, 0  ;;  %v613_v22 = vperm.slane %v450_v17, 4 }
  0x63   : > { %v1104_v23 = vperm.slane %v450_v17, 2  ;;  %v1105_v24 = vperm.slane %v450_v17, 6 }
  0x64   : > { %v3863_v27 = vperm.slane %v811_v20, 1  ;;  %v3867_v29 = vperm.slane %v612_v21, 0  ;;  %v3869_v30 = vperm.slane %v613_v22, 0  ;;  %v3923_v20 = vld [vmem:[%s3703_s22 + $0x18] sm:$0xff]  ;;  %v385_v21 = vld [vmem:[%s3703_s22] sm:$0xff] }
  0x65   : > { %v3873_v33 = vperm.slane %v1104_v23, 2  ;;  %v3875_v34 = vperm.slane %v1105_v24, 2 }
  0x66   : > { %1076 = vperm.xlu0 %3561, %v443_v40  }
  0x68   : > { %3570 = vset.pattern.permute.xlu2 %v3624_v1 }
  0x69   : > { %583 = vperm.xlu2 %3570, %v411_v41  }
  0x6a   : > { %3569 = vset.pattern.permute.xlu1 %v3624_v1 }
  0x6b   : > { %1071 = vperm.xlu1 %3569, %v442_v48   ;;  %v1238_v48 = vld [vmem:[%s5196_s3] sm:$0x3] }
  0x6c   : > { %v1027_v14 = vpop.permute.xlu2 %1026  ;;  %v3898_v56 = vperm.slane %v1238_v48, 0  ;;  %v3900_v57 = vperm.slane %v1238_v48, 1 }
  0x6d   : > { %v1142_v40 = vmul.f32 %v3873_v33, %v1027_v14 }
  0x6e   : > { %598 = vperm.xlu0 %3561, %v3807_v54  }
  0x71   : > { %3572 = vset.pattern.permute.xlu2 %v3623_v0 }
  0x72   : > { %791 = vperm.xlu2 %3572, %v3748_v26   ;;  %v3861_v26 = vperm.slane %v810_v19, 1 }
  0x73   : > { %3571 = vset.pattern.permute.xlu1 %v3623_v0 }
  0x74   : > { %787 = vperm.xlu1 %3571, %v411_v41   ;;  %v1032_v25 = vpop.permute.xlu2 %1031  ;;  %v1143_v41 = vmul.f32 %v3875_v34, %v1027_v14 }
  0x75   : > { %v1144_v58 = vmul.f32 %v3873_v33, %v1032_v25  ;;  %v1145_v59 = vmul.f32 %v3875_v34, %v1032_v25 }
  0x76   : > { %1086 = vperm.xlu0 %3561, %v445_v5  }
  0x7a   : > { %3574 = vset.pattern.permute.xlu2 %v3624_v1 }
  0x7b   : > { %593 = vperm.xlu2 %3574, %v413_v15  }
  0x7c   : > { %3573 = vset.pattern.permute.xlu1 %v3624_v1 }
  0x7d   : > { %1081 = vperm.xlu1 %3573, %v444_v16  }
  0x7e   : > { %608 = vperm.xlu0 %3561, %v3857_v18   ;;  %v756_v45 = vpop.permute.xlu2 %755 }
  0x7f   : > { %v852_v14 = vmul.f32 %v3861_v26, %v756_v45 }
  0x83   : > { %3576 = vset.pattern.permute.xlu2 %v3623_v0 }
  0x84   : > { %799 = vperm.xlu2 %3576, %v3807_v54  }
  0x85   : > { %v748_v31 = vpop.permute.xlu1 %747  ;;  %3575 = vset.pattern.permute.xlu1 %v3623_v0  ;;  %v534_v32 = vpop.permute.xlu0 %533 }
  0x86   : > { %795 = vperm.xlu1 %3575, %v413_v15   ;;  %1096 = vperm.xlu0 %3561, %v447_v28   ;;  %v848_v35 = vmul.f32 %v3861_v26, %v748_v31  ;;  %v849_v36 = vmul.f32 %v3863_v27, %v748_v31  ;;  %v650_v37 = vmul.f32 %v3867_v29, %v534_v32  ;;  %v3461_v28 = vld [vmem:[%s5197_s4 + $0x74] sm:$0xf]  ;;  %v3185_v31 = vld [vmem:[%s5197_s4 + $0x78] sm:$0xf0] }
  0x87   : > { %v651_v38 = vmul.f32 %v3869_v30, %v534_v32  ;;  %v1042_v8 = vpop.permute.xlu2 %1041  ;;  %v853_v15 = vmul.f32 %v3863_v27, %v756_v45 }
  0x88   : > { %v912_v42 = vadd.f32 %v848_v35, %v650_v37  ;;  %v1148_v22 = vmul.f32 %v3873_v33, %v1042_v8  ;;  %v1149_v23 = vmul.f32 %v3875_v34, %v1042_v8 }
  0x89   : > { %v913_v43 = vadd.f32 %v849_v36, %v651_v38  ;;  %v448_v38 = vld [vmem:[%s3697_s19 + $0xf8] sm:$0xff] }
  0x8a   : > { %v1206_v54 = vadd.f32 %v1142_v40, %v912_v42  ;;  %v3477_v40 = vld [vmem:[%s5197_s4 + $0xf4] sm:$0xf] }
  0x8b   : > { %v1207_v55 = vadd.f32 %v1143_v41, %v913_v43  ;;  %v3249_v41 = vld [vmem:[%s5197_s4 + $0xf8] sm:$0xf0] }
  0x8c   : > { %3578 = vset.pattern.permute.xlu2 %v3624_v1  ;;  %v1276_v3 = vadd.f32 %v3898_v56, %v1206_v54  ;;  %v3252_v48 = vor.u32 %v3477_v40, %v3249_v41  ;;  %v418_v40 = vld [vmem:[%s3697_s19 + $0x8] sm:$0xff] }
  0x8d   : > { %v752_v46 = vpop.permute.xlu1 %751  ;;  %603 = vperm.xlu2 %3578, %v415_v39   ;;  %v539_v51 = vpop.permute.xlu0 %538  ;;  %v1277_v4 = vadd.f32 %v3900_v57, %v1207_v55  ;;  %v419_v55 = vld [vmem:[%s3697_s19 + $0x10] sm:$0xff] }
  0x8e   : > { %v850_v49 = vmul.f32 %v3861_v26, %v752_v46  ;;  %v851_v50 = vmul.f32 %v3863_v27, %v752_v46  ;;  %3577 = vset.pattern.permute.xlu1 %v3624_v1  ;;  %v652_v52 = vmul.f32 %v3867_v29, %v539_v51  ;;  %v653_v53 = vmul.f32 %v3869_v30, %v539_v51 }
  0x8f   : > { %458 = vperm.xlu0 %3561, %v3885_v44   ;;  %1091 = vperm.xlu1 %3577, %v446_v47   ;;  %v1340_v12 = vmax.f32 %v1276_v3, 0.0  ;;  %v1341_v13 = vmax.f32 %v1277_v4, 0.0  ;;  %v559_v47 = vpop.permute.xlu2 %558 }
  0x90   : > { %v914_v60 = vadd.f32 %v850_v49, %v652_v52  ;;  %v915_v61 = vadd.f32 %v851_v50, %v653_v53  ;;  %1869 = vmatpush.bf16.msrb.mxu3 %v3252_v48 }
  0x92   : > { %v1208_v62 = vadd.f32 %v1144_v58, %v914_v60  ;;  %v1209_v63 = vadd.f32 %v1145_v59, %v915_v61 }
  0x94   : > { %v1278_v5 = vadd.f32 %v3898_v56, %v1208_v62  ;;  %v1279_v6 = vadd.f32 %v3900_v57, %v1209_v63 }
  0x95   : > { %3580 = vset.pattern.permute.xlu2 %v3623_v0  ;;  %v544_v7 = vpop.permute.xlu0 %543 }
  0x96   : > { %807 = vperm.xlu2 %3580, %v3857_v18   ;;  %v549_v9 = vpop.permute.xlu1 %548  ;;  %v1342_v10 = vmax.f32 %v1278_v5, 0.0  ;;  %v1343_v11 = vmax.f32 %v1279_v6, 0.0  ;;  %v654_v16 = vmul.f32 %v3867_v29, %v544_v7  ;;  %v655_v17 = vmul.f32 %v3869_v30, %v544_v7 }
  0x97   : > { %946 = vperm.xlu0 %3561, %v417_v2   ;;  %3579 = vset.pattern.permute.xlu1 %v3623_v0  ;;  %v656_v32 = vmul.f32 %v3867_v29, %v549_v9  ;;  %v657_v35 = vmul.f32 %v3869_v30, %v549_v9 }
  0x98   : > { %803 = vperm.xlu1 %3579, %v415_v39   ;;  %v3916_v19 = vpack.c.bf16 %v1342_v10, %v1340_v12  ;;  %v3918_v18 = vpack.c.bf16 %v1343_v11, %v1341_v13  ;;  %v916_v24 = vadd.f32 %v852_v14, %v654_v16  ;;  %v917_v25 = vadd.f32 %v853_v15, %v655_v17  ;;  %v1047_v10 = vpop.permute.xlu2 %1046  ;;  %v3968_v15 = vld [vmem:[%s3703_s22 + $0x28] sm:$0xff] }
  0x99   : > { %v3188_v39 = vor.u32 %v3461_v28, %v3185_v31  ;;  %v1150_v13 = vmul.f32 %v3873_v33, %v1047_v10  ;;  %v1151_v16 = vmul.f32 %v3875_v34, %v1047_v10  ;;  %v3233_v10 = vld [vmem:[%s5197_s4 + $0xd8] sm:$0xf0] }
  0x9a   : > { %1650 = vmatmul.bf16.vlgmr.msra.gmra.mxu2 %v3916_v19  ;;  %1739 = vmatmul.bf16.vlgmr.msra.gmra.mxu3 %v3918_v18 }
  0x9b   : > { %1780 = vmatpush.bf16.msrb.mxu2 %v3188_v39 }
  0x9e   : > { %3582 = vset.pattern.permute.xlu2 %v3624_v1  ;;  %v1037_v36 = vpop.permute.xlu1 %1036 }
  0x9f   : > { %468 = vperm.xlu0 %3561, %v3923_v20   ;;  %v760_v37 = vpop.permute.xlu0 %759  ;;  %v1146_v42 = vmul.f32 %v3873_v33, %v1037_v36  ;;  %v1147_v43 = vmul.f32 %v3875_v34, %v1037_v36  ;;  %453 = vperm.xlu2 %3582, %v385_v21  }
  0xa0   : > { %v854_v45 = vmul.f32 %v3861_v26, %v760_v37  ;;  %v855_v46 = vmul.f32 %v3863_v27, %v760_v37  ;;  %3581 = vset.pattern.permute.xlu1 %v3624_v1 }
  0xa1   : > { %v1210_v49 = vadd.f32 %v1146_v42, %v916_v24  ;;  %v1211_v50 = vadd.f32 %v1147_v43, %v917_v25  ;;  %1101 = vperm.xlu1 %3581, %v448_v38   ;;  %v660_v24 = vmul.f32 %v3867_v29, %v559_v47  ;;  %v661_v25 = vmul.f32 %v3869_v30, %v559_v47  ;;  %v421_v47 = vld [vmem:[%s3697_s19 + $0x20] sm:$0xff] }
  0xa2   : > { %v918_v51 = vadd.f32 %v854_v45, %v656_v32  ;;  %v919_v52 = vadd.f32 %v855_v46, %v657_v35  ;;  %v3241_v35 = vld [vmem:[%s5197_s4 + $0xe8] sm:$0xf0] }
  0xa3   : > { %v1280_v58 = vadd.f32 %v3898_v56, %v1210_v49  ;;  %v1281_v59 = vadd.f32 %v3900_v57, %v1211_v50 }
  0xa4   : > { %v1212_v53 = vadd.f32 %v1148_v22, %v918_v51  ;;  %v1213_v54 = vadd.f32 %v1149_v23, %v919_v52  ;;  %v3177_v22 = vld [vmem:[%s5197_s4 + $0x68] sm:$0xf0]  ;;  %v3475_v23 = vld [vmem:[%s5197_s4 + $0xe4] sm:$0xf]  ;;  %v569_v52 = vpop.permute.xlu2 %568 }
  0xa5   : > { %v1344_v4 = vmax.f32 %v1280_v58, 0.0  ;;  %v1345_v5 = vmax.f32 %v1281_v59, 0.0  ;;  %v3244_v41 = vor.u32 %v3475_v23, %v3241_v35  ;;  %v423_v23 = vld [vmem:[%s3697_s19 + $0x30] sm:$0xff] }
  0xa6   : > { %v1282_v60 = vadd.f32 %v3898_v56, %v1212_v53  ;;  %v1283_v61 = vadd.f32 %v3900_v57, %v1213_v54  ;;  %v554_v62 = vpop.permute.xlu1 %553 }
  0xa7   : > { %956 = vperm.xlu0 %3561, %v419_v55   ;;  %v764_v63 = vpop.permute.xlu0 %763  ;;  %v658_v2 = vmul.f32 %v3867_v29, %v554_v62  ;;  %3584 = vset.pattern.permute.xlu2 %v3623_v0  ;;  %v659_v6 = vmul.f32 %v3869_v30, %v554_v62 }
  0xa8   : > { %v856_v3 = vmul.f32 %v3861_v26, %v764_v63  ;;  %v857_v7 = vmul.f32 %v3863_v27, %v764_v63  ;;  %687 = vperm.xlu2 %3584, %v3885_v44   ;;  %v1346_v8 = vmax.f32 %v1282_v60, 0.0  ;;  %v1347_v9 = vmax.f32 %v1283_v61, 0.0  ;;  %v387_v44 = vld [vmem:[%s3703_s22 + $0x10] sm:$0xff]  ;;  %1870 = vmatpush.bf16.msrb.mxu3 %v3244_v41 }
  0xa9   : > { %3583 = vset.pattern.permute.xlu1 %v3623_v0 }
  0xaa   : > { %683 = vperm.xlu1 %3583, %v385_v21   ;;  %v3962_v11 = vpack.c.bf16 %v1346_v8, %v1344_v4  ;;  %v3964_v12 = vpack.c.bf16 %v1347_v9, %v1345_v5  ;;  %v920_v14 = vadd.f32 %v856_v3, %v658_v2  ;;  %v921_v17 = vadd.f32 %v857_v7, %v659_v6  ;;  %v3459_v21 = vld [vmem:[%s5197_s4 + $0x64] sm:$0xf]  ;;  %v4009_v3 = vld [vmem:[%s3703_s22 + $0x38] sm:$0xff]  ;;  %v3457_v6 = vld [vmem:[%s5197_s4 + $0x54] sm:$0xf] }
  0xab   : > { %v3180_v32 = vor.u32 %v3459_v21, %v3177_v22  ;;  %v389_v5 = vld [vmem:[%s3703_s22 + $0x20] sm:$0xff]  ;;  %v3169_v7 = vld [vmem:[%s5197_s4 + $0x58] sm:$0xf0]  ;;  %v3473_v8 = vld [vmem:[%s5197_s4 + $0xd4] sm:$0xf] }
  0xac   : > { %1655 = vmatmul.bf16.gmra.mxu2 %v3962_v11  ;;  %1744 = vmatmul.bf16.gmra.mxu3 %v3964_v12  ;;  %v1214_v28 = vadd.f32 %v1150_v13, %v920_v14  ;;  %v1215_v36 = vadd.f32 %v1151_v16, %v921_v17  ;;  %v776_v4 = vpop.permute.xlu2 %775  ;;  %v3172_v9 = vor.u32 %v3457_v6, %v3169_v7  ;;  %v420_v14 = vld [vmem:[%s3697_s19 + $0x18] sm:$0xff] }
  0xad   : > { %1781 = vmatpush.bf16.msrb.mxu2 %v3180_v32  ;;  %v3236_v16 = vor.u32 %v3473_v8, %v3233_v10  ;;  %v664_v32 = vmul.f32 %v3867_v29, %v569_v52  ;;  %v862_v35 = vmul.f32 %v3861_v26, %v776_v4  ;;  %v3471_v8 = vld [vmem:[%s5197_s4 + $0xc4] sm:$0xf] }
  0xae   : > { %v1284_v50 = vadd.f32 %v3898_v56, %v1214_v28  ;;  %v1285_v51 = vadd.f32 %v3900_v57, %v1215_v36 }
  0xaf   : > { %478 = vperm.xlu0 %3561, %v3968_v15   ;;  %1871 = vmatpush.bf16.msrb.mxu3 %v3236_v16 }
  0xb0   : > { %v768_v31 = vpop.permute.xlu1 %767  ;;  %v1052_v39 = vpop.permute.xlu0 %1051  ;;  %3586 = vset.pattern.permute.xlu2 %v3624_v1  ;;  %v1348_v59 = vmax.f32 %v1284_v50, 0.0  ;;  %v1349_v61 = vmax.f32 %v1285_v51, 0.0 }
  0xb1   : > { %v858_v37 = vmul.f32 %v3861_v26, %v768_v31  ;;  %v859_v38 = vmul.f32 %v3863_v27, %v768_v31  ;;  %v1152_v42 = vmul.f32 %v3873_v33, %v1052_v39  ;;  %v1153_v43 = vmul.f32 %v3875_v34, %v1052_v39  ;;  %463 = vperm.xlu2 %3586, %v387_v44  }
  0xb2   : > { %3585 = vset.pattern.permute.xlu1 %v3624_v1  ;;  %1782 = vmatpush.bf16.msrb.mxu2 %v3172_v9 }
  0xb3   : > { %v922_v45 = vadd.f32 %v858_v37, %v660_v24  ;;  %v923_v46 = vadd.f32 %v859_v38, %v661_v25  ;;  %951 = vperm.xlu1 %3585, %v418_v40   ;;  %v665_v37 = vmul.f32 %v3869_v30, %v569_v52  ;;  %v863_v38 = vmul.f32 %v3863_v27, %v776_v4  ;;  %v391_v4 = vld [vmem:[%s3703_s22 + $0x30] sm:$0xff] }
  0xb4   : > { %v574_v36 = vpop.permute.xlu2 %573 }
  0xb5   : > { %v1216_v48 = vadd.f32 %v1152_v42, %v922_v45  ;;  %v1217_v49 = vadd.f32 %v1153_v43, %v923_v46  ;;  %v926_v42 = vadd.f32 %v862_v35, %v664_v32  ;;  %v4045_v45 = vld [vmem:[%s3703_s22 + $0x48] sm:$0xff]  ;;  %v3455_v46 = vld [vmem:[%s5197_s4 + $0x44] sm:$0xf]  ;;  %v666_v10 = vmul.f32 %v3867_v29, %v574_v36 }
  0xb7   : > { %966 = vperm.xlu0 %3561, %v421_v47   ;;  %v1286_v53 = vadd.f32 %v3898_v56, %v1216_v48  ;;  %v1287_v54 = vadd.f32 %v3900_v57, %v1217_v49  ;;  %v3161_v47 = vld [vmem:[%s5197_s4 + $0x48] sm:$0xf0]  ;;  %v927_v48 = vadd.f32 %v863_v38, %v665_v37 }
  0xb8   : > { %v1057_v55 = vpop.permute.xlu0 %1056  ;;  %v3164_v51 = vor.u32 %v3455_v46, %v3161_v47 }
  0xb9   : > { %v564_v58 = vpop.permute.xlu1 %563  ;;  %v1350_v60 = vmax.f32 %v1286_v53, 0.0  ;;  %v1351_v62 = vmax.f32 %v1287_v54, 0.0  ;;  %3588 = vset.pattern.permute.xlu2 %v3623_v0  ;;  %v1154_v24 = vmul.f32 %v3873_v33, %v1057_v55  ;;  %v1155_v25 = vmul.f32 %v3875_v34, %v1057_v55 }
  0xba   : > { %695 = vperm.xlu2 %3588, %v3923_v20   ;;  %v662_v17 = vmul.f32 %v3867_v29, %v564_v58  ;;  %1783 = vmatpush.bf16.msrb.mxu2 %v3164_v51 }
  0xbb   : > { %v4003_v63 = vpack.c.bf16 %v1350_v60, %v1348_v59  ;;  %v4005_v2 = vpack.c.bf16 %v1351_v62, %v1349_v61  ;;  %3587 = vset.pattern.permute.xlu1 %v3623_v0 }
  0xbc   : > { %691 = vperm.xlu1 %3587, %v387_v44   ;;  %v663_v44 = vmul.f32 %v3869_v30, %v564_v58  ;;  %v784_v60 = vpop.permute.xlu2 %783 }
  0xbd   : > { %1660 = vmatmul.bf16.gmra.mxu2 %v4003_v63  ;;  %1749 = vmatmul.bf16.gmra.mxu3 %v4005_v2  ;;  %v867_v37 = vmul.f32 %v3863_v27, %v784_v60 }
  0xbf   : > { %488 = vperm.xlu0 %3561, %v4009_v3  }
  0xc0   : > { %v4015_v20 = vpop.permute.xlu0 %578 }
  0xc1   : > { %v668_v32 = vmul.f32 %v3867_v29, %v4015_v20  ;;  %v669_v38 = vmul.f32 %v3869_v30, %v4015_v20 }
  0xc2   : > { %v772_v13 = vpop.permute.xlu1 %771  ;;  %3590 = vset.pattern.permute.xlu2 %v3624_v1 }
  0xc3   : > { %v860_v21 = vmul.f32 %v3861_v26, %v772_v13  ;;  %v861_v22 = vmul.f32 %v3863_v27, %v772_v13  ;;  %473 = vperm.xlu2 %3590, %v389_v5  }
  0xc4   : > { %3589 = vset.pattern.permute.xlu1 %v3624_v1 }
  0xc5   : > { %v924_v28 = vadd.f32 %v860_v21, %v662_v17  ;;  %v925_v31 = vadd.f32 %v861_v22, %v663_v44  ;;  %961 = vperm.xlu1 %3589, %v420_v14   ;;  %v425_v17 = vld [vmem:[%s3697_s19 + $0x40] sm:$0xff]  ;;  %v667_v44 = vmul.f32 %v3869_v30, %v574_v36 }
  0xc7   : > { %976 = vperm.xlu0 %3561, %v423_v23   ;;  %v1218_v40 = vadd.f32 %v1154_v24, %v924_v28  ;;  %v1219_v41 = vadd.f32 %v1155_v25, %v925_v31  ;;  %v422_v23 = vld [vmem:[%s3697_s19 + $0x28] sm:$0xff]  ;;  %v866_v31 = vmul.f32 %v3861_v26, %v784_v60 }
  0xc8   : > { %v1067_v39 = vpop.permute.xlu0 %1066 }
  0xc9   : > { %v1288_v52 = vadd.f32 %v3898_v56, %v1218_v40  ;;  %v1289_v53 = vadd.f32 %v3900_v57, %v1219_v41  ;;  %v1158_v35 = vmul.f32 %v3873_v33, %v1067_v39  ;;  %v1159_v36 = vmul.f32 %v3875_v34, %v1067_v39  ;;  %v584_v40 = vpop.permute.xlu2 %583  ;;  %v3153_v39 = vld [vmem:[%s5197_s4 + $0x38] sm:$0xf0] }
  0xca   : > { %v930_v46 = vadd.f32 %v866_v31, %v668_v32 }
  0xcb   : > { %v1062_v43 = vpop.permute.xlu1 %1061  ;;  %3592 = vset.pattern.permute.xlu2 %v3623_v0  ;;  %v1352_v61 = vmax.f32 %v1288_v52, 0.0  ;;  %v1353_v62 = vmax.f32 %v1289_v53, 0.0 }
  0xcc   : > { %v1156_v49 = vmul.f32 %v3873_v33, %v1062_v43  ;;  %v1157_v50 = vmul.f32 %v3875_v34, %v1062_v43  ;;  %703 = vperm.xlu2 %3592, %v3968_v15   ;;  %v4096_v43 = vld [vmem:[%s3703_s22 + $0x58] sm:$0xff] }
  0xcd   : > { %3591 = vset.pattern.permute.xlu1 %v3623_v0 }
  0xce   : > { %v1220_v54 = vadd.f32 %v1156_v49, %v926_v42  ;;  %v1221_v55 = vadd.f32 %v1157_v50, %v927_v48  ;;  %699 = vperm.xlu1 %3591, %v389_v5   ;;  %v3225_v5 = vld [vmem:[%s5197_s4 + $0xc8] sm:$0xf0]  ;;  %v3453_v48 = vld [vmem:[%s5197_s4 + $0x34] sm:$0xf]  ;;  %v931_v49 = vadd.f32 %v867_v37, %v669_v38 }
  0xcf   : > { %498 = vperm.xlu0 %3561, %v4045_v45   ;;  %v3228_v9 = vor.u32 %v3471_v8, %v3225_v5  ;;  %v3156_v51 = vor.u32 %v3453_v48, %v3153_v39 }
  0xd0   : > { %v4060_v58 = vpop.permute.xlu0 %588  ;;  %v1290_v59 = vadd.f32 %v3898_v56, %v1220_v54  ;;  %v1291_v15 = vadd.f32 %v3900_v57, %v1221_v55  ;;  %v3469_v54 = vld [vmem:[%s5197_s4 + $0xb4] sm:$0xf]  ;;  %v3217_v55 = vld [vmem:[%s5197_s4 + $0xb8] sm:$0xf0] }
  0xd1   : > { %1872 = vmatpush.bf16.msrb.mxu3 %v3228_v9  ;;  %1784 = vmatpush.bf16.msrb.mxu2 %v3156_v51  ;;  %v3220_v60 = vor.u32 %v3469_v54, %v3217_v55  ;;  %v672_v37 = vmul.f32 %v3867_v29, %v4060_v58  ;;  %v3467_v54 = vld [vmem:[%s5197_s4 + $0xa4] sm:$0xf]  ;;  %v3209_v55 = vld [vmem:[%s5197_s4 + $0xa8] sm:$0xf0] }
  0xd2   : > { %v1354_v6 = vmax.f32 %v1290_v59, 0.0  ;;  %v1355_v7 = vmax.f32 %v1291_v15, 0.0 }
  0xd4   : > { %v780_v13 = vpop.permute.xlu1 %779  ;;  %3594 = vset.pattern.permute.xlu2 %v3624_v1  ;;  %v4073_v14 = vpack.c.bf16 %v1354_v6, %v1352_v61  ;;  %v4075_v16 = vpack.c.bf16 %v1355_v7, %v1353_v62  ;;  %v427_v6 = vld [vmem:[%s3697_s19 + $0x50] sm:$0xff] }
  0xd5   : > { %v864_v21 = vmul.f32 %v3861_v26, %v780_v13  ;;  %v865_v22 = vmul.f32 %v3863_v27, %v780_v13  ;;  %483 = vperm.xlu2 %3594, %v391_v4   ;;  %1873 = vmatpush.bf16.msrb.mxu3 %v3220_v60  ;;  %v792_v13 = vpop.permute.xlu2 %791 }
  0xd6   : > { %1665 = vmatmul.bf16.gmra.mxu2 %v4073_v14  ;;  %1754 = vmatmul.bf16.gmra.mxu3 %v4075_v16 }
  0xd7   : > { %v928_v24 = vadd.f32 %v864_v21, %v666_v10  ;;  %v929_v25 = vadd.f32 %v865_v22, %v667_v44  ;;  %986 = vperm.xlu0 %3561, %v425_v17   ;;  %3593 = vset.pattern.permute.xlu1 %v3624_v1  ;;  %v393_v10 = vld [vmem:[%s3703_s22 + $0x40] sm:$0xff]  ;;  %v670_v17 = vmul.f32 %v3867_v29, %v584_v40 }
  0xd8   : > { %971 = vperm.xlu1 %3593, %v422_v23   ;;  %v4085_v28 = vpop.permute.xlu0 %1076  ;;  %v671_v22 = vmul.f32 %v3869_v30, %v584_v40 }
  0xd9   : > { %v1222_v41 = vadd.f32 %v1158_v35, %v928_v24  ;;  %v1223_v42 = vadd.f32 %v1159_v36, %v929_v25  ;;  %v424_v25 = vld [vmem:[%s3697_s19 + $0x38] sm:$0xff]  ;;  %v870_v36 = vmul.f32 %v3861_v26, %v792_v13  ;;  %v1162_v38 = vmul.f32 %v3873_v33, %v4085_v28 }
  0xda   : > { %v1163_v40 = vmul.f32 %v3875_v34, %v4085_v28  ;;  %v3451_v28 = vld [vmem:[%s5197_s4 + $0x24] sm:$0xf] }
  0xdb   : > { %v1292_v52 = vadd.f32 %v3898_v56, %v1222_v41  ;;  %v1293_v53 = vadd.f32 %v3900_v57, %v1223_v42  ;;  %v871_v41 = vmul.f32 %v3863_v27, %v792_v13  ;;  %v673_v42 = vmul.f32 %v3869_v30, %v4060_v58 }
  0xdc   : > { %v934_v39 = vadd.f32 %v870_v36, %v672_v37  ;;  %v426_v36 = vld [vmem:[%s3697_s19 + $0x48] sm:$0xff] }
  0xdd   : > { %v1072_v47 = vpop.permute.xlu1 %1071  ;;  %3596 = vset.pattern.permute.xlu2 %v3623_v0  ;;  %v1356_v7 = vmax.f32 %v1292_v52, 0.0  ;;  %v1357_v5 = vmax.f32 %v1293_v53, 0.0  ;;  %v935_v58 = vadd.f32 %v871_v41, %v673_v42  ;;  %v4192_v41 = vld [vmem:[%s3703_s22 + $0x78] sm:$0xff] }
  0xde   : > { %v1160_v20 = vmul.f32 %v3873_v33, %v1072_v47  ;;  %v1161_v50 = vmul.f32 %v3875_v34, %v1072_v47  ;;  %711 = vperm.xlu2 %3596, %v4009_v3  }
  0xdf   : > { %508 = vperm.xlu0 %3561, %v4096_v43  }
  0xe0   : > { %v1224_v59 = vadd.f32 %v1160_v20, %v930_v46  ;;  %v1225_v15 = vadd.f32 %v1161_v50, %v931_v49  ;;  %3595 = vset.pattern.permute.xlu1 %v3623_v0  ;;  %v4118_v3 = vpop.permute.xlu0 %598  ;;  %v4150_v46 = vld [vmem:[%s3703_s22 + $0x68] sm:$0xff]  ;;  %v594_v49 = vpop.permute.xlu2 %593 }
  0xe1   : > { %707 = vperm.xlu1 %3595, %v391_v4   ;;  %v3145_v50 = vld [vmem:[%s5197_s4 + $0x28] sm:$0xf0]  ;;  %v675_v37 = vmul.f32 %v3869_v30, %v594_v49 }
  0xe2   : > { %v1294_v61 = vadd.f32 %v3898_v56, %v1224_v59  ;;  %v1295_v62 = vadd.f32 %v3900_v57, %v1225_v15  ;;  %v3148_v53 = vor.u32 %v3451_v28, %v3145_v50 }
  0xe4   : > { %v1358_v8 = vmax.f32 %v1294_v61, 0.0  ;;  %v1359_v9 = vmax.f32 %v1295_v62, 0.0  ;;  %1785 = vmatpush.bf16.msrb.mxu2 %v3148_v53 }
  0xe6   : > { %v788_v44 = vpop.permute.xlu1 %787  ;;  %3598 = vset.pattern.permute.xlu2 %v3624_v1  ;;  %v4126_v21 = vpack.c.bf16 %v1358_v8, %v1356_v7  ;;  %v4128_v4 = vpack.c.bf16 %v1359_v9, %v1357_v5 }
  0xe7   : > { %v868_v23 = vmul.f32 %v3861_v26, %v788_v44  ;;  %v869_v24 = vmul.f32 %v3863_v27, %v788_v44  ;;  %996 = vperm.xlu0 %3561, %v427_v6   ;;  %493 = vperm.xlu2 %3598, %v393_v10   ;;  %v429_v6 = vld [vmem:[%s3697_s19 + $0x60] sm:$0xff]  ;;  %v395_v44 = vld [vmem:[%s3703_s22 + $0x50] sm:$0xff] }
  0xe8   : > { %1670 = vmatmul.bf16.gmra.mxu2 %v4126_v21  ;;  %1759 = vmatmul.bf16.gmra.mxu3 %v4128_v4  ;;  %v4136_v35 = vpop.permute.xlu0 %1086 }
  0xe9   : > { %v932_v31 = vadd.f32 %v868_v23, %v670_v17  ;;  %v933_v32 = vadd.f32 %v869_v24, %v671_v22  ;;  %3597 = vset.pattern.permute.xlu1 %v3624_v1  ;;  %v674_v24 = vmul.f32 %v3867_v29, %v594_v49  ;;  %v676_v49 = vmul.f32 %v3867_v29, %v4118_v3 }
  0xea   : > { %981 = vperm.xlu1 %3597, %v424_v25   ;;  %v800_v25 = vpop.permute.xlu2 %799  ;;  %v1167_v28 = vmul.f32 %v3875_v34, %v4136_v35 }
  0xeb   : > { %v1226_v47 = vadd.f32 %v1162_v38, %v932_v31  ;;  %v1227_v48 = vadd.f32 %v1163_v40, %v933_v32  ;;  %v874_v42 = vmul.f32 %v3861_v26, %v800_v25 }
  0xed   : > { %v1296_v59 = vadd.f32 %v3898_v56, %v1226_v47  ;;  %v1297_v15 = vadd.f32 %v3900_v57, %v1227_v48  ;;  %v1166_v47 = vmul.f32 %v3873_v33, %v4136_v35  ;;  %v3449_v35 = vld [vmem:[%s5197_s4 + $0x14] sm:$0xf] }
  0xef   : > { %518 = vperm.xlu0 %3561, %v4150_v46   ;;  %v1082_v20 = vpop.permute.xlu1 %1081  ;;  %3600 = vset.pattern.permute.xlu2 %v3623_v0  ;;  %v1360_v5 = vmax.f32 %v1296_v59, 0.0  ;;  %v1361_v13 = vmax.f32 %v1297_v15, 0.0  ;;  %v3137_v15 = vld [vmem:[%s5197_s4 + $0x18] sm:$0xf0] }
  0xf0   : > { %v1164_v51 = vmul.f32 %v3873_v33, %v1082_v20  ;;  %v1165_v52 = vmul.f32 %v3875_v34, %v1082_v20  ;;  %719 = vperm.xlu2 %3600, %v4045_v45   ;;  %v3212_v45 = vor.u32 %v3467_v54, %v3209_v55  ;;  %v4172_v62 = vpop.permute.xlu0 %608  ;;  %v677_v20 = vmul.f32 %v3869_v30, %v4118_v3 }
  0xf2   : > { %v1228_v60 = vadd.f32 %v1164_v51, %v934_v39  ;;  %v1229_v61 = vadd.f32 %v1165_v52, %v935_v58  ;;  %3599 = vset.pattern.permute.xlu1 %v3623_v0  ;;  %1874 = vmatpush.bf16.msrb.mxu3 %v3212_v45  ;;  %v875_v39 = vmul.f32 %v3863_v27, %v800_v25  ;;  %v604_v3 = vpop.permute.xlu2 %603 }
  0xf3   : > { %715 = vperm.xlu1 %3599, %v393_v10   ;;  %v938_v52 = vadd.f32 %v874_v42, %v676_v49  ;;  %v3463_v49 = vld [vmem:[%s5197_s4 + $0x84] sm:$0xf] }
  0xf4   : > { %v1298_v7 = vadd.f32 %v3898_v56, %v1228_v60  ;;  %v1299_v8 = vadd.f32 %v3900_v57, %v1229_v61  ;;  %v939_v53 = vadd.f32 %v875_v39, %v677_v20  ;;  %v3465_v60 = vld [vmem:[%s5197_s4 + $0x94] sm:$0xf]  ;;  %v3129_v39 = vld [vmem:[%s5197_s4 + $0x8] sm:$0xf0]  ;;  %v678_v20 = vmul.f32 %v3867_v29, %v604_v3 }
  0xf6   : > { %v1362_v9 = vmax.f32 %v1298_v7, 0.0  ;;  %v1363_v17 = vmax.f32 %v1299_v8, 0.0  ;;  %v3140_v7 = vor.u32 %v3449_v35, %v3137_v15  ;;  %v3201_v8 = vld [vmem:[%s5197_s4 + $0x98] sm:$0xf0] }
  0xf7   : > { %1006 = vperm.xlu0 %3561, %v429_v6  }
  0xf8   : > { %v796_v22 = vpop.permute.xlu1 %795  ;;  %3602 = vset.pattern.permute.xlu2 %v3624_v1  ;;  %v4179_v23 = vpack.c.bf16 %v1362_v9, %v1360_v5  ;;  %v4181_v10 = vpack.c.bf16 %v1363_v17, %v1361_v13  ;;  %v4197_v48 = vpop.permute.xlu0 %1096  ;;  %v3204_v5 = vor.u32 %v3465_v60, %v3201_v8  ;;  %1786 = vmatpush.bf16.msrb.mxu2 %v3140_v7 }
  0xf9   : > { %v872_v31 = vmul.f32 %v3861_v26, %v796_v22  ;;  %v873_v32 = vmul.f32 %v3863_v27, %v796_v22  ;;  %503 = vperm.xlu2 %3602, %v395_v44   ;;  %v1170_v15 = vmul.f32 %v3873_v33, %v4197_v48  ;;  %v1171_v60 = vmul.f32 %v3875_v34, %v4197_v48 }
  0xfa   : > { %1675 = vmatmul.bf16.gmra.mxu2 %v4179_v23  ;;  %1764 = vmatmul.bf16.gmra.mxu3 %v4181_v10 }
  0xfb   : > { %v936_v38 = vadd.f32 %v872_v31, %v674_v24  ;;  %3601 = vset.pattern.permute.xlu1 %v3624_v1  ;;  %v937_v40 = vadd.f32 %v873_v32, %v675_v37  ;;  %1875 = vmatpush.bf16.msrb.mxu3 %v3204_v5  ;;  %v397_v32 = vld [vmem:[%s3703_s22 + $0x60] sm:$0xff] }
  0xfc   : > { %991 = vperm.xlu1 %3601, %v426_v36  }
  0xfd   : > { %v1230_v50 = vadd.f32 %v1166_v47, %v936_v38  ;;  %v1231_v58 = vadd.f32 %v1167_v28, %v937_v40  ;;  %v428_v38 = vld [vmem:[%s3697_s19 + $0x58] sm:$0xff]  ;;  %v3447_v47 = vld [vmem:[%s5197_s4 + $0x4] sm:$0xf]  ;;  %v679_v28 = vmul.f32 %v3869_v30, %v604_v3  ;;  %v681_v3 = vmul.f32 %v3869_v30, %v4172_v62 }
  0xff   : > { %528 = vperm.xlu0 %3561, %v4192_v41   ;;  %v1300_v59 = vadd.f32 %v3898_v56, %v1230_v50  ;;  %v1301_v6 = vadd.f32 %v3900_v57, %v1231_v58  ;;  %v3132_v50 = vor.u32 %v3447_v47, %v3129_v39  ;;  %v3193_v58 = vld [vmem:[%s5197_s4 + $0x88] sm:$0xf0]  ;;  %v399_v47 = vld [vmem:[%s3703_s22 + $0x70] sm:$0xff]  ;;  %s5104_s22 = scalar_lea.vmem %s5203_s10, %s3691_s16 }
 0x101   : > { %v1092_v51 = vpop.permute.xlu1 %1091  ;;  %3604 = vset.pattern.permute.xlu2 %v3623_v0  ;;  %v4229_v17 = vpop.permute.xlu0 %458  ;;  %v1364_v22 = vmax.f32 %v1300_v59, 0.0  ;;  %v1365_v25 = vmax.f32 %v1301_v6, 0.0  ;;  %1787 = vmatpush.bf16.msrb.mxu2 %v3132_v50  ;;  %v3493_v50 = vld [vmem:[%s5199_s6 + $0x74] sm:$0xf] }
 0x102   : > { %v1168_v54 = vmul.f32 %v3873_v33, %v1092_v51  ;;  %v1169_v55 = vmul.f32 %v3875_v34, %v1092_v51  ;;  %727 = vperm.xlu2 %3604, %v4096_v43   ;;  %v431_v43 = vld [vmem:[%s3697_s19 + $0x70] sm:$0xff]  ;;  %v808_v51 = vpop.permute.xlu2 %807 }
 0x103   : > { %v878_v59 = vmul.f32 %v3861_v26, %v808_v51  ;;  %v879_v35 = vmul.f32 %v3863_v27, %v808_v51 }
 0x104   : > { %v1232_v61 = vadd.f32 %v1168_v54, %v938_v52  ;;  %v1233_v45 = vadd.f32 %v1169_v55, %v939_v53  ;;  %3603 = vset.pattern.permute.xlu1 %v3623_v0  ;;  %v3196_v52 = vor.u32 %v3463_v49, %v3193_v58  ;;  %v680_v55 = vmul.f32 %v3867_v29, %v4172_v62  ;;  %v3313_v58 = vld [vmem:[%s5199_s6 + $0x78] sm:$0xf0] }
 0x105   : > { %723 = vperm.xlu1 %3603, %v395_v44   ;;  %v943_v8 = vadd.f32 %v879_v35, %v681_v3 }
 0x106   : > { %v1302_v9 = vadd.f32 %v3898_v56, %v1232_v61  ;;  %v1303_v13 = vadd.f32 %v3900_v57, %v1233_v45  ;;  %1876 = vmatpush.bf16.msrb.mxu3 %v3196_v52  ;;  %v942_v7 = vadd.f32 %v878_v59, %v680_v55 }
 0x107   : > { %1016 = vperm.xlu0 %3561, %v431_v43  }
 0x108   : > { %v1366_v24 = vmax.f32 %v1302_v9, 0.0  ;;  %v1367_v31 = vmax.f32 %v1303_v13, 0.0 }
 0x109   : > { %v947_v61 = vpop.permute.xlu0 %946 }
 0x10a   : > { %v804_v36 = vpop.permute.xlu1 %803  ;;  %3606 = vset.pattern.permute.xlu2 %v3624_v1  ;;  %v4233_v44 = vpack.c.bf16 %v1366_v24, %v1364_v22  ;;  %v4235_v37 = vpack.c.bf16 %v1367_v31, %v1365_v25  ;;  %v454_v9 = vpop.permute.xlu2 %453  ;;  %v4277_v25 = vld [vmem:[%s5198_s5] sm:$0x3] }
 0x10b   : > { %v876_v40 = vmul.f32 %v3861_v26, %v804_v36  ;;  %v877_v42 = vmul.f32 %v3863_v27, %v804_v36  ;;  %513 = vperm.xlu2 %3606, %v397_v32   ;;  %v4285_v49 = vperm.slane %v4277_v25, 0  ;;  %v618_v55 = vmul.f32 %v3867_v29, %v454_v9 }
 0x10c   : > { %1680 = vmatmul.bf16.gmra.mxu2 %v4233_v44  ;;  %1769 = vmatmul.bf16.gmra.mxu3 %v4235_v37  ;;  %v619_v3 = vmul.f32 %v3869_v30, %v454_v9  ;;  %v620_v9 = vmul.f32 %v3867_v29, %v4229_v17 }
 0x10d   : > { %3605 = vset.pattern.permute.xlu1 %v3624_v1  ;;  %v940_v53 = vadd.f32 %v876_v40, %v678_v20  ;;  %v941_v54 = vadd.f32 %v877_v42, %v679_v28 }
 0x10e   : > { %1001 = vperm.xlu1 %3605, %v428_v38  }
 0x10f   : > { %v1234_v45 = vadd.f32 %v1170_v15, %v940_v53  ;;  %v1235_v43 = vadd.f32 %v1171_v60, %v941_v54  ;;  %v430_v53 = vld [vmem:[%s3697_s19 + $0x68] sm:$0xff]  ;;  %v3316_v54 = vor.u32 %v3493_v50, %v3313_v58 }
 0x111   : > { %v1304_v48 = vadd.f32 %v3898_v56, %v1234_v45  ;;  %v1305_v24 = vadd.f32 %v3900_v57, %v1235_v43  ;;  %v4282_v39 = vpop.permute.xlu0 %468  ;;  %2430 = vmatpush.bf16.msra.mxu2 %v3316_v54 }
 0x112   : > { %v688_v15 = vpop.permute.xlu2 %687 }
 0x113   : > { %v1102_v6 = vpop.permute.xlu1 %1101  ;;  %3608 = vset.pattern.permute.xlu2 %v3623_v0  ;;  %v1369_v40 = vmax.f32 %v1305_v24, 0.0  ;;  %v3509_v24 = vld [vmem:[%s5199_s6 + $0xf4] sm:$0xf] }
 0x114   : > { %v1172_v62 = vmul.f32 %v3873_v33, %v1102_v6  ;;  %v1173_v5 = vmul.f32 %v3875_v34, %v1102_v6  ;;  %735 = vperm.xlu2 %3608, %v4150_v46   ;;  %v1368_v46 = vmax.f32 %v1304_v48, 0.0 }
 0x116   : > { %v1236_v13 = vadd.f32 %v1172_v62, %v942_v7  ;;  %v1237_v22 = vadd.f32 %v1173_v5, %v943_v8  ;;  %3607 = vset.pattern.permute.xlu1 %v3623_v0  ;;  %v818_v7 = vmul.f32 %v3861_v26, %v688_v15  ;;  %v819_v8 = vmul.f32 %v3863_v27, %v688_v15 }
 0x117   : > { %731 = vperm.xlu1 %3607, %v397_v32   ;;  %v1110_v62 = vmul.f32 %v3873_v33, %v947_v61  ;;  %v1111_v5 = vmul.f32 %v3875_v34, %v947_v61 }
 0x118   : > { %v1306_v31 = vadd.f32 %v3898_v56, %v1236_v13  ;;  %v1307_v36 = vadd.f32 %v3900_v57, %v1237_v22  ;;  %v621_v13 = vmul.f32 %v3869_v30, %v4229_v17 }
 0x11a   : > { %v1370_v38 = vmax.f32 %v1306_v31, 0.0  ;;  %v1371_v42 = vmax.f32 %v1307_v36, 0.0  ;;  %v3377_v31 = vld [vmem:[%s5199_s6 + $0xf8] sm:$0xf0]  ;;  %v957_v36 = vpop.permute.xlu0 %956  ;;  %v464_v58 = vpop.permute.xlu2 %463 }
 0x11b   : > { %v3380_v61 = vor.u32 %v3509_v24, %v3377_v31  ;;  %v432_v31 = vld [vmem:[%s3697_s19 + $0x78] sm:$0xff] }
 0x11c   : > { %v684_v32 = vpop.permute.xlu1 %683  ;;  %3610 = vset.pattern.permute.xlu2 %v3624_v1  ;;  %v4288_v20 = vpack.c.bf16 %v1370_v38, %v1368_v46  ;;  %v4290_v28 = vpack.c.bf16 %v1371_v42, %v1369_v40  ;;  %v882_v38 = vadd.f32 %v818_v7, %v620_v9  ;;  %v883_v40 = vadd.f32 %v819_v8, %v621_v13 }
 0x11d   : > { %v816_v51 = vmul.f32 %v3861_v26, %v684_v32  ;;  %v817_v52 = vmul.f32 %v3863_v27, %v684_v32  ;;  %523 = vperm.xlu2 %3610, %v399_v47   ;;  %v1651_v59 = vpop.f32.mrf.mxu2  ;;  %v1740_v35 = vpop.f32.mrf.mxu3  ;;  %2519 = vmatpush.bf16.msra.mxu3 %v3380_v61  ;;  %v622_v13 = vmul.f32 %v3867_v29, %v464_v58 }
 0x11e   : > { %1685 = vmatmul.bf16.gmra.mxu2 %v4288_v20  ;;  %1774 = vmatmul.bf16.gmra.mxu3 %v4290_v28  ;;  %v1652_v60 = vadd.f32 %v1651_v59, %v4285_v49 }
 0x11f   : > { %3609 = vset.pattern.permute.xlu1 %v3624_v1  ;;  %v880_v45 = vadd.f32 %v816_v51, %v618_v55  ;;  %v881_v43 = vadd.f32 %v817_v52, %v619_v3 }
 0x120   : > { %1011 = vperm.xlu1 %3609, %v430_v53   ;;  %v4307_v6 = vadd.f32 %v1740_v35, %v1652_v60 }
 0x121   : > { %v1174_v22 = vadd.f32 %v1110_v62, %v880_v45  ;;  %v1175_v48 = vadd.f32 %v1111_v5, %v881_v43 }
 0x123   : > { %v1244_v53 = vadd.f32 %v3898_v56, %v1174_v22  ;;  %v1245_v54 = vadd.f32 %v3900_v57, %v1175_v48  ;;  %v623_v22 = vmul.f32 %v3869_v30, %v464_v58  ;;  %v4346_v48 = vpop.permute.xlu0 %478 }
 0x125   : > { %v952_v46 = vpop.permute.xlu1 %951  ;;  %3612 = vset.pattern.permute.xlu2 %v3623_v0  ;;  %v4326_v32 = vpop.f32.mrf.mxu2  ;;  %v1308_v59 = vmax.f32 %v1244_v53, 0.0  ;;  %v1309_v15 = vmax.f32 %v1245_v54, 0.0 }
 0x126   : > { %v1112_v42 = vmul.f32 %v3873_v33, %v952_v46  ;;  %v1113_v17 = vmul.f32 %v3875_v34, %v952_v46  ;;  %v4328_v50 = vpop.f32.mrf.mxu3  ;;  %743 = vperm.xlu2 %3612, %v4192_v41   ;;  %v3311_v41 = vld [vmem:[%s5199_s6 + $0x70] sm:$0xf]  ;;  %v696_v46 = vpop.permute.xlu2 %695 }
 0x127   : > { %v823_v53 = vmul.f32 %v3863_v27, %v696_v46 }
 0x128   : > { %v1176_v51 = vadd.f32 %v1112_v42, %v882_v38  ;;  %v1177_v52 = vadd.f32 %v1113_v17, %v883_v40  ;;  %3611 = vset.pattern.permute.xlu1 %v3623_v0  ;;  %v3494_v0 = vld [vmem:[%s5199_s6 + $0x74] sm:$0xf0]  ;;  %v3375_v42 = vld [vmem:[%s5199_s6 + $0xf0] sm:$0xf] }
 0x129   : > { %739 = vperm.xlu1 %3611, %v399_v47   ;;  %v3312_v9 = vor.u32 %v3494_v0, %v3311_v41  ;;  %v3510_v17 = vld [vmem:[%s5199_s6 + $0xf4] sm:$0xf0] }
 0x12a   : > { %v1246_v55 = vadd.f32 %v3898_v56, %v1176_v51  ;;  %v1247_v3 = vadd.f32 %v3900_v57, %v1177_v52  ;;  %v3376_v58 = vor.u32 %v3510_v17, %v3375_v42  ;;  %v1114_v51 = vmul.f32 %v3873_v33, %v957_v36 }
 0x12b   : > { %2252 = vmatpush.bf16.msrb.mxu0 %v3312_v9  ;;  %v822_v52 = vmul.f32 %v3861_v26, %v696_v46 }
 0x12c   : > { %v1310_v35 = vmax.f32 %v1246_v55, 0.0  ;;  %v1311_v60 = vmax.f32 %v1247_v3, 0.0  ;;  %2341 = vmatpush.bf16.msrb.mxu1 %v3376_v58  ;;  %v624_v3 = vmul.f32 %v3867_v29, %v4282_v39  ;;  %v3303_v58 = vld [vmem:[%s5199_s6 + $0x60] sm:$0xf] }
 0x12e   : > { %v692_v45 = vpop.permute.xlu1 %691  ;;  %v1372_v43 = vpack.c.bf16 %v1310_v35, %v1308_v59  ;;  %v1373_v47 = vpack.c.bf16 %v1311_v60, %v1309_v15  ;;  %v625_v59 = vmul.f32 %v3869_v30, %v4282_v39  ;;  %v886_v41 = vadd.f32 %v822_v52, %v624_v3  ;;  %v474_v0 = vpop.permute.xlu2 %473 }
 0x12f   : > { %v820_v7 = vmul.f32 %v3861_v26, %v692_v45  ;;  %v821_v8 = vmul.f32 %v3863_v27, %v692_v45  ;;  %v1656_v62 = vpop.f32.mrf.mxu2  ;;  %v1745_v5 = vpop.f32.mrf.mxu3  ;;  %v626_v52 = vmul.f32 %v3867_v29, %v474_v0 }
 0x130   : > { %v1657_v24 = vadd.f32 %v1656_v62, %v4285_v49  ;;  %1610 = vmatmul.bf16.vlgmr.msra.gmra.mxu0 %v1372_v43  ;;  %1699 = vmatmul.bf16.vlgmr.msra.gmra.mxu1 %v1373_v47 }
 0x131   : > { %3613 = vset.pattern.permute.xlu1 %v3624_v1  ;;  %v884_v61 = vadd.f32 %v820_v7, %v622_v13  ;;  %v885_v38 = vadd.f32 %v821_v8, %v623_v22  ;;  %1788 = vmatmul.bf16.vlgmr.msrb.gmra.mxu2 %v1372_v43  ;;  %v1115_v1 = vmul.f32 %v3875_v34, %v957_v36 }
 0x132   : > { %v4351_v40 = vadd.f32 %v1745_v5, %v1657_v24  ;;  %1877 = vmatmul.bf16.vlgmr.msrb.gmra.mxu3 %v1373_v47  ;;  %1021 = vperm.xlu1 %3613, %v432_v31   ;;  %v887_v36 = vadd.f32 %v823_v53, %v625_v59  ;;  %v967_v47 = vpop.permute.xlu0 %966  ;;  %v3369_v59 = vld [vmem:[%s5199_s6 + $0xe8] sm:$0xf0] }
 0x133   : > { %v1178_v54 = vadd.f32 %v1114_v51, %v884_v61  ;;  %v1179_v55 = vadd.f32 %v1115_v1, %v885_v38  ;;  %v3491_v61 = vld [vmem:[%s5199_s6 + $0x64] sm:$0xf]  ;;  %v3305_v38 = vld [vmem:[%s5199_s6 + $0x68] sm:$0xf0]  ;;  %v3492_v51 = vld [vmem:[%s5199_s6 + $0x64] sm:$0xf0] }
 0x134   : > { %v3308_v17 = vor.u32 %v3491_v61, %v3305_v38  ;;  %v3507_v1 = vld [vmem:[%s5199_s6 + $0xe4] sm:$0xf] }
 0x135   : > { %v1248_v7 = vadd.f32 %v3898_v56, %v1178_v54  ;;  %v1249_v8 = vadd.f32 %v3900_v57, %v1179_v55 }
 0x136   : > { %2431 = vmatpush.bf16.msra.mxu2 %v3308_v17 }
 0x137   : > { %v4367_v35 = vpop.f32.mrf.mxu2  ;;  %v4369_v15 = vpop.f32.mrf.mxu3  ;;  %v1312_v13 = vmax.f32 %v1248_v7, 0.0  ;;  %v1313_v22 = vmax.f32 %v1249_v8, 0.0  ;;  %v3304_v7 = vor.u32 %v3492_v51, %v3303_v58  ;;  %v3372_v8 = vor.u32 %v3507_v1, %v3369_v59 }
 0x138   : > { %v962_v60 = vpop.permute.xlu1 %961 }
 0x139   : > { %v1116_v45 = vmul.f32 %v3873_v33, %v962_v60  ;;  %v1117_v43 = vmul.f32 %v3875_v34, %v962_v60  ;;  %v627_v60 = vmul.f32 %v3869_v30, %v474_v0  ;;  %2253 = vmatpush.bf16.msrb.mxu0 %v3304_v7  ;;  %2520 = vmatpush.bf16.msra.mxu3 %v3372_v8 }
 0x13a   : > { %v1118_v0 = vmul.f32 %v3873_v33, %v967_v47 }
 0x13b   : > { %v1180_v62 = vadd.f32 %v1116_v45, %v886_v41  ;;  %v1181_v5 = vadd.f32 %v1117_v43, %v887_v36  ;;  %v704_v43 = vpop.permute.xlu2 %703 }
 0x13d   : > { %v1250_v39 = vadd.f32 %v3898_v56, %v1180_v62  ;;  %v1251_v9 = vadd.f32 %v3900_v57, %v1181_v5  ;;  %v4402_v62 = vpop.permute.xlu0 %488 }
 0x13f   : > { %v1314_v31 = vmax.f32 %v1250_v39, 0.0  ;;  %v1315_v46 = vmax.f32 %v1251_v9, 0.0  ;;  %v1119_v9 = vmul.f32 %v3875_v34, %v967_v47  ;;  %v629_v47 = vmul.f32 %v3869_v30, %v4346_v48 }
 0x140   : > { %v1661_v24 = vpop.f32.mrf.mxu2  ;;  %v1750_v53 = vpop.f32.mrf.mxu3 }
 0x141   : > { %v1662_v42 = vadd.f32 %v1661_v24, %v4285_v49  ;;  %v700_v54 = vpop.permute.xlu1 %699  ;;  %v1374_v55 = vpack.c.bf16 %v1314_v31, %v1312_v13  ;;  %v1375_v3 = vpack.c.bf16 %v1315_v46, %v1313_v22  ;;  %v3367_v13 = vld [vmem:[%s5199_s6 + $0xe0] sm:$0xf]  ;;  %v3508_v22 = vld [vmem:[%s5199_s6 + $0xe4] sm:$0xf0]  ;;  %v826_v24 = vmul.f32 %v3861_v26, %v704_v43 }
 0x142   : > { %v824_v36 = vmul.f32 %v3861_v26, %v700_v54  ;;  %v825_v45 = vmul.f32 %v3863_v27, %v700_v54  ;;  %v827_v31 = vmul.f32 %v3863_v27, %v704_v43  ;;  %v3368_v46 = vor.u32 %v3508_v22, %v3367_v13  ;;  %v3359_v13 = vld [vmem:[%s5199_s6 + $0xd0] sm:$0xf]  ;;  %v3506_v22 = vld [vmem:[%s5199_s6 + $0xd4] sm:$0xf0] }
 0x143   : > { %v4398_v41 = vadd.f32 %v1750_v53, %v1662_v42  ;;  %1615 = vmatmul.bf16.gmra.mxu0 %v1374_v55  ;;  %1704 = vmatmul.bf16.gmra.mxu1 %v1375_v3  ;;  %v628_v42 = vmul.f32 %v3867_v29, %v4346_v48  ;;  %v484_v1 = vpop.permute.xlu2 %483 }
 0x144   : > { %v888_v5 = vadd.f32 %v824_v36, %v626_v52  ;;  %v889_v39 = vadd.f32 %v825_v45, %v627_v60  ;;  %1793 = vmatmul.bf16.gmra.mxu2 %v1374_v55  ;;  %1882 = vmatmul.bf16.gmra.mxu3 %v1375_v3  ;;  %v891_v51 = vadd.f32 %v827_v31, %v629_v47 }
 0x145   : > { %2342 = vmatpush.bf16.msrb.mxu1 %v3368_v46  ;;  %v890_v58 = vadd.f32 %v826_v24, %v628_v42  ;;  %v977_v60 = vpop.permute.xlu0 %976  ;;  %v630_v42 = vmul.f32 %v3867_v29, %v484_v1  ;;  %v631_v47 = vmul.f32 %v3869_v30, %v484_v1 }
 0x146   : > { %v1182_v61 = vadd.f32 %v1118_v0, %v888_v5  ;;  %v1183_v38 = vadd.f32 %v1119_v9, %v889_v39  ;;  %v3295_v39 = vld [vmem:[%s5199_s6 + $0x50] sm:$0xf]  ;;  %v3490_v0 = vld [vmem:[%s5199_s6 + $0x54] sm:$0xf0] }
 0x147   : > { %v3296_v9 = vor.u32 %v3490_v0, %v3295_v39 }
 0x148   : > { %v1252_v54 = vadd.f32 %v3898_v56, %v1182_v61  ;;  %v1253_v55 = vadd.f32 %v3900_v57, %v1183_v38  ;;  %v4424_v7 = vpop.f32.mrf.mxu2  ;;  %v4438_v24 = vpop.f32.mrf.mxu3  ;;  %v3360_v38 = vor.u32 %v3506_v22, %v3359_v13 }
 0x149   : > { %2254 = vmatpush.bf16.msrb.mxu0 %v3296_v9 }
 0x14a   : > { %v972_v17 = vpop.permute.xlu1 %971  ;;  %v1316_v45 = vmax.f32 %v1252_v54, 0.0  ;;  %v1317_v43 = vmax.f32 %v1253_v55, 0.0  ;;  %2343 = vmatpush.bf16.msrb.mxu1 %v3360_v38  ;;  %v1122_v54 = vmul.f32 %v3873_v33, %v977_v60  ;;  %v1123_v55 = vmul.f32 %v3875_v34, %v977_v60 }
 0x14b   : > { %v1120_v52 = vmul.f32 %v3873_v33, %v972_v17  ;;  %v1121_v53 = vmul.f32 %v3875_v34, %v972_v17 }
 0x14d   : > { %v1184_v3 = vadd.f32 %v1120_v52, %v890_v58  ;;  %v1185_v59 = vadd.f32 %v1121_v53, %v891_v51  ;;  %v712_v51 = vpop.permute.xlu2 %711 }
 0x14e   : > { %v830_v1 = vmul.f32 %v3861_v26, %v712_v51 }
 0x14f   : > { %v1254_v36 = vadd.f32 %v3898_v56, %v1184_v3  ;;  %v1255_v48 = vadd.f32 %v3900_v57, %v1185_v59  ;;  %v4446_v3 = vpop.permute.xlu0 %498  ;;  %v831_v59 = vmul.f32 %v3863_v27, %v712_v51 }
 0x151   : > { %v1318_v8 = vmax.f32 %v1254_v36, 0.0  ;;  %v1319_v5 = vmax.f32 %v1255_v48, 0.0 }
 0x153   : > { %v708_v31 = vpop.permute.xlu1 %707  ;;  %v1376_v46 = vpack.c.bf16 %v1318_v8, %v1316_v45  ;;  %v1377_v61 = vpack.c.bf16 %v1319_v5, %v1317_v43  ;;  %v632_v8 = vmul.f32 %v3867_v29, %v4402_v62  ;;  %v633_v5 = vmul.f32 %v3869_v30, %v4402_v62 }
 0x154   : > { %v828_v17 = vmul.f32 %v3861_v26, %v708_v31  ;;  %v829_v58 = vmul.f32 %v3863_v27, %v708_v31 }
 0x155   : > { %1620 = vmatmul.bf16.gmra.mxu0 %v1376_v46  ;;  %1709 = vmatmul.bf16.gmra.mxu1 %v1377_v61  ;;  %v894_v9 = vadd.f32 %v830_v1, %v632_v8  ;;  %v895_v13 = vadd.f32 %v831_v59, %v633_v5  ;;  %v494_v22 = vpop.permute.xlu2 %493  ;;  %v3505_v8 = vld [vmem:[%s5199_s6 + $0xd4] sm:$0xf]  ;;  %v3361_v5 = vld [vmem:[%s5199_s6 + $0xd8] sm:$0xf0] }
 0x156   : > { %v892_v52 = vadd.f32 %v828_v17, %v630_v42  ;;  %v893_v53 = vadd.f32 %v829_v58, %v631_v47  ;;  %1798 = vmatmul.bf16.gmra.mxu2 %v1376_v46  ;;  %1887 = vmatmul.bf16.gmra.mxu3 %v1377_v61 }
 0x157   : > { %v987_v58 = vpop.permute.xlu0 %986 }
 0x158   : > { %v1186_v48 = vadd.f32 %v1122_v54, %v892_v52  ;;  %v1187_v45 = vadd.f32 %v1123_v55, %v893_v53  ;;  %v3489_v53 = vld [vmem:[%s5199_s6 + $0x54] sm:$0xf]  ;;  %v3297_v54 = vld [vmem:[%s5199_s6 + $0x58] sm:$0xf0] }
 0x159   : > { %v1666_v36 = vpop.f32.mrf.mxu2  ;;  %v1755_v39 = vpop.f32.mrf.mxu3 }
 0x15a   : > { %v1667_v43 = vadd.f32 %v1666_v36, %v4285_v49  ;;  %v1256_v61 = vadd.f32 %v3898_v56, %v1186_v48  ;;  %v1257_v38 = vadd.f32 %v3900_v57, %v1187_v45  ;;  %v3300_v36 = vor.u32 %v3489_v53, %v3297_v54  ;;  %v3287_v48 = vld [vmem:[%s5199_s6 + $0x40] sm:$0xf]  ;;  %v3488_v45 = vld [vmem:[%s5199_s6 + $0x44] sm:$0xf0] }
 0x15b   : > { %v1126_v54 = vmul.f32 %v3873_v33, %v987_v58 }
 0x15c   : > { %v4455_v0 = vadd.f32 %v1755_v39, %v1667_v43  ;;  %v982_v60 = vpop.permute.xlu1 %981  ;;  %v1320_v51 = vmax.f32 %v1256_v61, 0.0  ;;  %v1321_v52 = vmax.f32 %v1257_v38, 0.0  ;;  %v3288_v43 = vor.u32 %v3488_v45, %v3287_v48  ;;  %v3351_v39 = vld [vmem:[%s5199_s6 + $0xc0] sm:$0xf]  ;;  %2432 = vmatpush.bf16.msra.mxu2 %v3300_v36  ;;  %v3504_v61 = vld [vmem:[%s5199_s6 + $0xc4] sm:$0xf0] }
 0x15d   : > { %v1124_v31 = vmul.f32 %v3873_v33, %v982_v60  ;;  %v1125_v46 = vmul.f32 %v3875_v34, %v982_v60  ;;  %v634_v38 = vmul.f32 %v3867_v29, %v494_v22 }
 0x15e   : > { %2255 = vmatpush.bf16.msrb.mxu0 %v3288_v43 }
 0x15f   : > { %v1188_v42 = vadd.f32 %v1124_v31, %v894_v9  ;;  %v1189_v47 = vadd.f32 %v1125_v46, %v895_v13  ;;  %v3364_v46 = vor.u32 %v3505_v8, %v3361_v5  ;;  %v509_v48 = vpop.permute.xlu0 %508  ;;  %v636_v5 = vmul.f32 %v3867_v29, %v4446_v3 }
 0x161   : > { %v1258_v17 = vadd.f32 %v3898_v56, %v1188_v42  ;;  %v1259_v62 = vadd.f32 %v3900_v57, %v1189_v47  ;;  %v4469_v55 = vpop.f32.mrf.mxu2  ;;  %v4486_v60 = vpop.f32.mrf.mxu3  ;;  %v635_v42 = vmul.f32 %v3869_v30, %v494_v22  ;;  %2521 = vmatpush.bf16.msra.mxu3 %v3364_v46 }
 0x163   : > { %v1322_v1 = vmax.f32 %v1258_v17, 0.0  ;;  %v1323_v59 = vmax.f32 %v1259_v62, 0.0  ;;  %v720_v62 = vpop.permute.xlu2 %719 }
 0x164   : > { %v834_v22 = vmul.f32 %v3861_v26, %v720_v62 }
 0x165   : > { %v716_v9 = vpop.permute.xlu1 %715  ;;  %v1378_v13 = vpack.c.bf16 %v1322_v1, %v1320_v51  ;;  %v1379_v31 = vpack.c.bf16 %v1323_v59, %v1321_v52  ;;  %v3352_v51 = vor.u32 %v3504_v61, %v3351_v39  ;;  %v1127_v1 = vmul.f32 %v3875_v34, %v987_v58 }
 0x166   : > { %v832_v47 = vmul.f32 %v3861_v26, %v716_v9  ;;  %v833_v17 = vmul.f32 %v3863_v27, %v716_v9  ;;  %v835_v59 = vmul.f32 %v3863_v27, %v720_v62  ;;  %v637_v39 = vmul.f32 %v3869_v30, %v4446_v3 }
 0x167   : > { %1625 = vmatmul.bf16.gmra.mxu0 %v1378_v13  ;;  %1714 = vmatmul.bf16.gmra.mxu1 %v1379_v31 }
 0x168   : > { %v896_v52 = vadd.f32 %v832_v47, %v634_v38  ;;  %v897_v53 = vadd.f32 %v833_v17, %v635_v42  ;;  %1803 = vmatmul.bf16.gmra.mxu2 %v1378_v13  ;;  %1892 = vmatmul.bf16.gmra.mxu3 %v1379_v31  ;;  %v898_v31 = vadd.f32 %v834_v22, %v636_v5  ;;  %v3486_v22 = vld [vmem:[%s5199_s6 + $0x34] sm:$0xf0] }
 0x169   : > { %2344 = vmatpush.bf16.msrb.mxu1 %v3352_v51  ;;  %v899_v46 = vadd.f32 %v835_v59, %v637_v39  ;;  %v3502_v5 = vld [vmem:[%s5199_s6 + $0xb4] sm:$0xf0]  ;;  %v997_v39 = vpop.permute.xlu0 %996 }
 0x16a   : > { %v1190_v45 = vadd.f32 %v1126_v54, %v896_v52  ;;  %v1191_v43 = vadd.f32 %v1127_v1, %v897_v53  ;;  %v3279_v1 = vld [vmem:[%s5199_s6 + $0x30] sm:$0xf] }
 0x16b   : > { %v1671_v36 = vpop.f32.mrf.mxu2  ;;  %v1760_v9 = vpop.f32.mrf.mxu3 }
 0x16c   : > { %v1672_v8 = vadd.f32 %v1671_v36, %v4285_v49  ;;  %v504_v61 = vpop.permute.xlu2 %503  ;;  %v1260_v47 = vadd.f32 %v3898_v56, %v1190_v45  ;;  %v1261_v17 = vadd.f32 %v3900_v57, %v1191_v43  ;;  %v3280_v43 = vor.u32 %v3486_v22, %v3279_v1 }
 0x16e   : > { %v4504_v13 = vadd.f32 %v1760_v9, %v1672_v8  ;;  %v992_v58 = vpop.permute.xlu1 %991  ;;  %v1324_v53 = vmax.f32 %v1260_v47, 0.0  ;;  %v1325_v54 = vmax.f32 %v1261_v17, 0.0  ;;  %v3343_v8 = vld [vmem:[%s5199_s6 + $0xb0] sm:$0xf]  ;;  %2256 = vmatpush.bf16.msrb.mxu0 %v3280_v43 }
 0x16f   : > { %v1128_v38 = vmul.f32 %v3873_v33, %v992_v58  ;;  %v1129_v42 = vmul.f32 %v3875_v34, %v992_v58  ;;  %v3344_v9 = vor.u32 %v3502_v5, %v3343_v8  ;;  %v641_v8 = vmul.f32 %v3869_v30, %v509_v48 }
 0x170   : > { %5204 = vst [vmem:[#allocation2_spill] sm:$0xff] %v4504_v13 }
 0x171   : > { %v1192_v62 = vadd.f32 %v1128_v38, %v898_v31  ;;  %v1193_v51 = vadd.f32 %v1129_v42, %v899_v46  ;;  %v638_v42 = vmul.f32 %v3867_v29, %v504_v61  ;;  %2345 = vmatpush.bf16.msrb.mxu1 %v3344_v9 }
 0x173   : > { %v1262_v52 = vadd.f32 %v3898_v56, %v1192_v62  ;;  %v1263_v3 = vadd.f32 %v3900_v57, %v1193_v51  ;;  %v4518_v59 = vpop.f32.mrf.mxu2  ;;  %v4526_v58 = vpop.f32.mrf.mxu3  ;;  %v639_v62 = vmul.f32 %v3869_v30, %v504_v61  ;;  %v640_v61 = vmul.f32 %v3867_v29, %v509_v48 }
 0x174   : > { %v728_v51 = vpop.permute.xlu2 %727 }
 0x175   : > { %v1326_v36 = vmax.f32 %v1262_v52, 0.0  ;;  %v1327_v45 = vmax.f32 %v1263_v3, 0.0  ;;  %v838_v1 = vmul.f32 %v3861_v26, %v728_v51  ;;  %v839_v22 = vmul.f32 %v3863_v27, %v728_v51 }
 0x177   : > { %v724_v31 = vpop.permute.xlu1 %723  ;;  %v1380_v46 = vpack.c.bf16 %v1326_v36, %v1324_v53  ;;  %v1381_v38 = vpack.c.bf16 %v1327_v45, %v1325_v54  ;;  %v1130_v53 = vmul.f32 %v3873_v33, %v997_v39  ;;  %v1131_v54 = vmul.f32 %v3875_v34, %v997_v39  ;;  %v3487_v39 = vld [vmem:[%s5199_s6 + $0x44] sm:$0xf] }
 0x178   : > { %v836_v47 = vmul.f32 %v3861_v26, %v724_v31  ;;  %v837_v17 = vmul.f32 %v3863_v27, %v724_v31  ;;  %v519_v31 = vpop.permute.xlu0 %518 }
 0x179   : > { %1630 = vmatmul.bf16.gmra.mxu0 %v1380_v46  ;;  %1719 = vmatmul.bf16.gmra.mxu1 %v1381_v38 }
 0x17a   : > { %v900_v52 = vadd.f32 %v836_v47, %v638_v42  ;;  %1808 = vmatmul.bf16.gmra.mxu2 %v1380_v46  ;;  %v901_v3 = vadd.f32 %v837_v17, %v639_v62  ;;  %1897 = vmatmul.bf16.gmra.mxu3 %v1381_v38  ;;  %v3289_v42 = vld [vmem:[%s5199_s6 + $0x48] sm:$0xf0]  ;;  %v902_v47 = vadd.f32 %v838_v1, %v640_v61 }
 0x17b   : > { %v903_v17 = vadd.f32 %v839_v22, %v641_v8  ;;  %v3292_v1 = vor.u32 %v3487_v39, %v3289_v42  ;;  %v3500_v39 = vld [vmem:[%s5199_s6 + $0xa4] sm:$0xf0] }
 0x17c   : > { %v1194_v45 = vadd.f32 %v1130_v53, %v900_v52  ;;  %v1195_v5 = vadd.f32 %v1131_v54, %v901_v3  ;;  %v514_v62 = vpop.permute.xlu2 %513  ;;  %v3271_v52 = vld [vmem:[%s5199_s6 + $0x20] sm:$0xf]  ;;  %v3484_v3 = vld [vmem:[%s5199_s6 + $0x24] sm:$0xf0]  ;;  %v3503_v53 = vld [vmem:[%s5199_s6 + $0xc4] sm:$0xf] }
 0x17d   : > { %v1676_v36 = vpop.f32.mrf.mxu2  ;;  %v1765_v9 = vpop.f32.mrf.mxu3  ;;  %v3272_v22 = vor.u32 %v3484_v3, %v3271_v52  ;;  %2433 = vmatpush.bf16.msra.mxu2 %v3292_v1 }
 0x17e   : > { %v1677_v43 = vadd.f32 %v1676_v36, %v4285_v49  ;;  %v1264_v54 = vadd.f32 %v3898_v56, %v1194_v45  ;;  %v3353_v36 = vld [vmem:[%s5199_s6 + $0xc8] sm:$0xf0]  ;;  %v1265_v8 = vadd.f32 %v3900_v57, %v1195_v5  ;;  %v3335_v45 = vld [vmem:[%s5199_s6 + $0xa0] sm:$0xf] }
 0x17f   : > { %2257 = vmatpush.bf16.msrb.mxu0 %v3272_v22 }
 0x180   : > { %v4539_v46 = vadd.f32 %v1765_v9, %v1677_v43  ;;  %v1002_v38 = vpop.permute.xlu1 %1001  ;;  %v3356_v9 = vor.u32 %v3503_v53, %v3353_v36  ;;  %v1328_v13 = vmax.f32 %v1264_v54, 0.0  ;;  %v1007_v54 = vpop.permute.xlu0 %1006  ;;  %v642_v36 = vmul.f32 %v3867_v29, %v514_v62 }
 0x181   : > { %v1132_v51 = vmul.f32 %v3873_v33, %v1002_v38  ;;  %v1133_v48 = vmul.f32 %v3875_v34, %v1002_v38 }
 0x182   : > { %5205 = vst [vmem:[#allocation3_spill] sm:$0xff] %v4539_v46  ;;  %2522 = vmatpush.bf16.msra.mxu3 %v3356_v9  ;;  %v1134_v9 = vmul.f32 %v3873_v33, %v1007_v54 }
 0x183   : > { %v1196_v43 = vadd.f32 %v1132_v51, %v902_v47  ;;  %v1197_v61 = vadd.f32 %v1133_v48, %v903_v17  ;;  %v1329_v47 = vmax.f32 %v1265_v8, 0.0  ;;  %v3336_v51 = vor.u32 %v3500_v39, %v3335_v45 }
 0x185   : > { %v1266_v38 = vadd.f32 %v3898_v56, %v1196_v43  ;;  %v1267_v46 = vadd.f32 %v3900_v57, %v1197_v61  ;;  %v4571_v42 = vpop.f32.mrf.mxu2  ;;  %v4573_v48 = vpop.f32.mrf.mxu3  ;;  %2346 = vmatpush.bf16.msrb.mxu1 %v3336_v51  ;;  %v643_v43 = vmul.f32 %v3869_v30, %v514_v62 }
 0x186   : > { %5206 = vst [vmem:[#allocation4_spill] sm:$0xff] %v4571_v42  ;;  %v736_v61 = vpop.permute.xlu2 %735 }
 0x187   : > { %v1330_v5 = vmax.f32 %v1266_v38, 0.0  ;;  %v1331_v17 = vmax.f32 %v1267_v46, 0.0  ;;  %5207 = vst [vmem:[#allocation5_spill] sm:$0xff] %v4573_v48  ;;  %v1135_v38 = vmul.f32 %v3875_v34, %v1007_v54  ;;  %v843_v45 = vmul.f32 %v3863_v27, %v736_v61  ;;  %v3263_v54 = vld [vmem:[%s5199_s6 + $0x10] sm:$0xf] }
 0x189   : > { %v732_v52 = vpop.permute.xlu1 %731  ;;  %v1382_v3 = vpack.c.bf16 %v1330_v5, %v1328_v13  ;;  %v1383_v53 = vpack.c.bf16 %v1331_v17, %v1329_v47  ;;  %v842_v13 = vmul.f32 %v3861_v26, %v736_v61  ;;  %v644_v5 = vmul.f32 %v3867_v29, %v519_v31 }
 0x18a   : > { %v840_v1 = vmul.f32 %v3861_v26, %v732_v52  ;;  %v841_v22 = vmul.f32 %v3863_v27, %v732_v52  ;;  %v645_v47 = vmul.f32 %v3869_v30, %v519_v31 }
 0x18b   : > { %1635 = vmatmul.bf16.gmra.mxu0 %v1382_v3  ;;  %1724 = vmatmul.bf16.gmra.mxu1 %v1383_v53 }
 0x18c   : > { %1813 = vmatmul.bf16.gmra.mxu2 %v1382_v3  ;;  %1902 = vmatmul.bf16.gmra.mxu3 %v1383_v53  ;;  %v904_v46 = vadd.f32 %v840_v1, %v642_v36  ;;  %v905_v8 = vadd.f32 %v841_v22, %v643_v43  ;;  %v906_v3 = vadd.f32 %v842_v13, %v644_v5  ;;  %v3482_v22 = vld [vmem:[%s5199_s6 + $0x14] sm:$0xf0]  ;;  %v529_v13 = vpop.permute.xlu0 %528 }
 0x18d   : > { %v907_v36 = vadd.f32 %v843_v45, %v645_v47  ;;  %v3264_v61 = vor.u32 %v3482_v22, %v3263_v54 }
 0x18e   : > { %v1198_v17 = vadd.f32 %v1134_v9, %v904_v46  ;;  %v1199_v51 = vadd.f32 %v1135_v38, %v905_v8  ;;  %v3327_v46 = vld [vmem:[%s5199_s6 + $0x90] sm:$0xf]  ;;  %v3498_v8 = vld [vmem:[%s5199_s6 + $0x94] sm:$0xf0]  ;;  %v524_v9 = vpop.permute.xlu2 %523 }
 0x18f   : > { %v1681_v39 = vpop.f32.mrf.mxu2  ;;  %v1770_v52 = vpop.f32.mrf.mxu3  ;;  %v3328_v38 = vor.u32 %v3498_v8, %v3327_v46  ;;  %2258 = vmatpush.bf16.msrb.mxu0 %v3264_v61 }
 0x190   : > { %v1682_v62 = vadd.f32 %v1681_v39, %v4285_v49  ;;  %v1268_v45 = vadd.f32 %v3898_v56, %v1198_v17  ;;  %v3255_v17 = vld [vmem:[%s5199_s6] sm:$0xf] }
 0x191   : > { %2347 = vmatpush.bf16.msrb.mxu1 %v3328_v38  ;;  %v646_v38 = vmul.f32 %v3867_v29, %v524_v9 }
 0x192   : > { %v4586_v53 = vadd.f32 %v1770_v52, %v1682_v62  ;;  %v1012_v1 = vpop.permute.xlu1 %1011  ;;  %v1269_v62 = vadd.f32 %v3900_v57, %v1199_v51  ;;  %v1332_v54 = vmax.f32 %v1268_v45, 0.0  ;;  %v3480_v51 = vld [vmem:[%s5199_s6 + $0x4] sm:$0xf0] }
 0x193   : > { %v1136_v43 = vmul.f32 %v3873_v33, %v1012_v1  ;;  %v1137_v31 = vmul.f32 %v3875_v34, %v1012_v1  ;;  %v3256_v46 = vor.u32 %v3480_v51, %v3255_v17  ;;  %v648_v17 = vmul.f32 %v3867_v29, %v529_v13  ;;  %v3345_v29 = vld [vmem:[%s5199_s6 + $0xb8] sm:$0xf0] }
 0x194   : > { %5208 = vst [vmem:[#allocation6_spill] sm:$0xff] %v4586_v53  ;;  %v1333_v53 = vmax.f32 %v1269_v62, 0.0  ;;  %v1017_v8 = vpop.permute.xlu0 %1016 }
 0x195   : > { %v1200_v39 = vadd.f32 %v1136_v43, %v906_v3  ;;  %v1201_v5 = vadd.f32 %v1137_v31, %v907_v36  ;;  %2259 = vmatpush.bf16.msrb.mxu0 %v3256_v46  ;;  %v1138_v45 = vmul.f32 %v3873_v33, %v1017_v8 }
 0x197   : > { %v1270_v47 = vadd.f32 %v3898_v56, %v1200_v39  ;;  %v1271_v52 = vadd.f32 %v3900_v57, %v1201_v5  ;;  %v4606_v1 = vpop.f32.mrf.mxu2  ;;  %v4608_v42 = vpop.f32.mrf.mxu3 }
 0x199   : > { %v1334_v22 = vmax.f32 %v1270_v47, 0.0  ;;  %v1335_v48 = vmax.f32 %v1271_v52, 0.0  ;;  %v3319_v52 = vld [vmem:[%s5199_s6 + $0x80] sm:$0xf] }
 0x19b   : > { %v740_v3 = vpop.permute.xlu1 %739  ;;  %v1384_v36 = vpack.c.bf16 %v1334_v22, %v1332_v54  ;;  %v1385_v43 = vpack.c.bf16 %v1335_v48, %v1333_v53  ;;  %v647_v48 = vmul.f32 %v3869_v30, %v524_v9  ;;  %v744_v53 = vpop.permute.xlu2 %743  ;;  %v3496_v54 = vld [vmem:[%s5199_s6 + $0x84] sm:$0xf0]  ;;  %v1139_v9 = vmul.f32 %v3875_v34, %v1017_v8 }
 0x19c   : > { %v844_v31 = vmul.f32 %v3861_v26, %v740_v3  ;;  %v845_v61 = vmul.f32 %v3863_v27, %v740_v3  ;;  %v846_v62 = vmul.f32 %v3861_v26, %v744_v53  ;;  %v847_v22 = vmul.f32 %v3863_v27, %v744_v53  ;;  %v3281_v26 = vld [vmem:[%s5199_s6 + $0x38] sm:$0xf0]  ;;  %v3501_v53 = vld [vmem:[%s5199_s6 + $0xb4] sm:$0xf] }
 0x19d   : > { %1640 = vmatmul.bf16.gmra.mxu0 %v1384_v36  ;;  %1729 = vmatmul.bf16.gmra.mxu1 %v1385_v43 }
 0x19e   : > { %1818 = vmatmul.bf16.gmra.mxu2 %v1384_v36  ;;  %1907 = vmatmul.bf16.gmra.mxu3 %v1385_v43  ;;  %v908_v39 = vadd.f32 %v844_v31, %v646_v38  ;;  %v909_v5 = vadd.f32 %v845_v61, %v647_v48  ;;  %v3485_v36 = vld [vmem:[%s5199_s6 + $0x34] sm:$0xf]  ;;  %v3320_v43 = vor.u32 %v3496_v54, %v3319_v52 }
 0x19f   : > { %v3284_v31 = vor.u32 %v3485_v36, %v3281_v26  ;;  %v649_v61 = vmul.f32 %v3869_v30, %v529_v13  ;;  %v910_v38 = vadd.f32 %v846_v62, %v648_v17  ;;  %v3348_v13 = vor.u32 %v3501_v53, %v3345_v29  ;;  %v3526_v29 = vld [vmem:[%s5201_s8 + $0x78] sm:$0xff] }
 0x1a0   : > { %v1202_v46 = vadd.f32 %v1138_v45, %v908_v39  ;;  %v1203_v8 = vadd.f32 %v1139_v9, %v909_v5  ;;  %2348 = vmatpush.bf16.msrb.mxu1 %v3320_v43 }
 0x1a1   : > { %v1686_v47 = vpop.f32.mrf.mxu2  ;;  %v1775_v51 = vpop.f32.mrf.mxu3  ;;  %2434 = vmatpush.bf16.msra.mxu2 %v3284_v31  ;;  %2523 = vmatpush.bf16.msra.mxu3 %v3348_v13 }
 0x1a2   : > { %v1687_v3 = vadd.f32 %v1686_v47, %v4285_v49  ;;  %v911_v47 = vadd.f32 %v847_v22, %v649_v61  ;;  %v1272_v45 = vadd.f32 %v3898_v56, %v1202_v46  ;;  %v1273_v62 = vadd.f32 %v3900_v57, %v1203_v8 }
 0x1a3   : > { %v4662_v8 = vperm.slane %v4277_v25, 1 }
 0x1a4   : > { %v4639_v27 = vadd.f32 %v1775_v51, %v1687_v3  ;;  %v1022_v48 = vpop.permute.xlu1 %1021  ;;  %v1336_v36 = vmax.f32 %v1272_v45, 0.0  ;;  %v1337_v26 = vmax.f32 %v1273_v62, 0.0  ;;  %2925 = vmatpush.bf16.msra.mxu1 %v3526_v29 }
 0x1a5   : > { %v1140_v52 = vmul.f32 %v3873_v33, %v1022_v48  ;;  %v1141_v30 = vmul.f32 %v3875_v34, %v1022_v48 }
 0x1a7   : > { %v1204_v39 = vadd.f32 %v1140_v52, %v910_v38  ;;  %v1205_v5 = vadd.f32 %v1141_v30, %v911_v47 }
 0x1a9   : > { %v1274_v54 = vadd.f32 %v3898_v56, %v1204_v39  ;;  %v1275_v9 = vadd.f32 %v3900_v57, %v1205_v5  ;;  %v4653_v3 = vpop.f32.mrf.mxu2  ;;  %v4655_v43 = vpop.f32.mrf.mxu3  ;;  %v3518_v57 = vld [vmem:[%s5201_s8 + $0x38] sm:$0xff] }
 0x1aa   : > { %2836 = vmatpush.bf16.msra.mxu0 %v3518_v57 }
 0x1ab   : > { %v1338_v22 = vmax.f32 %v1274_v54, 0.0  ;;  %v1339_v33 = vmax.f32 %v1275_v9, 0.0 }
 0x1ad   : > { %v1611_v34 = vpop.f32.mrf.mxu0  ;;  %v1700_v17 = vpop.f32.mrf.mxu1  ;;  %v1386_v51 = vpack.c.bf16 %v1338_v22, %v1336_v36  ;;  %v1387_v31 = vpack.c.bf16 %v1339_v33, %v1337_v26  ;;  %v3483_v26 = vld [vmem:[%s5199_s6 + $0x24] sm:$0xf]  ;;  %v3273_v33 = vld [vmem:[%s5199_s6 + $0x28] sm:$0xf0] }
 0x1ae   : > { %v1612_v56 = vadd.f32 %v1611_v34, %v4285_v49 }
 0x1af   : > { %1645 = vmatmul.bf16.gmra.mxu0 %v1386_v51  ;;  %1734 = vmatmul.bf16.gmra.mxu1 %v1387_v31 }
 0x1b0   : > { %1823 = vmatmul.bf16.gmra.mxu2 %v1386_v51  ;;  %1912 = vmatmul.bf16.gmra.mxu3 %v1387_v31  ;;  %v1701_v48 = vadd.f32 %v1700_v17, %v1612_v56  ;;  %v3276_v51 = vor.u32 %v3483_v26, %v3273_v33 }
 0x1b2   : > { %v1958_v13 = vmax.f32 %v1701_v48, 0.0  ;;  %2435 = vmatpush.bf16.msra.mxu2 %v3276_v51 }
 0x1b4   : > { %v1789_v61 = vpop.f32.mrf.mxu2 }
 0x1b5   : > { %v1878_v46 = vpop.f32.mrf.mxu3  ;;  %v1613_v38 = vpop.f32.mrf.mxu0  ;;  %v1790_v30 = vadd.f32 %v1789_v61, %v4662_v8 }
 0x1b6   : > { %v1614_v53 = vadd.f32 %v1613_v38, %v4285_v49  ;;  %v1702_v47 = vpop.f32.mrf.mxu1 }
 0x1b7   : > { %v1879_v25 = vadd.f32 %v1878_v46, %v1790_v30 }
 0x1b8   : > { %v1703_v52 = vadd.f32 %v1702_v47, %v1614_v53 }
 0x1b9   : > { %v1959_v34 = vmax.f32 %v1879_v25, 0.0 }
 0x1ba   : > { %v1960_v39 = vmax.f32 %v1703_v52, 0.0 }
 0x1bc   : > { %v1791_v5 = vpop.f32.mrf.mxu2  ;;  %v4669_v45 = vpack.c.bf16 %v1960_v39, %v1958_v13 }
 0x1bd   : > { %v1792_v62 = vadd.f32 %v1791_v5, %v4662_v8  ;;  %v1880_v54 = vpop.f32.mrf.mxu3 }
 0x1bf   : > { %v1881_v9 = vadd.f32 %v1880_v54, %v1792_v62  ;;  %2260 = vmatmul.bf16.vlgmr.msrb.gmra.mxu0 %v4669_v45 }
 0x1c0   : > { %v1616_v36 = vpop.f32.mrf.mxu0  ;;  %v1705_v22 = vpop.f32.mrf.mxu1  ;;  %1828 = vmatmul.bf16.gmra.mxu2 %v3916_v19  ;;  %1917 = vmatmul.bf16.gmra.mxu3 %v3918_v18  ;;  %v3499_v19 = vld [vmem:[%s5199_s6 + $0xa4] sm:$0xf]  ;;  %v3337_v18 = vld [vmem:[%s5199_s6 + $0xa8] sm:$0xf0] }
 0x1c1   : > { %v1961_v17 = vmax.f32 %v1881_v9, 0.0  ;;  %v1617_v56 = vadd.f32 %v1616_v36, %v4285_v49  ;;  %v3340_v46 = vor.u32 %v3499_v19, %v3337_v18  ;;  %v3517_v9 = vld [vmem:[%s5201_s8 + $0x30] sm:$0xff] }
 0x1c2   : > { %2837 = vmatpush.bf16.msra.mxu0 %v3517_v9 }
 0x1c3   : > { %v4681_v31 = vpack.c.bf16 %v1961_v17, %v1959_v34  ;;  %v1706_v48 = vadd.f32 %v1705_v22, %v1617_v56  ;;  %2524 = vmatpush.bf16.msra.mxu3 %v3340_v46 }
 0x1c5   : > { %2349 = vmatmul.bf16.vlgmr.msrb.gmra.mxu1 %v4681_v31  ;;  %v1962_v30 = vmax.f32 %v1706_v48, 0.0 }
 0x1c7   : > { %v1794_v57 = vpop.f32.mrf.mxu2  ;;  %v1883_v61 = vpop.f32.mrf.mxu3 }
 0x1c8   : > { %v1618_v38 = vpop.f32.mrf.mxu0  ;;  %v1707_v29 = vpop.f32.mrf.mxu1  ;;  %v1795_v52 = vadd.f32 %v1794_v57, %v4662_v8 }
 0x1c9   : > { %v1619_v53 = vadd.f32 %v1618_v38, %v4285_v49 }
 0x1ca   : > { %v1884_v25 = vadd.f32 %v1883_v61, %v1795_v52 }
 0x1cb   : > { %v1708_v47 = vadd.f32 %v1707_v29, %v1619_v53 }
 0x1cc   : > { %v1963_v33 = vmax.f32 %v1884_v25, 0.0  ;;  %v3265_v25 = vld [vmem:[%s5199_s6 + $0x18] sm:$0xf0] }
 0x1cd   : > { %v1964_v13 = vmax.f32 %v1708_v47, 0.0 }
 0x1cf   : > { %v1796_v39 = vpop.f32.mrf.mxu2  ;;  %v4693_v5 = vpack.c.bf16 %v1964_v13, %v1962_v30  ;;  %v1885_v54 = vpop.f32.mrf.mxu3 }
 0x1d0   : > { %v1797_v62 = vadd.f32 %v1796_v39, %v4662_v8  ;;  %1833 = vmatmul.bf16.gmra.mxu2 %v3962_v11  ;;  %1922 = vmatmul.bf16.gmra.mxu3 %v3964_v12  ;;  %v3525_v11 = vld [vmem:[%s5201_s8 + $0x70] sm:$0xff] }
 0x1d1   : > { %2265 = vmatmul.bf16.gmra.mxu0 %v4693_v5  ;;  %2926 = vmatpush.bf16.msra.mxu1 %v3525_v11  ;;  %v3481_v39 = vld [vmem:[%s5199_s6 + $0x14] sm:$0xf] }
 0x1d2   : > { %v1886_v36 = vadd.f32 %v1885_v54, %v1797_v62  ;;  %v1621_v22 = vpop.f32.mrf.mxu0  ;;  %v1710_v26 = vpop.f32.mrf.mxu1  ;;  %v3268_v9 = vor.u32 %v3481_v39, %v3265_v25  ;;  %v3516_v39 = vld [vmem:[%s5201_s8 + $0x28] sm:$0xff] }
 0x1d3   : > { %v1622_v51 = vadd.f32 %v1621_v22, %v4285_v49  ;;  %v3524_v25 = vld [vmem:[%s5201_s8 + $0x68] sm:$0xff]  ;;  %2838 = vmatpush.bf16.msra.mxu0 %v3516_v39 }
 0x1d4   : > { %v1965_v34 = vmax.f32 %v1886_v36, 0.0  ;;  %v3329_v36 = vld [vmem:[%s5199_s6 + $0x98] sm:$0xf0]  ;;  %2436 = vmatpush.bf16.msra.mxu2 %v3268_v9 }
 0x1d5   : > { %v1711_v18 = vadd.f32 %v1710_v26, %v1622_v51  ;;  %2927 = vmatpush.bf16.msra.mxu1 %v3524_v25 }
 0x1d6   : > { %v4702_v17 = vpack.c.bf16 %v1965_v34, %v1963_v33 }
 0x1d7   : > { %v1966_v48 = vmax.f32 %v1711_v18, 0.0 }
 0x1d8   : > { %2354 = vmatmul.bf16.gmra.mxu1 %v4702_v17 }
 0x1d9   : > { %v1799_v12 = vpop.f32.mrf.mxu2  ;;  %v1888_v56 = vpop.f32.mrf.mxu3 }
 0x1da   : > { %v1623_v19 = vpop.f32.mrf.mxu0  ;;  %v1712_v61 = vpop.f32.mrf.mxu1  ;;  %v1800_v38 = vadd.f32 %v1799_v12, %v4662_v8 }
 0x1db   : > { %v1624_v57 = vadd.f32 %v1623_v19, %v4285_v49 }
 0x1dc   : > { %v1889_v52 = vadd.f32 %v1888_v56, %v1800_v38 }
 0x1dd   : > { %v1713_v46 = vadd.f32 %v1712_v61, %v1624_v57 }
 0x1de   : > { %v1967_v26 = vmax.f32 %v1889_v52, 0.0 }
 0x1df   : > { %v1968_v53 = vmax.f32 %v1713_v46, 0.0 }
 0x1e0   : > { %1838 = vmatmul.bf16.gmra.mxu2 %v4003_v63  ;;  %1927 = vmatmul.bf16.gmra.mxu3 %v4005_v2  ;;  %v3497_v63 = vld [vmem:[%s5199_s6 + $0x94] sm:$0xf] }
 0x1e1   : > { %v1801_v29 = vpop.f32.mrf.mxu2  ;;  %v4713_v47 = vpack.c.bf16 %v1968_v53, %v1966_v48  ;;  %v1890_v13 = vpop.f32.mrf.mxu3  ;;  %v3332_v22 = vor.u32 %v3497_v63, %v3329_v36 }
 0x1e2   : > { %v1802_v30 = vadd.f32 %v1801_v29, %v4662_v8 }
 0x1e3   : > { %2270 = vmatmul.bf16.gmra.mxu0 %v4713_v47  ;;  %2525 = vmatpush.bf16.msra.mxu3 %v3332_v22 }
 0x1e4   : > { %v1891_v2 = vadd.f32 %v1890_v13, %v1802_v30  ;;  %v1626_v62 = vpop.f32.mrf.mxu0  ;;  %v1715_v54 = vpop.f32.mrf.mxu1 }
 0x1e5   : > { %v1627_v51 = vadd.f32 %v1626_v62, %v4285_v49 }
 0x1e6   : > { %v1969_v33 = vmax.f32 %v1891_v2, 0.0 }
 0x1e7   : > { %v1716_v19 = vadd.f32 %v1715_v54, %v1627_v51 }
 0x1e8   : > { %v4729_v34 = vpack.c.bf16 %v1969_v33, %v1967_v26 }
 0x1e9   : > { %v1970_v38 = vmax.f32 %v1716_v19, 0.0  ;;  %v3257_v19 = vld [vmem:[%s5199_s6 + $0x8] sm:$0xf0] }
 0x1ea   : > { %2359 = vmatmul.bf16.gmra.mxu1 %v4729_v34 }
 0x1eb   : > { %v1804_v11 = vpop.f32.mrf.mxu2  ;;  %v1893_v12 = vpop.f32.mrf.mxu3 }
 0x1ec   : > { %v1628_v56 = vpop.f32.mrf.mxu0  ;;  %v1717_v57 = vpop.f32.mrf.mxu1  ;;  %v1805_v46 = vadd.f32 %v1804_v11, %v4662_v8 }
 0x1ed   : > { %v1629_v18 = vadd.f32 %v1628_v56, %v4285_v49  ;;  %v3479_v56 = vld [vmem:[%s5199_s6 + $0x4] sm:$0xf] }
 0x1ee   : > { %v1894_v52 = vadd.f32 %v1893_v12, %v1805_v46 }
 0x1ef   : > { %v1718_v61 = vadd.f32 %v1717_v57, %v1629_v18  ;;  %v3260_v57 = vor.u32 %v3479_v56, %v3257_v19 }
 0x1f0   : > { %1843 = vmatmul.bf16.gmra.mxu2 %v4073_v14  ;;  %1932 = vmatmul.bf16.gmra.mxu3 %v4075_v16  ;;  %v1971_v2 = vmax.f32 %v1894_v52, 0.0  ;;  %v3321_v52 = vld [vmem:[%s5199_s6 + $0x88] sm:$0xf0] }
 0x1f1   : > { %v1972_v48 = vmax.f32 %v1718_v61, 0.0  ;;  %2437 = vmatpush.bf16.msra.mxu2 %v3260_v57 }
 0x1f3   : > { %v1806_v53 = vpop.f32.mrf.mxu2  ;;  %v4737_v29 = vpack.c.bf16 %v1972_v48, %v1970_v38  ;;  %v1895_v13 = vpop.f32.mrf.mxu3 }
 0x1f4   : > { %v1807_v30 = vadd.f32 %v1806_v53, %v4662_v8  ;;  %v3495_v53 = vld [vmem:[%s5199_s6 + $0x84] sm:$0xf] }
 0x1f5   : > { %2275 = vmatmul.bf16.gmra.mxu0 %v4737_v29 }
 0x1f6   : > { %v1896_v14 = vadd.f32 %v1895_v13, %v1807_v30  ;;  %v1631_v63 = vpop.f32.mrf.mxu0  ;;  %v1720_v16 = vpop.f32.mrf.mxu1  ;;  %v3324_v13 = vor.u32 %v3495_v53, %v3321_v52 }
 0x1f7   : > { %v1632_v9 = vadd.f32 %v1631_v63, %v4285_v49 }
 0x1f8   : > { %v1973_v62 = vmax.f32 %v1896_v14, 0.0  ;;  %2526 = vmatpush.bf16.msra.mxu3 %v3324_v13 }
 0x1f9   : > { %v1721_v33 = vadd.f32 %v1720_v16, %v1632_v9 }
 0x1fa   : > { %v4747_v54 = vpack.c.bf16 %v1973_v62, %v1971_v2 }
 0x1fb   : > { %v1974_v61 = vmax.f32 %v1721_v33, 0.0 }
 0x1fc   : > { %2364 = vmatmul.bf16.gmra.mxu1 %v4747_v54 }
 0x1fd   : > { %v1809_v36 = vpop.f32.mrf.mxu2  ;;  %v1898_v22 = vpop.f32.mrf.mxu3 }
 0x1fe   : > { %v1633_v26 = vpop.f32.mrf.mxu0  ;;  %v1722_v11 = vpop.f32.mrf.mxu1  ;;  %v1810_v18 = vadd.f32 %v1809_v36, %v4662_v8 }
 0x1ff   : > { %v1634_v51 = vadd.f32 %v1633_v26, %v4285_v49 }
 0x200   : > { %1848 = vmatmul.bf16.gmra.mxu2 %v4126_v21  ;;  %1937 = vmatmul.bf16.gmra.mxu3 %v4128_v4  ;;  %v1899_v21 = vadd.f32 %v1898_v22, %v1810_v18 }
 0x201   : > { %v1723_v12 = vadd.f32 %v1722_v11, %v1634_v51  ;;  %v3515_v11 = vld [vmem:[%s5201_s8 + $0x20] sm:$0xff] }
 0x202   : > { %v1975_v63 = vmax.f32 %v1899_v21, 0.0  ;;  %2839 = vmatpush.bf16.msra.mxu0 %v3515_v11 }
 0x203   : > { %v1976_v46 = vmax.f32 %v1723_v12, 0.0 }
 0x205   : > { %v1811_v38 = vpop.f32.mrf.mxu2  ;;  %v4761_v48 = vpack.c.bf16 %v1976_v46, %v1974_v61  ;;  %v1900_v30 = vpop.f32.mrf.mxu3 }
 0x206   : > { %v1812_v4 = vadd.f32 %v1811_v38, %v4662_v8  ;;  %v3523_v38 = vld [vmem:[%s5201_s8 + $0x60] sm:$0xff] }
 0x207   : > { %2280 = vmatmul.bf16.gmra.mxu0 %v4761_v48  ;;  %2928 = vmatpush.bf16.msra.mxu1 %v3523_v38 }
 0x208   : > { %v1901_v39 = vadd.f32 %v1900_v30, %v1812_v4  ;;  %v1636_v25 = vpop.f32.mrf.mxu0  ;;  %v1725_v14 = vpop.f32.mrf.mxu1 }
 0x209   : > { %v1637_v62 = vadd.f32 %v1636_v25, %v4285_v49 }
 0x20a   : > { %v1977_v16 = vmax.f32 %v1901_v39, 0.0 }
 0x20b   : > { %v1726_v26 = vadd.f32 %v1725_v14, %v1637_v62 }
 0x20c   : > { %v4771_v2 = vpack.c.bf16 %v1977_v16, %v1975_v63 }
 0x20d   : > { %v1978_v19 = vmax.f32 %v1726_v26, 0.0 }
 0x20e   : > { %2369 = vmatmul.bf16.gmra.mxu1 %v4771_v2 }
 0x20f   : > { %v1814_v9 = vpop.f32.mrf.mxu2  ;;  %v1903_v36 = vpop.f32.mrf.mxu3 }
 0x210   : > { %v1638_v22 = vpop.f32.mrf.mxu0  ;;  %1853 = vmatmul.bf16.gmra.mxu2 %v4179_v23  ;;  %1942 = vmatmul.bf16.gmra.mxu3 %v4181_v10  ;;  %v1727_v51 = vpop.f32.mrf.mxu1  ;;  %v1815_v56 = vadd.f32 %v1814_v9, %v4662_v8 }
 0x211   : > { %v1639_v33 = vadd.f32 %v1638_v22, %v4285_v49 }
 0x212   : > { %v1904_v46 = vadd.f32 %v1903_v36, %v1815_v56 }
 0x213   : > { %v1728_v12 = vadd.f32 %v1727_v51, %v1639_v33 }
 0x214   : > { %v1979_v52 = vmax.f32 %v1904_v46, 0.0 }
 0x215   : > { %v1980_v18 = vmax.f32 %v1728_v12, 0.0 }
 0x217   : > { %v1816_v57 = vpop.f32.mrf.mxu2  ;;  %v4782_v61 = vpack.c.bf16 %v1980_v18, %v1978_v19  ;;  %v1905_v10 = vpop.f32.mrf.mxu3 }
 0x218   : > { %v1817_v23 = vadd.f32 %v1816_v57, %v4662_v8 }
 0x219   : > { %2285 = vmatmul.bf16.gmra.mxu0 %v4782_v61 }
 0x21a   : > { %v1906_v21 = vadd.f32 %v1905_v10, %v1817_v23  ;;  %v1641_v4 = vpop.f32.mrf.mxu0  ;;  %v1730_v53 = vpop.f32.mrf.mxu1  ;;  %v3514_v10 = vld [vmem:[%s5201_s8 + $0x18] sm:$0xff] }
 0x21b   : > { %v1642_v39 = vadd.f32 %v1641_v4, %v4285_v49  ;;  %2840 = vmatpush.bf16.msra.mxu0 %v3514_v10 }
 0x21c   : > { %v1981_v30 = vmax.f32 %v1906_v21, 0.0 }
 0x21d   : > { %v1731_v16 = vadd.f32 %v1730_v53, %v1642_v39 }
 0x21e   : > { %v4789_v13 = vpack.c.bf16 %v1981_v30, %v1979_v52 }
 0x21f   : > { %v1982_v26 = vmax.f32 %v1731_v16, 0.0  ;;  %v4818_v16 = vld [vmem:[%s5200_s7] sm:$0x3] }
 0x220   : > { %2374 = vmatmul.bf16.gmra.mxu1 %v4789_v13  ;;  %1858 = vmatmul.bf16.gmra.mxu2 %v4233_v44 }
 0x221   : > { %1947 = vmatmul.bf16.gmra.mxu3 %v4235_v37  ;;  %v1819_v25 = vpop.f32.mrf.mxu2  ;;  %v1908_v14 = vpop.f32.mrf.mxu3 }
 0x222   : > { %v1643_v63 = vpop.f32.mrf.mxu0  ;;  %v1732_v9 = vpop.f32.mrf.mxu1  ;;  %v1820_v22 = vadd.f32 %v1819_v25, %v4662_v8 }
 0x223   : > { %v1644_v62 = vadd.f32 %v1643_v63, %v4285_v49 }
 0x224   : > { %v1909_v12 = vadd.f32 %v1908_v14, %v1820_v22 }
 0x225   : > { %v1733_v36 = vadd.f32 %v1732_v9, %v1644_v62 }
 0x226   : > { %v1983_v57 = vmax.f32 %v1909_v12, 0.0 }
 0x227   : > { %v1984_v33 = vmax.f32 %v1733_v36, 0.0 }
 0x229   : > { %v1821_v51 = vpop.f32.mrf.mxu2  ;;  %v4797_v11 = vpack.c.bf16 %v1984_v33, %v1982_v26  ;;  %v1910_v56 = vpop.f32.mrf.mxu3 }
 0x22a   : > { %v1822_v44 = vadd.f32 %v1821_v51, %v4662_v8  ;;  %v4824_v51 = vperm.slane %v4818_v16, 0 }
 0x22b   : > { %2290 = vmatmul.bf16.gmra.mxu0 %v4797_v11 }
 0x22c   : > { %v1911_v37 = vadd.f32 %v1910_v56, %v1822_v44  ;;  %v1646_v19 = vpop.f32.mrf.mxu0  ;;  %v1735_v18 = vpop.f32.mrf.mxu1  ;;  %v1654_v44 = vadd.f32 %v4326_v32, %v4285_v49 }
 0x22d   : > { %v1647_v38 = vadd.f32 %v1646_v19, %v4285_v49 }
 0x22e   : > { %v1985_v46 = vmax.f32 %v1911_v37, 0.0 }
 0x22f   : > { %v1736_v52 = vadd.f32 %v1735_v18, %v1647_v38 }
 0x230   : > { %v4801_v23 = vpack.c.bf16 %v1985_v46, %v1983_v57  ;;  %1863 = vmatmul.bf16.gmra.mxu2 %v4288_v20  ;;  %v1743_v46 = vadd.f32 %v4328_v50, %v1654_v44 }
 0x231   : > { %1952 = vmatmul.bf16.gmra.mxu3 %v4290_v28  ;;  %v3522_v28 = vld [vmem:[%s5201_s8 + $0x58] sm:$0xff]  ;;  %v1986_v14 = vmax.f32 %v1736_v52, 0.0 }
 0x232   : > { %2379 = vmatmul.bf16.gmra.mxu1 %v4801_v23 }
 0x233   : > { %v1824_v21 = vpop.f32.mrf.mxu2  ;;  %v1913_v4 = vpop.f32.mrf.mxu3  ;;  %2929 = vmatpush.bf16.msra.mxu1 %v3522_v28 }
 0x234   : > { %v1648_v53 = vpop.f32.mrf.mxu0  ;;  %v1737_v39 = vpop.f32.mrf.mxu1  ;;  %v1825_v20 = vadd.f32 %v1824_v21, %v4662_v8 }
 0x235   : > { %v1649_v30 = vadd.f32 %v1648_v53, %v4285_v49 }
 0x236   : > { %v1914_v22 = vadd.f32 %v1913_v4, %v1825_v20  ;;  %v1992_v4 = vmax.f32 %v1743_v46, 0.0 }
 0x237   : > { %v1738_v25 = vadd.f32 %v1737_v39, %v1649_v30 }
 0x238   : > { %v1987_v56 = vmax.f32 %v1914_v22, 0.0 }
 0x239   : > { %v1988_v63 = vmax.f32 %v1738_v25, 0.0 }
 0x23b   : > { %v1826_v62 = vpop.f32.mrf.mxu2  ;;  %v1915_v9 = vpop.f32.mrf.mxu3  ;;  %v4820_v36 = vpack.c.bf16 %v1988_v63, %v1986_v14  ;;  %v1659_v14 = vadd.f32 %v4367_v35, %v4285_v49 }
 0x23c   : > { %v1827_v26 = vadd.f32 %v1826_v62, %v4662_v8  ;;  %v2261_v33 = vpop.f32.mrf.mxu0 }
 0x23d   : > { %2295 = vmatmul.bf16.gmra.mxu0 %v4820_v36  ;;  %v2262_v19 = vadd.f32 %v2261_v33, %v4824_v51  ;;  %v1748_v22 = vadd.f32 %v4369_v15, %v1659_v14  ;;  %v1994_v15 = vmax.f32 %v4351_v40, 0.0 }
 0x23e   : > { %v1916_v12 = vadd.f32 %v1915_v9, %v1827_v26 }
 0x240   : > { %v1989_v37 = vmax.f32 %v1916_v12, 0.0  ;;  %2438 = vmatmul.bf16.vlgmr.msra.gmra.mxu2 %v4669_v45 }
 0x241   : > { %2527 = vmatmul.bf16.vlgmr.msra.gmra.mxu3 %v4681_v31  ;;  %v1990_v31 = vmax.f32 %v4307_v6, 0.0  ;;  %v3513_v6 = vld [vmem:[%s5201_s8 + $0x10] sm:$0xff] }
 0x242   : > { %v2350_v18 = vpop.f32.mrf.mxu1  ;;  %v4832_v57 = vpack.c.bf16 %v1989_v37, %v1987_v56  ;;  %2841 = vmatpush.bf16.msra.mxu0 %v3513_v6  ;;  %v3521_v37 = vld [vmem:[%s5201_s8 + $0x50] sm:$0xff] }
 0x243   : > { %v1829_v10 = vpop.f32.mrf.mxu2  ;;  %v1918_v38 = vpop.f32.mrf.mxu3  ;;  %v4835_v21 = vadd.f32 %v2350_v18, %v2262_v19  ;;  %v4842_v30 = vpack.c.bf16 %v1992_v4, %v1990_v31  ;;  %2930 = vmatpush.bf16.msra.mxu1 %v3521_v37  ;;  %v1664_v31 = vadd.f32 %v4424_v7, %v4285_v49 }
 0x244   : > { %2384 = vmatmul.bf16.gmra.mxu1 %v4832_v57  ;;  %v4838_v32 = vpop.f32.mrf.mxu0  ;;  %v1830_v45 = vadd.f32 %v1829_v10, %v4662_v8 }
 0x246   : > { %v1919_v39 = vadd.f32 %v1918_v38, %v1830_v45 }
 0x248   : > { %v1991_v63 = vmax.f32 %v1919_v39, 0.0 }
 0x24a   : > { %v4845_v25 = vpop.f32.mrf.mxu1 }
 0x24b   : > { %v1831_v53 = vpop.f32.mrf.mxu2  ;;  %v1920_v52 = vpop.f32.mrf.mxu3 }
 0x24c   : > { %v1832_v50 = vadd.f32 %v1831_v53, %v4662_v8 }
 0x24d   : > { %2300 = vmatmul.bf16.gmra.mxu0 %v4842_v30 }
 0x24e   : > { %v1921_v20 = vadd.f32 %v1920_v52, %v1832_v50  ;;  %v2266_v28 = vpop.f32.mrf.mxu0  ;;  %v1753_v50 = vadd.f32 %v4438_v24, %v1664_v31 }
 0x24f   : > { %v2267_v26 = vadd.f32 %v2266_v28, %v4824_v51 }
 0x250   : > { %v1993_v62 = vmax.f32 %v1921_v20, 0.0  ;;  %2443 = vmatmul.bf16.gmra.mxu2 %v4693_v5  ;;  %v1996_v5 = vmax.f32 %v1748_v22, 0.0 }
 0x251   : > { %2532 = vmatmul.bf16.gmra.mxu3 %v4702_v17 }
 0x252   : > { %v4855_v9 = vpack.c.bf16 %v1993_v62, %v1991_v63  ;;  %v4869_v46 = vpack.c.bf16 %v1996_v5, %v1994_v15  ;;  %v2000_v62 = vmax.f32 %v1753_v50, 0.0  ;;  %v1669_v5 = vadd.f32 %v4469_v55, %v4285_v49 }
 0x253   : > { %v1834_v33 = vpop.f32.mrf.mxu2  ;;  %v1923_v12 = vpop.f32.mrf.mxu3 }
 0x254   : > { %2389 = vmatmul.bf16.gmra.mxu1 %v4855_v9  ;;  %v1835_v17 = vadd.f32 %v1834_v33, %v4662_v8 }
 0x255   : > { %v2355_v35 = vpop.f32.mrf.mxu1 }
 0x256   : > { %v4860_v44 = vadd.f32 %v2355_v35, %v2267_v26  ;;  %v4863_v56 = vpop.f32.mrf.mxu0  ;;  %v1924_v10 = vadd.f32 %v1923_v12, %v1835_v17 }
 0x258   : > { %v1995_v53 = vmax.f32 %v1924_v10, 0.0  ;;  %v1758_v10 = vadd.f32 %v4486_v60, %v1669_v5 }
 0x25b   : > { %v1836_v19 = vpop.f32.mrf.mxu2  ;;  %v1925_v18 = vpop.f32.mrf.mxu3 }
 0x25c   : > { %v1837_v38 = vadd.f32 %v1836_v19, %v4662_v8 }
 0x25d   : > { %2305 = vmatmul.bf16.gmra.mxu0 %v4869_v46  ;;  %v4873_v45 = vpop.f32.mrf.mxu1 }
 0x25e   : > { %v1926_v4 = vadd.f32 %v1925_v18, %v1837_v38 }
 0x260   : > { %v1997_v52 = vmax.f32 %v1926_v4, 0.0  ;;  %2448 = vmatmul.bf16.gmra.mxu2 %v4713_v47  ;;  %v2271_v40 = vpop.f32.mrf.mxu0  ;;  %v1998_v47 = vmax.f32 %v4398_v41, 0.0  ;;  %v3512_v41 = vld [vmem:[%s5201_s8 + $0x8] sm:$0xff]  ;;  %v2004_v4 = vmax.f32 %v1758_v10, 0.0 }
 0x261   : > { %2537 = vmatmul.bf16.gmra.mxu3 %v4729_v34  ;;  %v2272_v14 = vadd.f32 %v2271_v40, %v4824_v51  ;;  %2842 = vmatpush.bf16.msra.mxu0 %v3512_v41 }
 0x262   : > { %v4879_v39 = vpack.c.bf16 %v1997_v52, %v1995_v53  ;;  %v4890_v33 = vpack.c.bf16 %v2000_v62, %v1998_v47  ;;  %v3520_v53 = vld [vmem:[%s5201_s8 + $0x48] sm:$0xff]  ;;  %v2002_v52 = vmax.f32 %v4455_v0, 0.0 }
 0x263   : > { %v1839_v20 = vpop.f32.mrf.mxu2  ;;  %v1928_v28 = vpop.f32.mrf.mxu3  ;;  %2931 = vmatpush.bf16.msra.mxu1 %v3520_v53 }
 0x264   : > { %2394 = vmatmul.bf16.gmra.mxu1 %v4879_v39  ;;  %v1840_v6 = vadd.f32 %v1839_v20, %v4662_v8  ;;  %v4915_v20 = vpack.c.bf16 %v2004_v4, %v2002_v52 }
 0x266   : > { %v1929_v24 = vadd.f32 %v1928_v28, %v1840_v6  ;;  %v1674_v6 = vadd.f32 %v4518_v59, %v4285_v49 }
 0x267   : > { %v2360_v63 = vpop.f32.mrf.mxu1 }
 0x268   : > { %v4884_v7 = vadd.f32 %v2360_v63, %v2272_v14  ;;  %v4888_v34 = vpop.f32.mrf.mxu0  ;;  %v1999_v17 = vmax.f32 %v1929_v24, 0.0  ;;  %v1763_v24 = vadd.f32 %v4526_v58, %v1674_v6  ;;  %v5211_v6 = vld [vmem:[#allocation5_spill] sm:$0xff] }
 0x26b   : > { %v1841_v22 = vpop.f32.mrf.mxu2  ;;  %v1930_v26 = vpop.f32.mrf.mxu3 }
 0x26c   : > { %v1842_v12 = vadd.f32 %v1841_v22, %v4662_v8 }
 0x26d   : > { %2310 = vmatmul.bf16.gmra.mxu0 %v4890_v33 }
 0x26e   : > { %v1931_v35 = vadd.f32 %v1930_v26, %v1842_v12 }
 0x26f   : > { %v4896_v15 = vpop.f32.mrf.mxu1 }
 0x270   : > { %v2001_v37 = vmax.f32 %v1931_v35, 0.0  ;;  %2453 = vmatmul.bf16.gmra.mxu2 %v4737_v29 }
 0x271   : > { %2542 = vmatmul.bf16.gmra.mxu3 %v4747_v54 }
 0x272   : > { %v2276_v19 = vpop.f32.mrf.mxu0  ;;  %v4903_v18 = vpack.c.bf16 %v2001_v37, %v1999_v17  ;;  %v2008_v17 = vmax.f32 %v1763_v24, 0.0  ;;  %v5209_v37 = vld [vmem:[#allocation2_spill] sm:$0xff] }
 0x273   : > { %v1844_v38 = vpop.f32.mrf.mxu2  ;;  %v1933_v55 = vpop.f32.mrf.mxu3  ;;  %v2277_v31 = vadd.f32 %v2276_v19, %v4824_v51  ;;  %v2006_v41 = vmax.f32 %v5209_v37, 0.0  ;;  %v3519_v37 = vld [vmem:[%s5201_s8 + $0x40] sm:$0xff] }
 0x274   : > { %2399 = vmatmul.bf16.gmra.mxu1 %v4903_v18  ;;  %v1845_v29 = vadd.f32 %v1844_v38, %v4662_v8 }
 0x275   : > { %2932 = vmatpush.bf16.msra.mxu1 %v3519_v37 }
 0x276   : > { %v1934_v28 = vadd.f32 %v1933_v55, %v1845_v29  ;;  %v4934_v55 = vpack.c.bf16 %v2008_v17, %v2006_v41  ;;  %v5212_v41 = vld [vmem:[#allocation3_spill] sm:$0xff] }
 0x278   : > { %v2003_v47 = vmax.f32 %v1934_v28, 0.0  ;;  %v3511_v28 = vld [vmem:[%s5201_s8] sm:$0xff] }
 0x279   : > { %v2365_v54 = vpop.f32.mrf.mxu1  ;;  %2843 = vmatpush.bf16.msra.mxu0 %v3511_v28 }
 0x27a   : > { %v4913_v40 = vadd.f32 %v2365_v54, %v2277_v31  ;;  %v4918_v63 = vpop.f32.mrf.mxu0  ;;  %v5210_v54 = vld [vmem:[#allocation4_spill] sm:$0xff] }
 0x27b   : > { %v1846_v60 = vpop.f32.mrf.mxu2  ;;  %v1935_v50 = vpop.f32.mrf.mxu3  ;;  %v1679_v53 = vadd.f32 %v5210_v54, %v4285_v49 }
 0x27c   : > { %v1847_v14 = vadd.f32 %v1846_v60, %v4662_v8 }
 0x27d   : > { %2315 = vmatmul.bf16.gmra.mxu0 %v4915_v20 }
 0x27e   : > { %v1936_v62 = vadd.f32 %v1935_v50, %v1847_v14 }
 0x280   : > { %v2005_v0 = vmax.f32 %v1936_v62, 0.0  ;;  %2458 = vmatmul.bf16.gmra.mxu2 %v4761_v48 }
 0x281   : > { %2547 = vmatmul.bf16.gmra.mxu3 %v4771_v2  ;;  %v4925_v22 = vpop.f32.mrf.mxu1 }
 0x282   : > { %v4927_v26 = vpack.c.bf16 %v2005_v0, %v2003_v47  ;;  %v1768_v47 = vadd.f32 %v5211_v6, %v1679_v53  ;;  %v1684_v53 = vadd.f32 %v4606_v1, %v4285_v49 }
 0x283   : > { %v1849_v12 = vpop.f32.mrf.mxu2  ;;  %v1938_v35 = vpop.f32.mrf.mxu3 }
 0x284   : > { %2404 = vmatmul.bf16.gmra.mxu1 %v4927_v26  ;;  %v2281_v5 = vpop.f32.mrf.mxu0  ;;  %v1850_v59 = vadd.f32 %v1849_v12, %v4662_v8 }
 0x285   : > { %v2282_v48 = vadd.f32 %v2281_v5, %v4824_v51  ;;  %v2012_v5 = vmax.f32 %v1768_v47, 0.0 }
 0x286   : > { %v1939_v4 = vadd.f32 %v1938_v35, %v1850_v59 }
 0x288   : > { %v2007_v52 = vmax.f32 %v1939_v4, 0.0 }
 0x28b   : > { %v2370_v19 = vpop.f32.mrf.mxu1  ;;  %v1851_v2 = vpop.f32.mrf.mxu2 }
 0x28c   : > { %v1940_v10 = vpop.f32.mrf.mxu3  ;;  %v2371_v38 = vadd.f32 %v2370_v19, %v2282_v48  ;;  %v1852_v58 = vadd.f32 %v1851_v2, %v4662_v8  ;;  %v2283_v29 = vpop.f32.mrf.mxu0  ;;  %v2010_v48 = vmax.f32 %v5212_v41, 0.0 }
 0x28d   : > { %2320 = vmatmul.bf16.gmra.mxu0 %v4934_v55  ;;  %v2284_v50 = vadd.f32 %v2283_v29, %v4824_v51 }
 0x28e   : > { %v1941_v31 = vadd.f32 %v1940_v10, %v1852_v58  ;;  %v4958_v4 = vpack.c.bf16 %v2012_v5, %v2010_v48  ;;  %v5213_v5 = vld [vmem:[#allocation6_spill] sm:$0xff] }
 0x290   : > { %v2009_v60 = vmax.f32 %v1941_v31, 0.0  ;;  %2463 = vmatmul.bf16.gmra.mxu2 %v4782_v61  ;;  %v2624_v61 = vmax.f32 %v2371_v38, 0.0 }
 0x291   : > { %2552 = vmatmul.bf16.gmra.mxu3 %v4789_v13 }
 0x292   : > { %v4946_v62 = vpack.c.bf16 %v2009_v60, %v2007_v52 }
 0x293   : > { %v2372_v14 = vpop.f32.mrf.mxu1  ;;  %v1854_v0 = vpop.f32.mrf.mxu2 }
 0x294   : > { %v1943_v24 = vpop.f32.mrf.mxu3  ;;  %v2373_v12 = vadd.f32 %v2372_v14, %v2284_v50  ;;  %2409 = vmatmul.bf16.gmra.mxu1 %v4946_v62  ;;  %v1855_v59 = vadd.f32 %v1854_v0, %v4662_v8  ;;  %v1773_v14 = vadd.f32 %v4608_v42, %v1684_v53 }
 0x296   : > { %v2626_v35 = vmax.f32 %v2373_v12, 0.0  ;;  %v2286_v13 = vpop.f32.mrf.mxu0  ;;  %v1944_v38 = vadd.f32 %v1943_v24, %v1855_v59  ;;  %v2016_v1 = vmax.f32 %v1773_v14, 0.0 }
 0x297   : > { %v2287_v19 = vadd.f32 %v2286_v13, %v4824_v51 }
 0x298   : > { %v4950_v17 = vpack.c.bf16 %v2626_v35, %v2624_v61  ;;  %v2011_v52 = vmax.f32 %v1944_v38, 0.0 }
 0x29b   : > { %v1856_v2 = vpop.f32.mrf.mxu2 }
 0x29c   : > { %v1945_v10 = vpop.f32.mrf.mxu3  ;;  %v1857_v58 = vadd.f32 %v1856_v2, %v4662_v8 }
 0x29d   : > { %v2375_v31 = vpop.f32.mrf.mxu1  ;;  %2325 = vmatmul.bf16.gmra.mxu0 %v4958_v4 }
 0x29e   : > { %v2376_v29 = vadd.f32 %v2375_v31, %v2287_v19  ;;  %v1946_v54 = vadd.f32 %v1945_v10, %v1857_v58  ;;  %v2288_v50 = vpop.f32.mrf.mxu0  ;;  %v1689_v58 = vadd.f32 %v4653_v3, %v4285_v49 }
 0x29f   : > { %v2289_v6 = vadd.f32 %v2288_v50, %v4824_v51 }
 0x2a0   : > { %v2013_v60 = vmax.f32 %v1946_v54, 0.0  ;;  %2468 = vmatmul.bf16.gmra.mxu2 %v4797_v11  ;;  %v2628_v61 = vmax.f32 %v2376_v29, 0.0 }
 0x2a1   : > { %2557 = vmatmul.bf16.gmra.mxu3 %v4801_v23  ;;  %v2014_v23 = vmax.f32 %v5213_v5, 0.0 }
 0x2a2   : > { %v4966_v28 = vpack.c.bf16 %v2013_v60, %v2011_v52  ;;  %v1778_v60 = vadd.f32 %v4655_v43, %v1689_v58 }
 0x2a3   : > { %v1859_v47 = vpop.f32.mrf.mxu2  ;;  %v4975_v41 = vpack.c.bf16 %v2016_v1, %v2014_v23 }
 0x2a4   : > { %v1948_v0 = vpop.f32.mrf.mxu3  ;;  %2414 = vmatmul.bf16.gmra.mxu1 %v4966_v28  ;;  %v1860_v13 = vadd.f32 %v1859_v47, %v4662_v8  ;;  %v2020_v49 = vmax.f32 %v1778_v60, 0.0 }
 0x2a5   : > { %v2377_v24 = vpop.f32.mrf.mxu1 }
 0x2a6   : > { %v2378_v12 = vadd.f32 %v2377_v24, %v2289_v6  ;;  %v1949_v48 = vadd.f32 %v1948_v0, %v1860_v13 }
 0x2a8   : > { %v2630_v35 = vmax.f32 %v2378_v12, 0.0  ;;  %v2291_v11 = vpop.f32.mrf.mxu0  ;;  %v2015_v29 = vmax.f32 %v1949_v48, 0.0 }
 0x2a9   : > { %v2292_v2 = vadd.f32 %v2291_v11, %v4824_v51 }
 0x2aa   : > { %v4973_v59 = vpack.c.bf16 %v2630_v35, %v2628_v61 }
 0x2ab   : > { %v1861_v37 = vpop.f32.mrf.mxu2 }
 0x2ac   : > { %v1950_v42 = vpop.f32.mrf.mxu3  ;;  %v1862_v19 = vadd.f32 %v1861_v37, %v4662_v8 }
 0x2ad   : > { %2330 = vmatmul.bf16.gmra.mxu0 %v4975_v41 }
 0x2ae   : > { %v1951_v10 = vadd.f32 %v1950_v42, %v1862_v19 }
 0x2af   : > { %v2380_v38 = vpop.f32.mrf.mxu1 }
 0x2b0   : > { %v2381_v31 = vadd.f32 %v2380_v38, %v2292_v2  ;;  %v2017_v54 = vmax.f32 %v1951_v10, 0.0  ;;  %2473 = vmatmul.bf16.gmra.mxu2 %v4820_v36  ;;  %v2293_v53 = vpop.f32.mrf.mxu0  ;;  %v2018_v36 = vmax.f32 %v4639_v27, 0.0  ;;  %v2264_v27 = vadd.f32 %v4838_v32, %v4824_v51 }
 0x2b1   : > { %2562 = vmatmul.bf16.gmra.mxu3 %v4832_v57  ;;  %v2294_v6 = vadd.f32 %v2293_v53, %v4824_v51  ;;  %v2608_v32 = vmax.f32 %v4835_v21, 0.0  ;;  %v2269_v21 = vadd.f32 %v4863_v56, %v4824_v51 }
 0x2b2   : > { %v4984_v52 = vpack.c.bf16 %v2017_v54, %v2015_v29  ;;  %v2632_v24 = vmax.f32 %v2381_v31, 0.0  ;;  %v4991_v35 = vpack.c.bf16 %v2020_v49, %v2018_v36  ;;  %v5006_v31 = vperm.slane %v4818_v16, 1 }
 0x2b3   : > { %v1864_v50 = vpop.f32.mrf.mxu2 }
 0x2b4   : > { %v1953_v14 = vpop.f32.mrf.mxu3  ;;  %2419 = vmatmul.bf16.gmra.mxu1 %v4984_v52  ;;  %v1865_v0 = vadd.f32 %v1864_v50, %v4662_v8 }
 0x2b6   : > { %v1954_v13 = vadd.f32 %v1953_v14, %v1865_v0 }
 0x2b7   : > { %v2382_v47 = vpop.f32.mrf.mxu1 }
 0x2b8   : > { %v2383_v3 = vadd.f32 %v2382_v47, %v2294_v6  ;;  %v2019_v23 = vmax.f32 %v1954_v13, 0.0 }
 0x2ba   : > { %v2634_v57 = vmax.f32 %v2383_v3, 0.0  ;;  %v2296_v12 = vpop.f32.mrf.mxu0 }
 0x2bb   : > { %v1866_v1 = vpop.f32.mrf.mxu2  ;;  %v2297_v42 = vadd.f32 %v2296_v12, %v4824_v51 }
 0x2bc   : > { %v1955_v61 = vpop.f32.mrf.mxu3  ;;  %v4993_v43 = vpack.c.bf16 %v2634_v57, %v2632_v24  ;;  %v1867_v11 = vadd.f32 %v1866_v1, %v4662_v8  ;;  %v2353_v8 = vadd.f32 %v4845_v25, %v2264_v27 }
 0x2bd   : > { %2335 = vmatmul.bf16.gmra.mxu0 %v4991_v35 }
 0x2be   : > { %v1956_v5 = vadd.f32 %v1955_v61, %v1867_v11  ;;  %v2358_v11 = vadd.f32 %v4873_v45, %v2269_v21 }
 0x2c0   : > { %v2021_v37 = vmax.f32 %v1956_v5, 0.0  ;;  %2478 = vmatmul.bf16.gmra.mxu2 %v4842_v30  ;;  %v2610_v30 = vmax.f32 %v2353_v8, 0.0 }
 0x2c1   : > { %2567 = vmatmul.bf16.gmra.mxu3 %v4855_v9  ;;  %v2385_v48 = vpop.f32.mrf.mxu1 }
 0x2c2   : > { %v2386_v19 = vadd.f32 %v2385_v48, %v2297_v42  ;;  %v2298_v2 = vpop.f32.mrf.mxu0  ;;  %v5002_v10 = vpack.c.bf16 %v2021_v37, %v2019_v23  ;;  %v2672_v50 = vpack.c.bf16 %v2610_v30, %v2608_v32  ;;  %v2614_v37 = vmax.f32 %v2358_v11, 0.0 }
 0x2c3   : > { %v2439_v38 = vpop.f32.mrf.mxu2  ;;  %v2299_v9 = vadd.f32 %v2298_v2, %v4824_v51 }
 0x2c4   : > { %v2528_v58 = vpop.f32.mrf.mxu3  ;;  %2424 = vmatmul.bf16.gmra.mxu1 %v5002_v10  ;;  %v2440_v29 = vadd.f32 %v2439_v38, %v5006_v31  ;;  %v2636_v6 = vmax.f32 %v2386_v19, 0.0 }
 0x2c6   : > { %v2529_v47 = vadd.f32 %v2528_v58, %v2440_v29 }
 0x2c8   : > { %v2609_v36 = vmax.f32 %v2529_v47, 0.0 }
 0x2c9   : > { %v2387_v54 = vpop.f32.mrf.mxu1 }
 0x2ca   : > { %v2388_v53 = vadd.f32 %v2387_v54, %v2299_v9  ;;  %v2301_v60 = vpop.f32.mrf.mxu0 }
 0x2cb   : > { %v2441_v14 = vpop.f32.mrf.mxu2  ;;  %v2302_v24 = vadd.f32 %v2301_v60, %v4824_v51 }
 0x2cc   : > { %v2530_v25 = vpop.f32.mrf.mxu3  ;;  %v2638_v49 = vmax.f32 %v2388_v53, 0.0  ;;  %v2442_v16 = vadd.f32 %v2441_v14, %v5006_v31 }
 0x2cd   : > { %2844 = vmatmul.bf16.vlgmr.msra.gmra.mxu0 %v2672_v50 }
 0x2ce   : > { %v2531_v3 = vadd.f32 %v2530_v25, %v2442_v16  ;;  %v5013_v0 = vpack.c.bf16 %v2638_v49, %v2636_v6 }
 0x2d0   : > { %v2611_v57 = vmax.f32 %v2531_v3, 0.0  ;;  %2483 = vmatmul.bf16.gmra.mxu2 %v4869_v46  ;;  %v2612_v46 = vmax.f32 %v4860_v44, 0.0  ;;  %v2274_v44 = vadd.f32 %v4888_v34, %v4824_v51 }
 0x2d1   : > { %2572 = vmatmul.bf16.gmra.mxu3 %v4879_v39  ;;  %v2390_v12 = vpop.f32.mrf.mxu1 }
 0x2d2   : > { %v2673_v1 = vpack.c.bf16 %v2611_v57, %v2609_v36  ;;  %v2391_v61 = vadd.f32 %v2390_v12, %v2302_v24  ;;  %v2303_v13 = vpop.f32.mrf.mxu0  ;;  %v2674_v8 = vpack.c.bf16 %v2614_v37, %v2612_v46  ;;  %v2363_v6 = vadd.f32 %v4896_v15, %v2274_v44 }
 0x2d3   : > { %v2444_v5 = vpop.f32.mrf.mxu2  ;;  %v2304_v42 = vadd.f32 %v2303_v13, %v4824_v51 }
 0x2d4   : > { %v2533_v23 = vpop.f32.mrf.mxu3  ;;  %2933 = vmatmul.bf16.vlgmr.msra.gmra.mxu1 %v2673_v1  ;;  %v2445_v27 = vadd.f32 %v2444_v5, %v5006_v31  ;;  %v2640_v38 = vmax.f32 %v2391_v61, 0.0  ;;  %v2618_v16 = vmax.f32 %v2363_v6, 0.0 }
 0x2d6   : > { %v2534_v58 = vadd.f32 %v2533_v23, %v2445_v27 }
 0x2d8   : > { %v2613_v32 = vmax.f32 %v2534_v58, 0.0 }
 0x2d9   : > { %v2392_v39 = vpop.f32.mrf.mxu1 }
 0x2da   : > { %v2393_v48 = vadd.f32 %v2392_v39, %v2304_v42  ;;  %v2306_v19 = vpop.f32.mrf.mxu0 }
 0x2db   : > { %v2446_v56 = vpop.f32.mrf.mxu2  ;;  %v2307_v54 = vadd.f32 %v2306_v19, %v4824_v51 }
 0x2dc   : > { %v2535_v2 = vpop.f32.mrf.mxu3  ;;  %v2642_v30 = vmax.f32 %v2393_v48, 0.0  ;;  %v2447_v45 = vadd.f32 %v2446_v56, %v5006_v31 }
 0x2dd   : > { %2849 = vmatmul.bf16.gmra.mxu0 %v2674_v8 }
 0x2de   : > { %v2536_v9 = vadd.f32 %v2535_v2, %v2447_v45  ;;  %v5025_v29 = vpack.c.bf16 %v2642_v30, %v2640_v38 }
 0x2e0   : > { %v2615_v53 = vmax.f32 %v2536_v9, 0.0  ;;  %2488 = vmatmul.bf16.gmra.mxu2 %v4890_v33  ;;  %v2616_v33 = vmax.f32 %v4884_v7, 0.0  ;;  %v2279_v7 = vadd.f32 %v4918_v63, %v4824_v51 }
 0x2e1   : > { %2577 = vmatmul.bf16.gmra.mxu3 %v4903_v18  ;;  %v2395_v60 = vpop.f32.mrf.mxu1 }
 0x2e2   : > { %v2396_v50 = vadd.f32 %v2395_v60, %v2307_v54  ;;  %v2308_v14 = vpop.f32.mrf.mxu0  ;;  %v2675_v25 = vpack.c.bf16 %v2615_v53, %v2613_v32  ;;  %v2676_v12 = vpack.c.bf16 %v2618_v16, %v2616_v33  ;;  %v2368_v19 = vadd.f32 %v4925_v22, %v2279_v7 }
 0x2e3   : > { %v2449_v47 = vpop.f32.mrf.mxu2  ;;  %v2309_v3 = vadd.f32 %v2308_v14, %v4824_v51 }
 0x2e4   : > { %v2538_v49 = vpop.f32.mrf.mxu3  ;;  %2938 = vmatmul.bf16.gmra.mxu1 %v2675_v25  ;;  %v2450_v36 = vadd.f32 %v2449_v47, %v5006_v31  ;;  %v2644_v1 = vmax.f32 %v2396_v50, 0.0  ;;  %v2622_v8 = vmax.f32 %v2368_v19, 0.0 }
 0x2e6   : > { %v2539_v61 = vadd.f32 %v2538_v49, %v2450_v36 }
 0x2e8   : > { %v2617_v23 = vmax.f32 %v2539_v61, 0.0 }
 0x2e9   : > { %v2397_v18 = vpop.f32.mrf.mxu1 }
 0x2ea   : > { %v2398_v24 = vadd.f32 %v2397_v18, %v2309_v3  ;;  %v2311_v57 = vpop.f32.mrf.mxu0 }
 0x2eb   : > { %v2451_v34 = vpop.f32.mrf.mxu2  ;;  %v2312_v37 = vadd.f32 %v2311_v57, %v4824_v51 }
 0x2ec   : > { %v2540_v21 = vpop.f32.mrf.mxu3  ;;  %v2646_v13 = vmax.f32 %v2398_v24, 0.0  ;;  %v2452_v15 = vadd.f32 %v2451_v34, %v5006_v31 }
 0x2ed   : > { %2854 = vmatmul.bf16.gmra.mxu0 %v2676_v12 }
 0x2ee   : > { %v2541_v11 = vadd.f32 %v2540_v21, %v2452_v15  ;;  %v5037_v5 = vpack.c.bf16 %v2646_v13, %v2644_v1 }
 0x2f0   : > { %v2619_v42 = vmax.f32 %v2541_v11, 0.0  ;;  %2493 = vmatmul.bf16.gmra.mxu2 %v4915_v20  ;;  %v2620_v20 = vmax.f32 %v4913_v40, 0.0 }
 0x2f1   : > { %2582 = vmatmul.bf16.gmra.mxu3 %v4927_v26  ;;  %v2400_v27 = vpop.f32.mrf.mxu1 }
 0x2f2   : > { %v2401_v46 = vadd.f32 %v2400_v27, %v2312_v37  ;;  %v2313_v39 = vpop.f32.mrf.mxu0  ;;  %v2677_v48 = vpack.c.bf16 %v2619_v42, %v2617_v23  ;;  %v2678_v32 = vpack.c.bf16 %v2622_v8, %v2620_v20 }
 0x2f3   : > { %v2454_v56 = vpop.f32.mrf.mxu2  ;;  %v2314_v38 = vadd.f32 %v2313_v39, %v4824_v51 }
 0x2f4   : > { %v2543_v2 = vpop.f32.mrf.mxu3  ;;  %2943 = vmatmul.bf16.gmra.mxu1 %v2677_v48  ;;  %v2455_v58 = vadd.f32 %v2454_v56, %v5006_v31  ;;  %v2648_v54 = vmax.f32 %v2401_v46, 0.0 }
 0x2f6   : > { %v2544_v53 = vadd.f32 %v2543_v2, %v2455_v58 }
 0x2f8   : > { %v2621_v14 = vmax.f32 %v2544_v53, 0.0 }
 0x2f9   : > { %v2402_v26 = vpop.f32.mrf.mxu1 }
 0x2fa   : > { %v2403_v30 = vadd.f32 %v2402_v26, %v2314_v38  ;;  %v2316_v45 = vpop.f32.mrf.mxu0 }
 0x2fb   : > { %v2456_v63 = vpop.f32.mrf.mxu2  ;;  %v2317_v25 = vadd.f32 %v2316_v45, %v4824_v51 }
 0x2fc   : > { %v2545_v9 = vpop.f32.mrf.mxu3  ;;  %v2650_v44 = vmax.f32 %v2403_v30, 0.0  ;;  %v2457_v22 = vadd.f32 %v2456_v63, %v5006_v31 }
 0x2fd   : > { %2859 = vmatmul.bf16.gmra.mxu0 %v2678_v32 }
 0x2fe   : > { %v2546_v60 = vadd.f32 %v2545_v9, %v2457_v22  ;;  %v5049_v50 = vpack.c.bf16 %v2650_v44, %v2648_v54 }
 0x300   : > { %v2623_v6 = vmax.f32 %v2546_v60, 0.0  ;;  %2498 = vmatmul.bf16.gmra.mxu2 %v4934_v55 }
 0x301   : > { %2587 = vmatmul.bf16.gmra.mxu3 %v4946_v62  ;;  %v2405_v40 = vpop.f32.mrf.mxu1 }
 0x302   : > { %v2406_v47 = vadd.f32 %v2405_v40, %v2317_v25  ;;  %v2318_v49 = vpop.f32.mrf.mxu0  ;;  %v2679_v16 = vpack.c.bf16 %v2623_v6, %v2621_v14 }
 0x303   : > { %v2459_v3 = vpop.f32.mrf.mxu2  ;;  %v2319_v33 = vadd.f32 %v2318_v49, %v4824_v51 }
 0x304   : > { %v2548_v36 = vpop.f32.mrf.mxu3  ;;  %2948 = vmatmul.bf16.gmra.mxu1 %v2679_v16  ;;  %v2460_v18 = vadd.f32 %v2459_v3, %v5006_v31  ;;  %v2652_v1 = vmax.f32 %v2406_v47, 0.0 }
 0x306   : > { %v2549_v55 = vadd.f32 %v2548_v36, %v2460_v18 }
 0x308   : > { %v2625_v11 = vmax.f32 %v2549_v55, 0.0 }
 0x309   : > { %v2407_v24 = vpop.f32.mrf.mxu1 }
 0x30a   : > { %v2408_v57 = vadd.f32 %v2407_v24, %v2319_v33  ;;  %v2321_v34 = vpop.f32.mrf.mxu0 }
 0x30b   : > { %v2461_v21 = vpop.f32.mrf.mxu2  ;;  %v2322_v23 = vadd.f32 %v2321_v34, %v4824_v51 }
 0x30c   : > { %v2550_v12 = vpop.f32.mrf.mxu3  ;;  %v2654_v61 = vmax.f32 %v2408_v57, 0.0  ;;  %v2462_v62 = vadd.f32 %v2461_v21, %v5006_v31 }
 0x30d   : > { %2864 = vmatmul.bf16.gmra.mxu0 %v4950_v17 }
 0x30e   : > { %v2551_v13 = vadd.f32 %v2550_v12, %v2462_v62  ;;  %v5058_v15 = vpack.c.bf16 %v2654_v61, %v2652_v1 }
 0x310   : > { %v2627_v37 = vmax.f32 %v2551_v13, 0.0  ;;  %2503 = vmatmul.bf16.gmra.mxu2 %v4958_v4 }
 0x311   : > { %2592 = vmatmul.bf16.gmra.mxu3 %v4966_v28  ;;  %v2410_v42 = vpop.f32.mrf.mxu1 }
 0x312   : > { %v2681_v7 = vpack.c.bf16 %v2627_v37, %v2625_v11  ;;  %v2411_v27 = vadd.f32 %v2410_v42, %v2322_v23  ;;  %v2323_v46 = vpop.f32.mrf.mxu0 }
 0x313   : > { %v2464_v39 = vpop.f32.mrf.mxu2  ;;  %v2324_v17 = vadd.f32 %v2323_v46, %v4824_v51 }
 0x314   : > { %v2553_v48 = vpop.f32.mrf.mxu3  ;;  %2953 = vmatmul.bf16.gmra.mxu1 %v2681_v7  ;;  %v2465_v19 = vadd.f32 %v2464_v39, %v5006_v31  ;;  %v2656_v20 = vmax.f32 %v2411_v27, 0.0 }
 0x316   : > { %v2554_v4 = vadd.f32 %v2553_v48, %v2465_v19 }
 0x318   : > { %v2629_v63 = vmax.f32 %v2554_v4, 0.0 }
 0x319   : > { %v2412_v56 = vpop.f32.mrf.mxu1 }
 0x31a   : > { %v2413_v2 = vadd.f32 %v2412_v56, %v2324_v17  ;;  %v2326_v8 = vpop.f32.mrf.mxu0 }
 0x31b   : > { %v2466_v38 = vpop.f32.mrf.mxu2  ;;  %v2327_v9 = vadd.f32 %v2326_v8, %v4824_v51 }
 0x31c   : > { %v2555_v58 = vpop.f32.mrf.mxu3  ;;  %v2658_v26 = vmax.f32 %v2413_v2, 0.0  ;;  %v2467_v28 = vadd.f32 %v2466_v38, %v5006_v31 }
 0x31d   : > { %2869 = vmatmul.bf16.gmra.mxu0 %v4973_v59 }
 0x31e   : > { %v2556_v30 = vadd.f32 %v2555_v58, %v2467_v28  ;;  %v5067_v45 = vpack.c.bf16 %v2658_v26, %v2656_v20 }
 0x320   : > { %v2631_v32 = vmax.f32 %v2556_v30, 0.0  ;;  %2508 = vmatmul.bf16.gmra.mxu2 %v4975_v41 }
 0x321   : > { %2597 = vmatmul.bf16.gmra.mxu3 %v4984_v52  ;;  %v2415_v54 = vpop.f32.mrf.mxu1 }
 0x322   : > { %v2683_v53 = vpack.c.bf16 %v2631_v32, %v2629_v63  ;;  %v2416_v44 = vadd.f32 %v2415_v54, %v2327_v9  ;;  %v2328_v22 = vpop.f32.mrf.mxu0 }
 0x323   : > { %v2469_v60 = vpop.f32.mrf.mxu2  ;;  %v2329_v59 = vadd.f32 %v2328_v22, %v4824_v51 }
 0x324   : > { %v2558_v14 = vpop.f32.mrf.mxu3  ;;  %2958 = vmatmul.bf16.gmra.mxu1 %v2683_v53  ;;  %v2470_v25 = vadd.f32 %v2469_v60, %v5006_v31  ;;  %v2660_v3 = vmax.f32 %v2416_v44, 0.0  ;;  %v5094_v60 = vld [vmem:[%s5202_s9] ss:$0 sm:$0xff] }
 0x326   : > { %v2559_v41 = vadd.f32 %v2558_v14, %v2470_v25 }
 0x328   : > { %v2633_v24 = vmax.f32 %v2559_v41, 0.0 }
 0x329   : > { %v2417_v6 = vpop.f32.mrf.mxu1 }
 0x32a   : > { %v2418_v40 = vadd.f32 %v2417_v6, %v2329_v59  ;;  %v2331_v47 = vpop.f32.mrf.mxu0 }
 0x32b   : > { %v2471_v49 = vpop.f32.mrf.mxu2  ;;  %v2332_v57 = vadd.f32 %v2331_v47, %v4824_v51 }
 0x32c   : > { %v2560_v16 = vpop.f32.mrf.mxu3  ;;  %v2662_v36 = vmax.f32 %v2418_v40, 0.0  ;;  %v2472_v52 = vadd.f32 %v2471_v49, %v5006_v31 }
 0x32d   : > { %2874 = vmatmul.bf16.gmra.mxu0 %v4993_v43 }
 0x32e   : > { %v2561_v33 = vadd.f32 %v2560_v16, %v2472_v52  ;;  %v5076_v18 = vpack.c.bf16 %v2662_v36, %v2660_v3 }
 0x330   : > { %v2635_v34 = vmax.f32 %v2561_v33, 0.0  ;;  %2513 = vmatmul.bf16.gmra.mxu2 %v4991_v35 }
 0x331   : > { %2602 = vmatmul.bf16.gmra.mxu3 %v5002_v10  ;;  %v2420_v21 = vpop.f32.mrf.mxu1 }
 0x332   : > { %v2685_v12 = vpack.c.bf16 %v2635_v34, %v2633_v24  ;;  %v2421_v1 = vadd.f32 %v2420_v21, %v2332_v57  ;;  %v2333_v55 = vpop.f32.mrf.mxu0 }
 0x333   : > { %v2474_v61 = vpop.f32.mrf.mxu2  ;;  %v2334_v43 = vadd.f32 %v2333_v55, %v4824_v51 }
 0x334   : > { %v2563_v62 = vpop.f32.mrf.mxu3  ;;  %2963 = vmatmul.bf16.gmra.mxu1 %v2685_v12  ;;  %v2475_v13 = vadd.f32 %v2474_v61, %v5006_v31  ;;  %v2664_v27 = vmax.f32 %v2421_v1, 0.0 }
 0x336   : > { %v2564_v35 = vadd.f32 %v2563_v62, %v2475_v13 }
 0x338   : > { %v2637_v17 = vmax.f32 %v2564_v35, 0.0 }
 0x339   : > { %v2422_v11 = vpop.f32.mrf.mxu1 }
 0x33a   : > { %v2423_v23 = vadd.f32 %v2422_v11, %v2334_v43  ;;  %v2336_v37 = vpop.f32.mrf.mxu0 }
 0x33b   : > { %v2476_v42 = vpop.f32.mrf.mxu2  ;;  %v2337_v19 = vadd.f32 %v2336_v37, %v4824_v51 }
 0x33c   : > { %v2565_v7 = vpop.f32.mrf.mxu3  ;;  %v2666_v46 = vmax.f32 %v2423_v23, 0.0  ;;  %v2477_v10 = vadd.f32 %v2476_v42, %v5006_v31 }
 0x33d   : > { %2879 = vmatmul.bf16.gmra.mxu0 %v5013_v0 }
 0x33e   : > { %v2566_v39 = vadd.f32 %v2565_v7, %v2477_v10  ;;  %v5085_v48 = vpack.c.bf16 %v2666_v46, %v2664_v27 }
 0x340   : > { %v2639_v56 = vmax.f32 %v2566_v39, 0.0 }
 0x341   : > { %v2425_v2 = vpop.f32.mrf.mxu1 }
 0x342   : > { %v2687_v8 = vpack.c.bf16 %v2639_v56, %v2637_v17  ;;  %v2426_v38 = vadd.f32 %v2425_v2, %v2337_v19  ;;  %v2338_v58 = vpop.f32.mrf.mxu0 }
 0x343   : > { %v2479_v20 = vpop.f32.mrf.mxu2  ;;  %v2339_v26 = vadd.f32 %v2338_v58, %v4824_v51 }
 0x344   : > { %v2568_v4 = vpop.f32.mrf.mxu3  ;;  %2968 = vmatmul.bf16.gmra.mxu1 %v2687_v8  ;;  %v2480_v28 = vadd.f32 %v2479_v20, %v5006_v31  ;;  %v2668_v54 = vmax.f32 %v2426_v38, 0.0 }
 0x346   : > { %v2569_v53 = vadd.f32 %v2568_v4, %v2480_v28 }
 0x348   : > { %v2641_v59 = vmax.f32 %v2569_v53, 0.0 }
 0x349   : > { %v2427_v30 = vpop.f32.mrf.mxu1 }
 0x34a   : > { %v2428_v0 = vadd.f32 %v2427_v30, %v2339_v26  ;;  %v2845_v63 = vpop.f32.mrf.mxu0 }
 0x34b   : > { %v2481_v9 = vpop.f32.mrf.mxu2  ;;  %v2846_v6 = vadd.f32 %v5094_v60, %v2845_v63 }
 0x34c   : > { %v2570_v32 = vpop.f32.mrf.mxu3  ;;  %v2670_v44 = vmax.f32 %v2428_v0, 0.0  ;;  %v2482_v22 = vadd.f32 %v2481_v9, %v5006_v31 }
 0x34d   : > { %2884 = vmatmul.bf16.gmra.mxu0 %v5025_v29 }
 0x34e   : > { %v2571_v51 = vadd.f32 %v2570_v32, %v2482_v22  ;;  %v5097_v14 = vpack.c.bf16 %v2670_v44, %v2668_v54 }
 0x350   : > { %v2643_v25 = vmax.f32 %v2571_v51, 0.0 }
 0x351   : > { %v2934_v40 = vpop.f32.mrf.mxu1 }
 0x352   : > { %v2689_v47 = vpack.c.bf16 %v2643_v25, %v2641_v59  ;;  %v2935_v49 = vadd.f32 %v2934_v40, %v2846_v6  ;;  %v2847_v16 = vpop.f32.mrf.mxu0 }
 0x353   : > { %v2484_v3 = vpop.f32.mrf.mxu2  ;;  %v2848_v36 = vadd.f32 %v5094_v60, %v2847_v16 }
 0x354   : > { %v2573_v29 = vpop.f32.mrf.mxu3  ;;  %3014 = vst [vmem:[%s5104_s22] sm:$0xff] %v2935_v49  ;;  %2973 = vmatmul.bf16.gmra.mxu1 %v2689_v47  ;;  %v2485_v41 = vadd.f32 %v2484_v3, %v5006_v31 }
 0x356   : > { %v2574_v21 = vadd.f32 %v2573_v29, %v2485_v41 }
 0x358   : > { %v2645_v55 = vmax.f32 %v2574_v21, 0.0 }
 0x359   : > { %v2936_v52 = vpop.f32.mrf.mxu1 }
 0x35a   : > { %v2937_v33 = vadd.f32 %v2936_v52, %v2848_v36  ;;  %v2850_v24 = vpop.f32.mrf.mxu0 }
 0x35b   : > { %v2486_v57 = vpop.f32.mrf.mxu2  ;;  %v2851_v62 = vadd.f32 %v5094_v60, %v2850_v24 }
 0x35c   : > { %v2575_v34 = vpop.f32.mrf.mxu3  ;;  %3015 = vst [vmem:[%s5104_s22 + $0x8] sm:$0xff] %v2937_v33  ;;  %v2487_v12 = vadd.f32 %v2486_v57, %v5006_v31 }
 0x35d   : > { %2889 = vmatmul.bf16.gmra.mxu0 %v5037_v5 }
 0x35e   : > { %v2576_v1 = vadd.f32 %v2575_v34, %v2487_v12 }
 0x360   : > { %v2647_v61 = vmax.f32 %v2576_v1, 0.0 }
 0x361   : > { %v2939_v43 = vpop.f32.mrf.mxu1 }
 0x362   : > { %v2691_v13 = vpack.c.bf16 %v2647_v61, %v2645_v55  ;;  %v2940_v11 = vadd.f32 %v2939_v43, %v2851_v62  ;;  %v2852_v23 = vpop.f32.mrf.mxu0 }
 0x363   : > { %v2489_v37 = vpop.f32.mrf.mxu2  ;;  %v2853_v27 = vadd.f32 %v5094_v60, %v2852_v23 }
 0x364   : > { %v2578_v42 = vpop.f32.mrf.mxu3  ;;  %3016 = vst [vmem:[%s5104_s22 + $0x10] sm:$0xff] %v2940_v11  ;;  %2978 = vmatmul.bf16.gmra.mxu1 %v2691_v13  ;;  %v2490_v7 = vadd.f32 %v2489_v37, %v5006_v31 }
 0x366   : > { %v2579_v17 = vadd.f32 %v2578_v42, %v2490_v7 }
 0x368   : > { %v2649_v2 = vmax.f32 %v2579_v17, 0.0 }
 0x369   : > { %v2941_v35 = vpop.f32.mrf.mxu1 }
 0x36a   : > { %v2942_v5 = vadd.f32 %v2941_v35, %v2853_v27  ;;  %v2855_v46 = vpop.f32.mrf.mxu0 }
 0x36b   : > { %v2491_v10 = vpop.f32.mrf.mxu2  ;;  %v2856_v38 = vadd.f32 %v5094_v60, %v2855_v46 }
 0x36c   : > { %v2580_v39 = vpop.f32.mrf.mxu3  ;;  %3017 = vst [vmem:[%s5104_s22 + $0x18] sm:$0xff] %v2942_v5  ;;  %v2492_v19 = vadd.f32 %v2491_v10, %v5006_v31 }
 0x36d   : > { %2894 = vmatmul.bf16.gmra.mxu0 %v5049_v50 }
 0x36e   : > { %v2581_v56 = vadd.f32 %v2580_v39, %v2492_v19 }
 0x370   : > { %v2651_v8 = vmax.f32 %v2581_v56, 0.0 }
 0x371   : > { %v2944_v58 = vpop.f32.mrf.mxu1 }
 0x372   : > { %v2693_v20 = vpack.c.bf16 %v2651_v8, %v2649_v2  ;;  %v2945_v4 = vadd.f32 %v2944_v58, %v2856_v38  ;;  %v2857_v26 = vpop.f32.mrf.mxu0 }
 0x373   : > { %v2494_v28 = vpop.f32.mrf.mxu2  ;;  %v2858_v63 = vadd.f32 %v5094_v60, %v2857_v26 }
 0x374   : > { %v2583_v30 = vpop.f32.mrf.mxu3  ;;  %3018 = vst [vmem:[%s5104_s22 + $0x20] sm:$0xff] %v2945_v4  ;;  %2983 = vmatmul.bf16.gmra.mxu1 %v2693_v20  ;;  %v2495_v0 = vadd.f32 %v2494_v28, %v5006_v31 }
 0x376   : > { %v2584_v44 = vadd.f32 %v2583_v30, %v2495_v0 }
 0x378   : > { %v2653_v59 = vmax.f32 %v2584_v44, 0.0 }
 0x379   : > { %v2946_v9 = vpop.f32.mrf.mxu1 }
 0x37a   : > { %v2947_v50 = vadd.f32 %v2946_v9, %v2858_v63  ;;  %v2860_v32 = vpop.f32.mrf.mxu0 }
 0x37b   : > { %v2496_v54 = vpop.f32.mrf.mxu2  ;;  %v2861_v6 = vadd.f32 %v5094_v60, %v2860_v32 }
 0x37c   : > { %v2585_v53 = vpop.f32.mrf.mxu3  ;;  %3019 = vst [vmem:[%s5104_s22 + $0x28] sm:$0xff] %v2947_v50  ;;  %v2497_v22 = vadd.f32 %v2496_v54, %v5006_v31 }
 0x37d   : > { %2899 = vmatmul.bf16.gmra.mxu0 %v5058_v15 }
 0x37e   : > { %v2586_v51 = vadd.f32 %v2585_v53, %v2497_v22 }
 0x380   : > { %v2655_v25 = vmax.f32 %v2586_v51, 0.0 }
 0x381   : > { %v2949_v40 = vpop.f32.mrf.mxu1 }
 0x382   : > { %v2695_v47 = vpack.c.bf16 %v2655_v25, %v2653_v59  ;;  %v2950_v49 = vadd.f32 %v2949_v40, %v2861_v6  ;;  %v2862_v16 = vpop.f32.mrf.mxu0 }
 0x383   : > { %v2499_v3 = vpop.f32.mrf.mxu2  ;;  %v2863_v36 = vadd.f32 %v5094_v60, %v2862_v16 }
 0x384   : > { %v2588_v29 = vpop.f32.mrf.mxu3  ;;  %3020 = vst [vmem:[%s5104_s22 + $0x30] sm:$0xff] %v2950_v49  ;;  %2988 = vmatmul.bf16.gmra.mxu1 %v2695_v47  ;;  %v2500_v41 = vadd.f32 %v2499_v3, %v5006_v31 }
 0x386   : > { %v2589_v34 = vadd.f32 %v2588_v29, %v2500_v41 }
 0x388   : > { %v2657_v1 = vmax.f32 %v2589_v34, 0.0 }
 0x389   : > { %v2951_v52 = vpop.f32.mrf.mxu1 }
 0x38a   : > { %v2952_v15 = vadd.f32 %v2951_v52, %v2863_v36  ;;  %v2865_v33 = vpop.f32.mrf.mxu0 }
 0x38b   : > { %v2501_v24 = vpop.f32.mrf.mxu2  ;;  %v2866_v61 = vadd.f32 %v5094_v60, %v2865_v33 }
 0x38c   : > { %v2590_v57 = vpop.f32.mrf.mxu3  ;;  %3021 = vst [vmem:[%s5104_s22 + $0x38] sm:$0xff] %v2952_v15  ;;  %v2502_v21 = vadd.f32 %v2501_v24, %v5006_v31 }
 0x38d   : > { %2904 = vmatmul.bf16.gmra.mxu0 %v5067_v45 }
 0x38e   : > { %v2591_v12 = vadd.f32 %v2590_v57, %v2502_v21 }
 0x390   : > { %v2659_v55 = vmax.f32 %v2591_v12, 0.0 }
 0x391   : > { %v2954_v62 = vpop.f32.mrf.mxu1 }
 0x392   : > { %v2697_v43 = vpack.c.bf16 %v2659_v55, %v2657_v1  ;;  %v2955_v13 = vadd.f32 %v2954_v62, %v2866_v61  ;;  %v2867_v11 = vpop.f32.mrf.mxu0 }
 0x393   : > { %v2504_v23 = vpop.f32.mrf.mxu2  ;;  %v2868_v7 = vadd.f32 %v5094_v60, %v2867_v11 }
 0x394   : > { %v2593_v37 = vpop.f32.mrf.mxu3  ;;  %3022 = vst [vmem:[%s5104_s22 + $0x40] sm:$0xff] %v2955_v13  ;;  %2993 = vmatmul.bf16.gmra.mxu1 %v2697_v43  ;;  %v2505_v42 = vadd.f32 %v2504_v23, %v5006_v31 }
 0x396   : > { %v2594_v10 = vadd.f32 %v2593_v37, %v2505_v42 }
 0x398   : > { %v2661_v19 = vmax.f32 %v2594_v10, 0.0 }
 0x399   : > { %v2956_v27 = vpop.f32.mrf.mxu1 }
 0x39a   : > { %v2957_v45 = vadd.f32 %v2956_v27, %v2868_v7  ;;  %v2870_v35 = vpop.f32.mrf.mxu0 }
 0x39b   : > { %v2506_v5 = vpop.f32.mrf.mxu2  ;;  %v2871_v2 = vadd.f32 %v5094_v60, %v2870_v35 }
 0x39c   : > { %v2595_v46 = vpop.f32.mrf.mxu3  ;;  %3023 = vst [vmem:[%s5104_s22 + $0x48] sm:$0xff] %v2957_v45  ;;  %v2507_v39 = vadd.f32 %v2506_v5, %v5006_v31 }
 0x39d   : > { %2909 = vmatmul.bf16.gmra.mxu0 %v5076_v18 }
 0x39e   : > { %v2596_v17 = vadd.f32 %v2595_v46, %v2507_v39 }
 0x3a0   : > { %v2663_v56 = vmax.f32 %v2596_v17, 0.0 }
 0x3a1   : > { %v2959_v8 = vpop.f32.mrf.mxu1 }
 0x3a2   : > { %v2699_v38 = vpack.c.bf16 %v2663_v56, %v2661_v19  ;;  %v2960_v58 = vadd.f32 %v2959_v8, %v2871_v2  ;;  %v2872_v20 = vpop.f32.mrf.mxu0 }
 0x3a3   : > { %v2509_v4 = vpop.f32.mrf.mxu2  ;;  %v2873_v30 = vadd.f32 %v5094_v60, %v2872_v20 }
 0x3a4   : > { %v2598_v26 = vpop.f32.mrf.mxu3  ;;  %3024 = vst [vmem:[%s5104_s22 + $0x50] sm:$0xff] %v2960_v58  ;;  %2998 = vmatmul.bf16.gmra.mxu1 %v2699_v38  ;;  %v2510_v28 = vadd.f32 %v2509_v4, %v5006_v31 }
 0x3a6   : > { %v2599_v32 = vadd.f32 %v2598_v26, %v2510_v28 }
 0x3a8   : > { %v2665_v44 = vmax.f32 %v2599_v32, 0.0 }
 0x3a9   : > { %v2961_v0 = vpop.f32.mrf.mxu1 }
 0x3aa   : > { %v2962_v18 = vadd.f32 %v2961_v0, %v2873_v30  ;;  %v2875_v63 = vpop.f32.mrf.mxu0 }
 0x3ab   : > { %v2511_v9 = vpop.f32.mrf.mxu2  ;;  %v2876_v51 = vadd.f32 %v5094_v60, %v2875_v63 }
 0x3ac   : > { %v2600_v50 = vpop.f32.mrf.mxu3  ;;  %3025 = vst [vmem:[%s5104_s22 + $0x58] sm:$0xff] %v2962_v18  ;;  %v2512_v54 = vadd.f32 %v2511_v9, %v5006_v31 }
 0x3ad   : > { %2914 = vmatmul.bf16.gmra.mxu0 %v5085_v48 }
 0x3ae   : > { %v2601_v53 = vadd.f32 %v2600_v50, %v2512_v54 }
 0x3b0   : > { %v2667_v22 = vmax.f32 %v2601_v53, 0.0 }
 0x3b1   : > { %v2964_v59 = vpop.f32.mrf.mxu1 }
 0x3b2   : > { %v2701_v25 = vpack.c.bf16 %v2667_v22, %v2665_v44  ;;  %v2965_v6 = vadd.f32 %v2964_v59, %v2876_v51  ;;  %v2877_v40 = vpop.f32.mrf.mxu0 }
 0x3b3   : > { %v2514_v47 = vpop.f32.mrf.mxu2  ;;  %v2878_v3 = vadd.f32 %v5094_v60, %v2877_v40 }
 0x3b4   : > { %v2603_v49 = vpop.f32.mrf.mxu3  ;;  %3026 = vst [vmem:[%s5104_s22 + $0x60] sm:$0xff] %v2965_v6  ;;  %3003 = vmatmul.bf16.gmra.mxu1 %v2701_v25  ;;  %v2515_v16 = vadd.f32 %v2514_v47, %v5006_v31 }
 0x3b6   : > { %v2604_v52 = vadd.f32 %v2603_v49, %v2515_v16 }
 0x3b8   : > { %v2669_v57 = vmax.f32 %v2604_v52, 0.0 }
 0x3b9   : > { %v2966_v29 = vpop.f32.mrf.mxu1 }
 0x3ba   : > { %v2967_v48 = vadd.f32 %v2966_v29, %v2878_v3  ;;  %v2880_v41 = vpop.f32.mrf.mxu0 }
 0x3bb   : > { %v2516_v36 = vpop.f32.mrf.mxu2  ;;  %v2881_v21 = vadd.f32 %v5094_v60, %v2880_v41 }
 0x3bc   : > { %3027 = vst [vmem:[%s5104_s22 + $0x68] sm:$0xff] %v2967_v48  ;;  %v2517_v15 = vadd.f32 %v2516_v36, %v5006_v31  ;;  %v2605_v33 = vpop.f32.mrf.mxu3 }
 0x3bd   : > { %2919 = vmatmul.bf16.gmra.mxu0 %v5097_v14 }
 0x3be   : > { %v2606_v24 = vadd.f32 %v2605_v33, %v2517_v15 }
 0x3c0   : > { %v2671_v34 = vmax.f32 %v2606_v24, 0.0 }
 0x3c1   : > { %v2969_v12 = vpop.f32.mrf.mxu1 }
 0x3c2   : > { %v2703_v1 = vpack.c.bf16 %v2671_v34, %v2669_v57  ;;  %v2970_v55 = vadd.f32 %v2969_v12, %v2881_v21  ;;  %v2882_v61 = vpop.f32.mrf.mxu0 }
 0x3c3   : > { %v2883_v62 = vadd.f32 %v5094_v60, %v2882_v61 }
 0x3c4   : > { %3028 = vst [vmem:[%s5104_s22 + $0x70] sm:$0xff] %v2970_v55  ;;  %3008 = vmatmul.bf16.gmra.mxu1 %v2703_v1 }
 0x3c9   : > { %v2971_v31 = vpop.f32.mrf.mxu1 }
 0x3ca   : > { %v2972_v43 = vadd.f32 %v2971_v31, %v2883_v62  ;;  %v2885_v13 = vpop.f32.mrf.mxu0 }
 0x3cb   : > { %v2886_v14 = vadd.f32 %v5094_v60, %v2885_v13 }
 0x3cc   : > { %3029 = vst [vmem:[%s5104_s22 + $0x78] sm:$0xff] %v2972_v43 }
 0x3d1   : > { %v2974_v11 = vpop.f32.mrf.mxu1 }
 0x3d2   : > { %v2975_v23 = vadd.f32 %v2974_v11, %v2886_v14  ;;  %v2887_v37 = vpop.f32.mrf.mxu0 }
 0x3d3   : > { %v2888_v42 = vadd.f32 %v5094_v60, %v2887_v37 }
 0x3d4   : > { %3030 = vst [vmem:[%s5104_s22 + $0x80] sm:$0xff] %v2975_v23 }
 0x3d9   : > { %v2976_v7 = vpop.f32.mrf.mxu1 }
 0x3da   : > { %v2977_v27 = vadd.f32 %v2976_v7, %v2888_v42  ;;  %v2890_v45 = vpop.f32.mrf.mxu0 }
 0x3db   : > { %v2891_v35 = vadd.f32 %v5094_v60, %v2890_v45 }
 0x3dc   : > { %3031 = vst [vmem:[%s5104_s22 + $0x88] sm:$0xff] %v2977_v27 }
 0x3e1   : > { %v2979_v5 = vpop.f32.mrf.mxu1 }
 0x3e2   : > { %v2980_v46 = vadd.f32 %v2979_v5, %v2891_v35  ;;  %v2892_v10 = vpop.f32.mrf.mxu0 }
 0x3e3   : > { %v2893_v39 = vadd.f32 %v5094_v60, %v2892_v10 }
 0x3e4   : > { %3032 = vst [vmem:[%s5104_s22 + $0x90] sm:$0xff] %v2980_v46 }
 0x3e9   : > { %v2981_v17 = vpop.f32.mrf.mxu1 }
 0x3ea   : > { %v2982_v19 = vadd.f32 %v2981_v17, %v2893_v39  ;;  %v2895_v56 = vpop.f32.mrf.mxu0 }
 0x3eb   : > { %v2896_v2 = vadd.f32 %v5094_v60, %v2895_v56 }
 0x3ec   : > { %3033 = vst [vmem:[%s5104_s22 + $0x98] sm:$0xff] %v2982_v19 }
 0x3f1   : > { %v2984_v8 = vpop.f32.mrf.mxu1 }
 0x3f2   : > { %v2985_v38 = vadd.f32 %v2984_v8, %v2896_v2  ;;  %v2897_v58 = vpop.f32.mrf.mxu0 }
 0x3f3   : > { %v2898_v20 = vadd.f32 %v5094_v60, %v2897_v58 }
 0x3f4   : > { %3034 = vst [vmem:[%s5104_s22 + $0xa0] sm:$0xff] %v2985_v38 }
 0x3f9   : > { %v2986_v4 = vpop.f32.mrf.mxu1 }
 0x3fa   : > { %v2987_v26 = vadd.f32 %v2986_v4, %v2898_v20  ;;  %v2900_v28 = vpop.f32.mrf.mxu0 }
 0x3fb   : > { %v2901_v30 = vadd.f32 %v5094_v60, %v2900_v28 }
 0x3fc   : > { %3035 = vst [vmem:[%s5104_s22 + $0xa8] sm:$0xff] %v2987_v26 }
 0x401   : > { %v2989_v0 = vpop.f32.mrf.mxu1 }
 0x402   : > { %v2990_v18 = vadd.f32 %v2989_v0, %v2901_v30  ;;  %v2902_v63 = vpop.f32.mrf.mxu0 }
 0x403   : > { %v2903_v9 = vadd.f32 %v5094_v60, %v2902_v63 }
 0x404   : > { %3036 = vst [vmem:[%s5104_s22 + $0xb0] sm:$0xff] %v2990_v18 }
 0x409   : > { %v2991_v50 = vpop.f32.mrf.mxu1 }
 0x40a   : > { %v2992_v32 = vadd.f32 %v2991_v50, %v2903_v9  ;;  %v2905_v54 = vpop.f32.mrf.mxu0 }
 0x40b   : > { %v2906_v53 = vadd.f32 %v5094_v60, %v2905_v54 }
 0x40c   : > { %3037 = vst [vmem:[%s5104_s22 + $0xb8] sm:$0xff] %v2992_v32 }
 0x411   : > { %v2994_v44 = vpop.f32.mrf.mxu1 }
 0x412   : > { %v2995_v22 = vadd.f32 %v2994_v44, %v2906_v53  ;;  %v2907_v51 = vpop.f32.mrf.mxu0 }
 0x413   : > { %v2908_v59 = vadd.f32 %v5094_v60, %v2907_v51 }
 0x414   : > { %3038 = vst [vmem:[%s5104_s22 + $0xc0] sm:$0xff] %v2995_v22 }
 0x419   : > { %v2996_v25 = vpop.f32.mrf.mxu1 }
 0x41a   : > { %v2997_v6 = vadd.f32 %v2996_v25, %v2908_v59  ;;  %v2910_v40 = vpop.f32.mrf.mxu0 }
 0x41b   : > { %v2911_v47 = vadd.f32 %v5094_v60, %v2910_v40 }
 0x41c   : > { %3039 = vst [vmem:[%s5104_s22 + $0xc8] sm:$0xff] %v2997_v6 }
 0x421   : > { %v2999_v49 = vpop.f32.mrf.mxu1 }
 0x422   : > { %v3000_v16 = vadd.f32 %v2999_v49, %v2911_v47  ;;  %v2912_v3 = vpop.f32.mrf.mxu0 }
 0x423   : > { %v2913_v29 = vadd.f32 %v5094_v60, %v2912_v3 }
 0x424   : > { %3040 = vst [vmem:[%s5104_s22 + $0xd0] sm:$0xff] %v3000_v16 }
 0x429   : > { %v3001_v48 = vpop.f32.mrf.mxu1 }
 0x42a   : > { %v3002_v41 = vadd.f32 %v3001_v48, %v2913_v29  ;;  %v2915_v36 = vpop.f32.mrf.mxu0 }
 0x42b   : > { %v2916_v52 = vadd.f32 %v5094_v60, %v2915_v36 }
 0x42c   : > { %3041 = vst [vmem:[%s5104_s22 + $0xd8] sm:$0xff] %v3002_v41 }
 0x431   : > { %v3004_v15 = vpop.f32.mrf.mxu1 }
 0x432   : > { %v3005_v33 = vadd.f32 %v3004_v15, %v2916_v52  ;;  %v2917_v24 = vpop.f32.mrf.mxu0 }
 0x433   : > { %v2918_v57 = vadd.f32 %v5094_v60, %v2917_v24 }
 0x434   : > { %3042 = vst [vmem:[%s5104_s22 + $0xe0] sm:$0xff] %v3005_v33 }
 0x439   : > { %v3006_v34 = vpop.f32.mrf.mxu1 }
 0x43a   : > { %v3007_v21 = vadd.f32 %v3006_v34, %v2918_v57  ;;  %v2920_v12 = vpop.f32.mrf.mxu0 }
 0x43b   : > { %v2921_v1 = vadd.f32 %v5094_v60, %v2920_v12 }
 0x43c   : > { %3043 = vst [vmem:[%s5104_s22 + $0xe8] sm:$0xff] %v3007_v21 }
 0x441   : > { %v3009_v55 = vpop.f32.mrf.mxu1 }
 0x442   : > { %v3010_v61 = vadd.f32 %v3009_v55, %v2921_v1  ;;  %v2922_v62 = vpop.f32.mrf.mxu0 }
 0x443   : > { %v2923_v31 = vadd.f32 %v5094_v60, %v2922_v62 }
 0x444   : > { %3044 = vst [vmem:[%s5104_s22 + $0xf0] sm:$0xff] %v3010_v61 }
 0x449   : > { %v3011_v43 = vpop.f32.mrf.mxu1 }
 0x44a   : > { %v3012_v13 = vadd.f32 %v3011_v43, %v2923_v31 }
 0x44c   : > { %3045 = vst [vmem:[%s5104_s22 + $0xf8] sm:$0xff] %v3012_v13 }
 0x44d PF: > { %s20_s13 = sadd.s32 1, %s3621_s13  }
 0x44e   : > { %p17_p4 = scmp.ge.s32.totalorder %s20_s13, 4  }
 0x450   :  { %19 = sbr.rel (!%p17_p4) target bundleno = 1 (0x1), region = 93 }

</bundles_post_ra>
